<compile_context>
chip_gen: v7x
topology: tpu7x:2x2x1
jax: 0.10.0
libtpu: 0.0.40
codegen_flags: <defaults>
</compile_context>

<pallas_src>
import jax
import jax.numpy as jnp
from jax import lax
from jax.experimental import pallas as pl
from jax.experimental.pallas import tpu as pltpu


# ----------------------------------------------------------------------------
# Bilinear (align_corners=True) upsample-by-2 + zero-pad, as a matrix.
# ----------------------------------------------------------------------------
def _upsample_matrix(n_in, n_out):
    # rows: output index, cols: input index; PyTorch align_corners=True mapping
    s = jnp.arange(n_out, dtype=jnp.float32) * (float(n_in - 1) / float(n_out - 1))
    i0 = jnp.floor(s).astype(jnp.int32)
    i1 = jnp.minimum(i0 + 1, n_in - 1)
    t = s - i0.astype(jnp.float32)
    return (jax.nn.one_hot(i0, n_in, dtype=jnp.float32) * (1.0 - t)[:, None]
            + jax.nn.one_hot(i1, n_in, dtype=jnp.float32) * t[:, None])


def _up_pad_matrix(n_in, n_out_total):
    # upsample to 2*n_in then zero-pad (left = dif//2) to n_out_total,
    # matching F.pad(x, [dif//2, dif - dif//2, ...]) with zeros.
    n_up = 2 * n_in
    dif = n_out_total - n_up
    assert dif >= 0, "x2 spatial size must be >= 2x x1 spatial size"
    m = _upsample_matrix(n_in, n_up)
    return jnp.pad(m, ((dif // 2, dif - dif // 2), (0, 0)))


def _fold_bn_into_conv(w_oihw, conv_b, gamma, beta, mean, var, eps=1e-5):
    scale = gamma / jnp.sqrt(var + eps)                    # (Cout,)
    w_f = w_oihw * scale[:, None, None, None]              # scale folded into W
    b_f = (conv_b - mean) * scale + beta
    return w_f, b_f


# ----------------------------------------------------------------------------
# Fused Pallas kernel (one batch image per grid step).
# ----------------------------------------------------------------------------
def _make_fused_kernel(C1, C2, Cmid, Cout, H1, W1, H2, W2):
    Cin = C1 + C2

    def kernel(x1_ref, x2_ref, uh_ref, uwt_ref, w1_ref, b1_ref, w2_ref, b2_ref,
               o_ref, xp_ref, hp_ref):
        # ---- bilinear upsample + pad of x1 via two small bf16 matmuls -------
        x1b = x1_ref[0].astype(jnp.bfloat16)                       # (C1,H1,W1)
        # contract W1 (minor axis): (C1*H1, W1) @ (W1, W2)
        r = jnp.dot(x1b.reshape(C1 * H1, W1), uwt_ref[...],
                    preferred_element_type=jnp.float32)
        r = r.reshape(C1, H1, W2).astype(jnp.bfloat16)
        # contract H1: bring it to the major axis (minor dim unchanged)
        r = jnp.transpose(r, (1, 0, 2)).reshape(H1, C1 * W2)
        a = jnp.dot(uh_ref[...], r, preferred_element_type=jnp.float32)
        x1u = jnp.transpose(a.reshape(H2, C1, W2), (1, 0, 2))      # (C1,H2,W2)

        # ---- pad=1 halo + channel concat ([x2, x1u]) into VMEM scratch ------
        # (zero every step: safe under "parallel" grid splitting across cores)
        xp_ref[...] = jnp.zeros(xp_ref.shape, xp_ref.dtype)
        xp_ref[0:C2, 1:H2 + 1, 1:W2 + 1] = x2_ref[0].astype(jnp.bfloat16)
        xp_ref[C2:Cin, 1:H2 + 1, 1:W2 + 1] = x1u.astype(jnp.bfloat16)

        # ---- conv1 + folded-BN + ReLU: single im2col matmul -----------------
        p1 = jnp.concatenate(
            [xp_ref[:, dy:dy + H2, dx:dx + W2].reshape(Cin, H2 * W2)
             for dy in range(3) for dx in range(3)], axis=0)        # (9Cin, HW)
        z1 = jnp.dot(w1_ref[...], p1, preferred_element_type=jnp.float32)
        h = jnp.maximum(z1 + b1_ref[...], 0.0)                      # (Cmid, HW)

        hp_ref[...] = jnp.zeros(hp_ref.shape, hp_ref.dtype)
        hp_ref[:, 1:H2 + 1, 1:W2 + 1] = (
            h.astype(jnp.bfloat16).reshape(Cmid, H2, W2))

        # ---- conv2 + folded-BN + ReLU ---------------------------------------
        p2 = jnp.concatenate(
            [hp_ref[:, dy:dy + H2, dx:dx + W2].reshape(Cmid, H2 * W2)
             for dy in range(3) for dx in range(3)], axis=0)        # (9Cmid, HW)
        z2 = jnp.dot(w2_ref[...], p2, preferred_element_type=jnp.float32)
        y = jnp.maximum(z2 + b2_ref[...], 0.0)                      # (Cout, HW)

        # lane-dense flat store, already in NCHW (c, h, w) flattening order
        o_ref[...] = y.reshape(1, 1, Cout * H2 * W2).astype(o_ref.dtype)

    return kernel


# ----------------------------------------------------------------------------
# Wrapper (NCHW in / NCHW out, no full-tensor relayout passes).
# ----------------------------------------------------------------------------
def upconv_forward(x1, x2, params):
    N, C1, H1, W1 = x1.shape
    N2, C2, H2, W2 = x2.shape
    assert N == N2
    Cin = C1 + C2
    Cmid = params["w1"].shape[0]
    Cout = params["w2"].shape[0]
    assert params["w1"].shape[1] == Cin and params["w2"].shape[1] == Cmid

    # interpolation matrices (upsample + pad folded in), bf16 for the MXU
    uh = _up_pad_matrix(H1, H2).astype(jnp.bfloat16)        # (H2, H1)
    uwt = _up_pad_matrix(W1, W2).T.astype(jnp.bfloat16)     # (W1, W2)

    # fold BN scale into the conv weights; reshape OIHW -> (Cout, 9*Cin)
    w1f, b1f = _fold_bn_into_conv(params["w1"], params["b1"], params["g1"],
                                  params["beta1"], params["m1"], params["v1"])
    w2f, b2f = _fold_bn_into_conv(params["w2"], params["b2"], params["g2"],
                                  params["beta2"], params["m2"], params["v2"])
    w1m = jnp.transpose(w1f, (0, 2, 3, 1)).reshape(Cmid, 9 * Cin).astype(jnp.bfloat16)
    w2m = jnp.transpose(w2f, (0, 2, 3, 1)).reshape(Cout, 9 * Cmid).astype(jnp.bfloat16)
    b1c = b1f.reshape(Cmid, 1).astype(jnp.float32)
    b2c = b2f.reshape(Cout, 1).astype(jnp.float32)

    kernel = _make_fused_kernel(C1, C2, Cmid, Cout, H1, W1, H2, W2)

    out_flat = pl.pallas_call(
        kernel,
        out_shape=jax.ShapeDtypeStruct((N, 1, Cout * H2 * W2), jnp.float32),
        grid=(N,),
        in_specs=[
            pl.BlockSpec((1, C1, H1, W1), lambda n: (n, 0, 0, 0)),   # x1 NCHW
            pl.BlockSpec((1, C2, H2, W2), lambda n: (n, 0, 0, 0)),   # x2 NCHW
            pl.BlockSpec((H2, H1), lambda n: (0, 0)),                # Uh
            pl.BlockSpec((W1, W2), lambda n: (0, 0)),                # Uw^T
            pl.BlockSpec((Cmid, 9 * Cin), lambda n: (0, 0)),         # W1 (folded)
            pl.BlockSpec((Cmid, 1), lambda n: (0, 0)),               # b1 (folded)
            pl.BlockSpec((Cout, 9 * Cmid), lambda n: (0, 0)),        # W2 (folded)
            pl.BlockSpec((Cout, 1), lambda n: (0, 0)),               # b2 (folded)
        ],
        out_specs=pl.BlockSpec((1, 1, Cout * H2 * W2), lambda n: (n, 0, 0)),
        scratch_shapes=[
            pltpu.VMEM((Cin, H2 + 2, W2 + 2), jnp.bfloat16),   # padded concat
            pltpu.VMEM((Cmid, H2 + 2, W2 + 2), jnp.bfloat16),  # padded mid act
        ],
        compiler_params=pltpu.CompilerParams(
            dimension_semantics=("parallel",),
            vmem_limit_bytes=32 * 1024 * 1024,
        ),
    )(x1, x2, uh, uwt, w1m, b1c, w2m, b2c)

    # flat CHW -> NCHW is a pure reshape (free), no transpose pass needed
    return out_flat.reshape(N, Cout, H2, W2)


# ----------------------------------------------------------------------------
# Pure-JAX reference mirroring the kernel's bf16/f32 precision choices.
# ----------------------------------------------------------------------------
def upconv_reference(x1, x2, params):
    N, C1, H1, W1 = x1.shape
    _, C2, H2, W2 = x2.shape
    uh = _up_pad_matrix(H1, H2).astype(jnp.bfloat16)   # (H2, H1)
    uw = _up_pad_matrix(W1, W2).astype(jnp.bfloat16)   # (W2, W1)

    x1b = x1.astype(jnp.bfloat16)
    r = jnp.einsum("nchq,wq->nchw", x1b, uw,
                   preferred_element_type=jnp.float32).astype(jnp.bfloat16)
    x1u = jnp.einsum("ncqw,hq->nchw", r, uh,
                     preferred_element_type=jnp.float32).astype(jnp.bfloat16)

    w1f, b1f = _fold_bn_into_conv(params["w1"], params["b1"], params["g1"],
                                  params["beta1"], params["m1"], params["v1"])
    w2f, b2f = _fold_bn_into_conv(params["w2"], params["b2"], params["g2"],
                                  params["beta2"], params["m2"], params["v2"])

    x = jnp.concatenate([x2.astype(jnp.bfloat16), x1u], axis=1)
    y = lax.conv_general_dilated(x, w1f.astype(jnp.bfloat16), (1, 1),
                                 ((1, 1), (1, 1)),
                                 dimension_numbers=("NCHW", "OIHW", "NCHW"),
                                 preferred_element_type=jnp.float32)
    y = jnp.maximum(y + b1f[None, :, None, None], 0.0).astype(jnp.bfloat16)
    y = lax.conv_general_dilated(y, w2f.astype(jnp.bfloat16), (1, 1),
                                 ((1, 1), (1, 1)),
                                 dimension_numbers=("NCHW", "OIHW", "NCHW"),
                                 preferred_element_type=jnp.float32)
    return jnp.maximum(y + b2f[None, :, None, None], 0.0)


# ----------------------------------------------------------------------------
# Main: deterministic synthetic inputs / params at small shapes.
# ----------------------------------------------------------------------------
if __name__ == "__main__":
    in_channels = 8                     # concat channels (x1: 4, x2: 4)
    mid_channels = in_channels // 2     # 4
    out_channels = 4
    N, H1, W1 = 2, 8, 8                 # x1 spatial; x2 is 2x (16x16)
    C1 = C2 = in_channels // 2
    H2, W2 = 2 * H1, 2 * W1

    key = jax.random.PRNGKey(0)
    ks = jax.random.split(key, 12)

    x1 = jax.random.normal(ks[0], (N, C1, H1, W1), jnp.float32)
    x2 = jax.random.normal(ks[1], (N, C2, H2, W2), jnp.float32)

    params = {
        # conv weights in PyTorch OIHW layout
        "w1": jax.random.normal(ks[2], (mid_channels, in_channels, 3, 3),
                                jnp.float32) * (1.0 / (9 * in_channels) ** 0.5),
        "b1": 0.1 * jax.random.normal(ks[3], (mid_channels,), jnp.float32),
        "g1": 1.0 + 0.1 * jax.random.normal(ks[4], (mid_channels,), jnp.float32),
        "beta1": 0.1 * jax.random.normal(ks[5], (mid_channels,), jnp.float32),
        "m1": 0.1 * jax.random.normal(ks[6], (mid_channels,), jnp.float32),
        "v1": 1.0 + 0.1 * jnp.abs(jax.random.normal(ks[7], (mid_channels,),
                                                    jnp.float32)),
        "w2": jax.random.normal(ks[8], (out_channels, mid_channels, 3, 3),
                                jnp.float32) * (1.0 / (9 * mid_channels) ** 0.5),
        "b2": 0.1 * jax.random.normal(ks[9], (out_channels,), jnp.float32),
        "g2": 1.0 + 0.1 * jax.random.normal(ks[10], (out_channels,), jnp.float32),
        "beta2": 0.1 * jax.random.normal(ks[11], (out_channels,), jnp.float32),
        "m2": jnp.zeros((out_channels,), jnp.float32),
        "v2": jnp.ones((out_channels,), jnp.float32),
    }

    out = jax.block_until_ready(jax.jit(upconv_forward)(x1, x2, params))
    ref = jax.block_until_ready(jax.jit(upconv_reference)(x1, x2, params))

    assert out.shape == (N, out_channels, H2, W2), out.shape
    assert bool(jnp.all(jnp.isfinite(out)))
    assert bool(jnp.all(out >= 0.0))            # ReLU output
    max_err = float(jnp.max(jnp.abs(out - ref)))
    assert max_err < 2e-2, f"max abs err vs reference: {max_err}"
    print("KERNEL_OK")
</pallas_src>

<mosaic_0001>
module attributes {stable_mosaic.version = 11 : i64} {
  func.func @kernel(%arg0: i32, %arg1: memref<1x4x8x8xf32, #tpu.memory_space<vmem>>, %arg2: memref<1x4x16x16xf32, #tpu.memory_space<vmem>>, %arg3: memref<16x8xbf16, #tpu.memory_space<vmem>>, %arg4: memref<8x16xbf16, #tpu.memory_space<vmem>>, %arg5: memref<4x72xbf16, #tpu.memory_space<vmem>>, %arg6: memref<4x1xf32, #tpu.memory_space<vmem>>, %arg7: memref<4x36xbf16, #tpu.memory_space<vmem>>, %arg8: memref<4x1xf32, #tpu.memory_space<vmem>>, %arg9: memref<1x1x1024xf32, #tpu.memory_space<vmem>>, %arg10: memref<8x18x18xbf16, #tpu.memory_space<vmem>>, %arg11: memref<4x18x18xbf16, #tpu.memory_space<vmem>>) attributes {dimension_semantics = [#tpu.dimension_semantics<parallel>], iteration_bounds = array<i64: 2>, scalar_prefetch = 0 : i64, scratch_operands = 2 : i64, tpu.core_type = #tpu.core_type<tc>, window_params = [{transform_indices = @transform_0, window_bounds = array<i64: 1, 4, 8, 8>}, {transform_indices = @transform_1, window_bounds = array<i64: 1, 4, 16, 16>}, {pipeline_mode = #tpu.pipeline_mode<synchronous>, transform_indices = @transform_2, window_bounds = array<i64: 16, 8>}, {pipeline_mode = #tpu.pipeline_mode<synchronous>, transform_indices = @transform_3, window_bounds = array<i64: 8, 16>}, {pipeline_mode = #tpu.pipeline_mode<synchronous>, transform_indices = @transform_4, window_bounds = array<i64: 4, 72>}, {pipeline_mode = #tpu.pipeline_mode<synchronous>, transform_indices = @transform_5, window_bounds = array<i64: 4, 1>}, {pipeline_mode = #tpu.pipeline_mode<synchronous>, transform_indices = @transform_6, window_bounds = array<i64: 4, 36>}, {pipeline_mode = #tpu.pipeline_mode<synchronous>, transform_indices = @transform_7, window_bounds = array<i64: 4, 1>}, {transform_indices = @transform_8, window_bounds = array<i64: 1, 1, 1024>}]} {
    %c0 = arith.constant 0 : index
    %c0_0 = arith.constant 0 : index
    %c0_1 = arith.constant 0 : index
    %c0_2 = arith.constant 0 : index
    %0 = vector.load %arg1[%c0, %c0_0, %c0_1, %c0_2] : memref<1x4x8x8xf32, #tpu.memory_space<vmem>>, vector<1x4x8x8xf32>
    %1 = vector.shape_cast %0 : vector<1x4x8x8xf32> to vector<4x8x8xf32>
    %2 = arith.truncf %1 : vector<4x8x8xf32> to vector<4x8x8xbf16>
    %3 = vector.shape_cast %2 : vector<4x8x8xbf16> to vector<32x8xbf16>
    %c0_3 = arith.constant 0 : index
    %c0_4 = arith.constant 0 : index
    %4 = vector.load %arg4[%c0_3, %c0_4] : memref<8x16xbf16, #tpu.memory_space<vmem>>, vector<8x16xbf16>
    %cst = arith.constant dense<0.000000e+00> : vector<32x16xf32>
    %5 = tpu.matmul %3, %4, %cst {dimension_numbers = #tpu.dot_dimension_numbers<[1], [0], [0], [1], [0, 0, 1, 1], [], []>} : vector<32x8xbf16>, vector<8x16xbf16>, vector<32x16xf32> -> vector<32x16xf32>
    %6 = vector.shape_cast %5 : vector<32x16xf32> to vector<4x8x16xf32>
    %7 = arith.truncf %6 : vector<4x8x16xf32> to vector<4x8x16xbf16>
    %8 = tpu.transpose %7, [1, 0, 2] : vector<4x8x16xbf16> -> vector<8x4x16xbf16>
    %9 = vector.shape_cast %8 : vector<8x4x16xbf16> to vector<8x64xbf16>
    %c0_5 = arith.constant 0 : index
    %c0_6 = arith.constant 0 : index
    %10 = vector.load %arg3[%c0_5, %c0_6] : memref<16x8xbf16, #tpu.memory_space<vmem>>, vector<16x8xbf16>
    %cst_7 = arith.constant dense<0.000000e+00> : vector<16x64xf32>
    %11 = tpu.matmul %10, %9, %cst_7 {dimension_numbers = #tpu.dot_dimension_numbers<[1], [0], [0], [1], [0, 0, 1, 1], [], []>} : vector<16x8xbf16>, vector<8x64xbf16>, vector<16x64xf32> -> vector<16x64xf32>
    %12 = vector.shape_cast %11 : vector<16x64xf32> to vector<16x4x16xf32>
    %13 = tpu.transpose %12, [1, 0, 2] : vector<16x4x16xf32> -> vector<4x16x16xf32>
    %cst_8 = arith.constant 0.000000e+00 : bf16
    %14 = vector.broadcast %cst_8 : bf16 to vector<8x18x18xbf16>
    %c0_9 = arith.constant 0 : index
    %c0_10 = arith.constant 0 : index
    %c0_11 = arith.constant 0 : index
    %15 = vector.load %arg10[%c0_9, %c0_10, %c0_11] : memref<8x18x18xbf16, #tpu.memory_space<vmem>>, vector<8x18x18xbf16>
    tpu.vector_store %arg10[%c0_9, %c0_10, %c0_11], %14 {strides = array<i32>} : memref<8x18x18xbf16, #tpu.memory_space<vmem>>, vector<8x18x18xbf16>,
    %c0_12 = arith.constant 0 : index
    %c0_13 = arith.constant 0 : index
    %c0_14 = arith.constant 0 : index
    %c0_15 = arith.constant 0 : index
    %16 = vector.load %arg2[%c0_12, %c0_13, %c0_14, %c0_15] : memref<1x4x16x16xf32, #tpu.memory_space<vmem>>, vector<1x4x16x16xf32>
    %17 = vector.shape_cast %16 : vector<1x4x16x16xf32> to vector<4x16x16xf32>
    %18 = arith.truncf %17 : vector<4x16x16xf32> to vector<4x16x16xbf16>
    %c0_16 = arith.constant 0 : index
    %c1 = arith.constant 1 : index
    %c1_17 = arith.constant 1 : index
    %19 = vector.load %arg10[%c0_16, %c1, %c1_17] : memref<8x18x18xbf16, #tpu.memory_space<vmem>>, vector<4x16x16xbf16>
    tpu.vector_store %arg10[%c0_16, %c1, %c1_17], %18 {strides = array<i32>} : memref<8x18x18xbf16, #tpu.memory_space<vmem>>, vector<4x16x16xbf16>,
    %20 = arith.truncf %13 : vector<4x16x16xf32> to vector<4x16x16xbf16>
    %c4 = arith.constant 4 : index
    %c1_18 = arith.constant 1 : index
    %c1_19 = arith.constant 1 : index
    %21 = vector.load %arg10[%c4, %c1_18, %c1_19] : memref<8x18x18xbf16, #tpu.memory_space<vmem>>, vector<4x16x16xbf16>
    tpu.vector_store %arg10[%c4, %c1_18, %c1_19], %20 {strides = array<i32>} : memref<8x18x18xbf16, #tpu.memory_space<vmem>>, vector<4x16x16xbf16>,
    %c0_20 = arith.constant 0 : index
    %c0_21 = arith.constant 0 : index
    %c0_22 = arith.constant 0 : index
    %22 = vector.load %arg10[%c0_20, %c0_21, %c0_22] : memref<8x18x18xbf16, #tpu.memory_space<vmem>>, vector<8x16x16xbf16>
    %23 = vector.shape_cast %22 : vector<8x16x16xbf16> to vector<8x256xbf16>
    %c0_23 = arith.constant 0 : index
    %c0_24 = arith.constant 0 : index
    %c1_25 = arith.constant 1 : index
    %24 = vector.load %arg10[%c0_23, %c0_24, %c1_25] : memref<8x18x18xbf16, #tpu.memory_space<vmem>>, vector<8x16x16xbf16>
    %25 = vector.shape_cast %24 : vector<8x16x16xbf16> to vector<8x256xbf16>
    %c0_26 = arith.constant 0 : index
    %c0_27 = arith.constant 0 : index
    %c2 = arith.constant 2 : index
    %26 = vector.load %arg10[%c0_26, %c0_27, %c2] : memref<8x18x18xbf16, #tpu.memory_space<vmem>>, vector<8x16x16xbf16>
    %27 = vector.shape_cast %26 : vector<8x16x16xbf16> to vector<8x256xbf16>
    %c0_28 = arith.constant 0 : index
    %c1_29 = arith.constant 1 : index
    %c0_30 = arith.constant 0 : index
    %28 = vector.load %arg10[%c0_28, %c1_29, %c0_30] : memref<8x18x18xbf16, #tpu.memory_space<vmem>>, vector<8x16x16xbf16>
    %29 = vector.shape_cast %28 : vector<8x16x16xbf16> to vector<8x256xbf16>
    %c0_31 = arith.constant 0 : index
    %c1_32 = arith.constant 1 : index
    %c1_33 = arith.constant 1 : index
    %30 = vector.load %arg10[%c0_31, %c1_32, %c1_33] : memref<8x18x18xbf16, #tpu.memory_space<vmem>>, vector<8x16x16xbf16>
    %31 = vector.shape_cast %30 : vector<8x16x16xbf16> to vector<8x256xbf16>
    %c0_34 = arith.constant 0 : index
    %c1_35 = arith.constant 1 : index
    %c2_36 = arith.constant 2 : index
    %32 = vector.load %arg10[%c0_34, %c1_35, %c2_36] : memref<8x18x18xbf16, #tpu.memory_space<vmem>>, vector<8x16x16xbf16>
    %33 = vector.shape_cast %32 : vector<8x16x16xbf16> to vector<8x256xbf16>
    %c0_37 = arith.constant 0 : index
    %c2_38 = arith.constant 2 : index
    %c0_39 = arith.constant 0 : index
    %34 = vector.load %arg10[%c0_37, %c2_38, %c0_39] : memref<8x18x18xbf16, #tpu.memory_space<vmem>>, vector<8x16x16xbf16>
    %35 = vector.shape_cast %34 : vector<8x16x16xbf16> to vector<8x256xbf16>
    %c0_40 = arith.constant 0 : index
    %c2_41 = arith.constant 2 : index
    %c1_42 = arith.constant 1 : index
    %36 = vector.load %arg10[%c0_40, %c2_41, %c1_42] : memref<8x18x18xbf16, #tpu.memory_space<vmem>>, vector<8x16x16xbf16>
    %37 = vector.shape_cast %36 : vector<8x16x16xbf16> to vector<8x256xbf16>
    %c0_43 = arith.constant 0 : index
    %c2_44 = arith.constant 2 : index
    %c2_45 = arith.constant 2 : index
    %38 = vector.load %arg10[%c0_43, %c2_44, %c2_45] : memref<8x18x18xbf16, #tpu.memory_space<vmem>>, vector<8x16x16xbf16>
    %39 = vector.shape_cast %38 : vector<8x16x16xbf16> to vector<8x256xbf16>
    %40 = tpu.concatenate %23, %25, %27, %29, %31, %33, %35, %37, %39 in 0 : vector<8x256xbf16>, vector<8x256xbf16>, vector<8x256xbf16>, vector<8x256xbf16>, vector<8x256xbf16>, vector<8x256xbf16>, vector<8x256xbf16>, vector<8x256xbf16>, vector<8x256xbf16> -> vector<72x256xbf16>
    %c0_46 = arith.constant 0 : index
    %c0_47 = arith.constant 0 : index
    %41 = vector.load %arg5[%c0_46, %c0_47] : memref<4x72xbf16, #tpu.memory_space<vmem>>, vector<4x72xbf16>
    %cst_48 = arith.constant dense<0.000000e+00> : vector<4x256xf32>
    %42 = tpu.matmul %41, %40, %cst_48 {dimension_numbers = #tpu.dot_dimension_numbers<[1], [0], [0], [1], [0, 0, 1, 1], [], []>} : vector<4x72xbf16>, vector<72x256xbf16>, vector<4x256xf32> -> vector<4x256xf32>
    %c0_49 = arith.constant 0 : index
    %c0_50 = arith.constant 0 : index
    %43 = vector.load %arg6[%c0_49, %c0_50] : memref<4x1xf32, #tpu.memory_space<vmem>>, vector<4x1xf32>
    %44 = vector.broadcast %43 : vector<4x1xf32> to vector<4x256xf32>
    %45 = arith.addf %42, %44 : vector<4x256xf32>
    %cst_51 = arith.constant 0.000000e+00 : f32
    %46 = vector.broadcast %cst_51 : f32 to vector<4x256xf32>
    %47 = arith.maximumf %45, %46 : vector<4x256xf32>
    %cst_52 = arith.constant 0.000000e+00 : bf16
    %48 = vector.broadcast %cst_52 : bf16 to vector<4x18x18xbf16>
    %c0_53 = arith.constant 0 : index
    %c0_54 = arith.constant 0 : index
    %c0_55 = arith.constant 0 : index
    %49 = vector.load %arg11[%c0_53, %c0_54, %c0_55] : memref<4x18x18xbf16, #tpu.memory_space<vmem>>, vector<4x18x18xbf16>
    tpu.vector_store %arg11[%c0_53, %c0_54, %c0_55], %48 {strides = array<i32>} : memref<4x18x18xbf16, #tpu.memory_space<vmem>>, vector<4x18x18xbf16>,
    %50 = arith.truncf %47 : vector<4x256xf32> to vector<4x256xbf16>
    %51 = vector.shape_cast %50 : vector<4x256xbf16> to vector<4x16x16xbf16>
    %c0_56 = arith.constant 0 : index
    %c1_57 = arith.constant 1 : index
    %c1_58 = arith.constant 1 : index
    %52 = vector.load %arg11[%c0_56, %c1_57, %c1_58] : memref<4x18x18xbf16, #tpu.memory_space<vmem>>, vector<4x16x16xbf16>
    tpu.vector_store %arg11[%c0_56, %c1_57, %c1_58], %51 {strides = array<i32>} : memref<4x18x18xbf16, #tpu.memory_space<vmem>>, vector<4x16x16xbf16>,
    %c0_59 = arith.constant 0 : index
    %c0_60 = arith.constant 0 : index
    %c0_61 = arith.constant 0 : index
    %53 = vector.load %arg11[%c0_59, %c0_60, %c0_61] : memref<4x18x18xbf16, #tpu.memory_space<vmem>>, vector<4x16x16xbf16>
    %54 = vector.shape_cast %53 : vector<4x16x16xbf16> to vector<4x256xbf16>
    %c0_62 = arith.constant 0 : index
    %c0_63 = arith.constant 0 : index
    %c1_64 = arith.constant 1 : index
    %55 = vector.load %arg11[%c0_62, %c0_63, %c1_64] : memref<4x18x18xbf16, #tpu.memory_space<vmem>>, vector<4x16x16xbf16>
    %56 = vector.shape_cast %55 : vector<4x16x16xbf16> to vector<4x256xbf16>
    %c0_65 = arith.constant 0 : index
    %c0_66 = arith.constant 0 : index
    %c2_67 = arith.constant 2 : index
    %57 = vector.load %arg11[%c0_65, %c0_66, %c2_67] : memref<4x18x18xbf16, #tpu.memory_space<vmem>>, vector<4x16x16xbf16>
    %58 = vector.shape_cast %57 : vector<4x16x16xbf16> to vector<4x256xbf16>
    %c0_68 = arith.constant 0 : index
    %c1_69 = arith.constant 1 : index
    %c0_70 = arith.constant 0 : index
    %59 = vector.load %arg11[%c0_68, %c1_69, %c0_70] : memref<4x18x18xbf16, #tpu.memory_space<vmem>>, vector<4x16x16xbf16>
    %60 = vector.shape_cast %59 : vector<4x16x16xbf16> to vector<4x256xbf16>
    %c0_71 = arith.constant 0 : index
    %c1_72 = arith.constant 1 : index
    %c1_73 = arith.constant 1 : index
    %61 = vector.load %arg11[%c0_71, %c1_72, %c1_73] : memref<4x18x18xbf16, #tpu.memory_space<vmem>>, vector<4x16x16xbf16>
    %62 = vector.shape_cast %61 : vector<4x16x16xbf16> to vector<4x256xbf16>
    %c0_74 = arith.constant 0 : index
    %c1_75 = arith.constant 1 : index
    %c2_76 = arith.constant 2 : index
    %63 = vector.load %arg11[%c0_74, %c1_75, %c2_76] : memref<4x18x18xbf16, #tpu.memory_space<vmem>>, vector<4x16x16xbf16>
    %64 = vector.shape_cast %63 : vector<4x16x16xbf16> to vector<4x256xbf16>
    %c0_77 = arith.constant 0 : index
    %c2_78 = arith.constant 2 : index
    %c0_79 = arith.constant 0 : index
    %65 = vector.load %arg11[%c0_77, %c2_78, %c0_79] : memref<4x18x18xbf16, #tpu.memory_space<vmem>>, vector<4x16x16xbf16>
    %66 = vector.shape_cast %65 : vector<4x16x16xbf16> to vector<4x256xbf16>
    %c0_80 = arith.constant 0 : index
    %c2_81 = arith.constant 2 : index
    %c1_82 = arith.constant 1 : index
    %67 = vector.load %arg11[%c0_80, %c2_81, %c1_82] : memref<4x18x18xbf16, #tpu.memory_space<vmem>>, vector<4x16x16xbf16>
    %68 = vector.shape_cast %67 : vector<4x16x16xbf16> to vector<4x256xbf16>
    %c0_83 = arith.constant 0 : index
    %c2_84 = arith.constant 2 : index
    %c2_85 = arith.constant 2 : index
    %69 = vector.load %arg11[%c0_83, %c2_84, %c2_85] : memref<4x18x18xbf16, #tpu.memory_space<vmem>>, vector<4x16x16xbf16>
    %70 = vector.shape_cast %69 : vector<4x16x16xbf16> to vector<4x256xbf16>
    %71 = tpu.concatenate %54, %56, %58, %60, %62, %64, %66, %68, %70 in 0 : vector<4x256xbf16>, vector<4x256xbf16>, vector<4x256xbf16>, vector<4x256xbf16>, vector<4x256xbf16>, vector<4x256xbf16>, vector<4x256xbf16>, vector<4x256xbf16>, vector<4x256xbf16> -> vector<36x256xbf16>
    %c0_86 = arith.constant 0 : index
    %c0_87 = arith.constant 0 : index
    %72 = vector.load %arg7[%c0_86, %c0_87] : memref<4x36xbf16, #tpu.memory_space<vmem>>, vector<4x36xbf16>
    %cst_88 = arith.constant dense<0.000000e+00> : vector<4x256xf32>
    %73 = tpu.matmul %72, %71, %cst_88 {dimension_numbers = #tpu.dot_dimension_numbers<[1], [0], [0], [1], [0, 0, 1, 1], [], []>} : vector<4x36xbf16>, vector<36x256xbf16>, vector<4x256xf32> -> vector<4x256xf32>
    %c0_89 = arith.constant 0 : index
    %c0_90 = arith.constant 0 : index
    %74 = vector.load %arg8[%c0_89, %c0_90] : memref<4x1xf32, #tpu.memory_space<vmem>>, vector<4x1xf32>
    %75 = vector.broadcast %74 : vector<4x1xf32> to vector<4x256xf32>
    %76 = arith.addf %73, %75 : vector<4x256xf32>
    %cst_91 = arith.constant 0.000000e+00 : f32
    %77 = vector.broadcast %cst_91 : f32 to vector<4x256xf32>
    %78 = arith.maximumf %76, %77 : vector<4x256xf32>
    %79 = vector.shape_cast %78 : vector<4x256xf32> to vector<1x1x1024xf32>
    %c0_92 = arith.constant 0 : index
    %c0_93 = arith.constant 0 : index
    %c0_94 = arith.constant 0 : index
    %80 = vector.load %arg9[%c0_92, %c0_93, %c0_94] : memref<1x1x1024xf32, #tpu.memory_space<vmem>>, vector<1x1x1024xf32>
    tpu.vector_store %arg9[%c0_92, %c0_93, %c0_94], %79 {strides = array<i32>} : memref<1x1x1024xf32, #tpu.memory_space<vmem>>, vector<1x1x1024xf32>,
    return
  }
  func.func @transform_0(%arg0: i32) -> (i32, i32, i32, i32) {
    %c0_i32 = arith.constant 0 : i32
    %c0_i32_0 = arith.constant 0 : i32
    %c0_i32_1 = arith.constant 0 : i32
    %c0_i32_2 = arith.constant 0 : i32
    return %arg0, %c0_i32, %c0_i32_0, %c0_i32_1 : i32, i32, i32, i32
  }
  func.func @transform_1(%arg0: i32) -> (i32, i32, i32, i32) {
    %c0_i32 = arith.constant 0 : i32
    %c0_i32_0 = arith.constant 0 : i32
    %c0_i32_1 = arith.constant 0 : i32
    %c0_i32_2 = arith.constant 0 : i32
    return %arg0, %c0_i32, %c0_i32_0, %c0_i32_1 : i32, i32, i32, i32
  }
  func.func @transform_2(%arg0: i32) -> (i32, i32) {
    %c0_i32 = arith.constant 0 : i32
    %c0_i32_0 = arith.constant 0 : i32
    %c0_i32_1 = arith.constant 0 : i32
    return %c0_i32, %c0_i32_0 : i32, i32
  }
  func.func @transform_3(%arg0: i32) -> (i32, i32) {
    %c0_i32 = arith.constant 0 : i32
    %c0_i32_0 = arith.constant 0 : i32
    %c0_i32_1 = arith.constant 0 : i32
    return %c0_i32, %c0_i32_0 : i32, i32
  }
  func.func @transform_4(%arg0: i32) -> (i32, i32) {
    %c0_i32 = arith.constant 0 : i32
    %c0_i32_0 = arith.constant 0 : i32
    %c0_i32_1 = arith.constant 0 : i32
    return %c0_i32, %c0_i32_0 : i32, i32
  }
  func.func @transform_5(%arg0: i32) -> (i32, i32) {
    %c0_i32 = arith.constant 0 : i32
    %c0_i32_0 = arith.constant 0 : i32
    %c0_i32_1 = arith.constant 0 : i32
    return %c0_i32, %c0_i32_0 : i32, i32
  }
  func.func @transform_6(%arg0: i32) -> (i32, i32) {
    %c0_i32 = arith.constant 0 : i32
    %c0_i32_0 = arith.constant 0 : i32
    %c0_i32_1 = arith.constant 0 : i32
    return %c0_i32, %c0_i32_0 : i32, i32
  }
  func.func @transform_7(%arg0: i32) -> (i32, i32) {
    %c0_i32 = arith.constant 0 : i32
    %c0_i32_0 = arith.constant 0 : i32
    %c0_i32_1 = arith.constant 0 : i32
    return %c0_i32, %c0_i32_0 : i32, i32
  }
  func.func @transform_8(%arg0: i32) -> (i32, i32, i32) {
    %c0_i32 = arith.constant 0 : i32
    %c0_i32_0 = arith.constant 0 : i32
    %c0_i32_1 = arith.constant 0 : i32
    return %arg0, %c0_i32, %c0_i32_0 : i32, i32, i32
  }
}

</mosaic_0001>

<bundles_post_ra>
// kernel: upconv_forward.1
= control target key start
LH: loop header
LB: loop body
LE: loop exit
PB: predicated region body
PF: predicated region fallthrough
CT: control target
= control target key end

     0   :  { %s8059_s27 = smov 0   ;;  %s12269_s0 = inlined_call_operand.vmem [shape: f32[2,4,8,8], index: 0, kind: input, shape index: {}]   ;;  %s12270_s1 = inlined_call_operand.vmem [shape: f32[2,4,16,16], index: 1, kind: input, shape index: {}]   ;;  %s12271_s2 = inlined_call_operand.vmem [shape: bf16[16,8], index: 2, kind: input, shape index: {}]   ;;  %s12272_s3 = inlined_call_operand.vmem [shape: bf16[8,16], index: 3, kind: input, shape index: {}]   ;;  %s12273_s4 = inlined_call_operand.vmem [shape: bf16[4,72], index: 4, kind: input, shape index: {}]   ;;  %s12274_s5 = inlined_call_operand.vmem [shape: f32[4,1], index: 5, kind: input, shape index: {}]   ;;  %s12275_s6 = inlined_call_operand.vmem [shape: bf16[4,36], index: 6, kind: input, shape index: {}]   ;;  %s12276_s7 = inlined_call_operand.vmem [shape: f32[4,1], index: 7, kind: input, shape index: {}]   ;;  %s12277_s8 = inlined_call_operand.vmem [shape: f32[2,1,1024], index: 8, kind: output, shape index: {}]  }
   0x1 LB: > { %s7536_s28 = sadd.s32 4294967295, %s7997_s27   ;;  %p7540_p0 = scmp.ge.s32.totalorder %s7997_s27, 1  ;;  %s7997_s27 = sphi %s8059_s27, %s18_s27  }
   0x2   : > { %p272_p1 = scmp.lt.s32.totalorder %s7997_s27, 3 }
   0x4   : > { %p273_p2 = pnand %p7540_p0, %p272_p1 }
   0x6   : > { %276 = sbr.rel (%p273_p2) target bundleno = 2547 (0x9f3), region = 52 }
   0xd   : > { %v333_v0 = vld [vmem:[%s12272_s3] sm:$0xf]  ;;  %vm351_vm0 = vcmask 1043456   ;;  %p310_p3 = scmp.lt.s32.totalorder %s7536_s28, 1  ;;  %vm344_vm1 = vcmask 64512   ;;  %v12278_v8 = vmov 0   ;;  %v408_v11 = vlaneseq }
   0xe   : > { %7960 = vmatprep.subr.msk.bf16.mxu0 %vm351_vm0, %v333_v0  ;;  %v353_v1 = vsel %vm351_vm0, %v333_v0, 0  ;;  %7984 = vset.pattern.permute.xlu1 %v12278_v8  ;;  %v8000_v9 = vmov 1983009808   ;;  %v8001_v14 = vmov 1934713408   ;;  %vm8003_vm3 = vmmov 0  }
   0xf   : > { %7949 = vmatpush3.bf16.msra.mxu0 %v353_v1  ;;  %s12698_s28 = smov (!%p310_p3, %s7536_s28), 1  ;;  %7985 = vset.pattern.permute.xlu0 %v12278_v8  ;;  %v406_v10 = vunpack.c.l.s4 %v8000_v9  ;;  %v409_v13 = vshrl.u32 %v408_v11, 7  ;;  %v423_v15 = vunpack.c.l.s4 %v8001_v14  ;;  %vm985_vm2 = vsmask.f32 256  ;;  %s8004_s17 = smov 16  }
  0x10   : > { %s7851_s9 = sshll.u32 %s12698_s28, 5  ;;  %s7852_s13 = sshll.u32 %s12698_s28, 6  ;;  %vm986_vm4 = vsmask.f32 4368  ;;  %vm927_vm5 = vcmask 142336   ;;  %vm930_vm7 = vcmask 139264  }
  0x11   : > { %s314_s12 = scalar_lea.vmem %s12269_s0, %s7851_s9  ;;  %v407_v12 = vunpack.c.0.s8 %v406_v10  ;;  %v424_v18 = vunpack.c.0.s8 %v423_v15  ;;  %s8100_s16 = scalar_lea.vmem %s12270_s1, %s7852_s13  ;;  %929 = vst.msk [vmem:[#allocation2 + $0x4] sm:$0xf] %vm927_vm5, %v12278_v8  ;;  %928 = vst.msk [vmem:[#allocation2] sm:$0xf] %vm927_vm5, %v12278_v8  ;;  %vm572_vm8 = vcmask 130048   ;;  %vm576_vm10 = vcmask 261120  }
  0x12   : > { %v325_v2 = vld [vmem:[%s314_s12] sm:$0xff]  ;;  %v326_v3 = vld [vmem:[%s314_s12 + $0x8] sm:$0xff]  ;;  %v327_v4 = vld [vmem:[%s314_s12 + $0x10] sm:$0xff]  ;;  %932 = vst.msk [vmem:[#allocation2 + $0xc] sm:$0xf] %vm927_vm5, %v12278_v8  ;;  %s8005_s18 = smov 48  }
  0x13   : > { %v7853_v5 = vpack.c.bf16 %v326_v3, %v325_v2  ;;  %v328_v6 = vld [vmem:[%s314_s12 + $0x18] sm:$0xff]  ;;  %v8083_v16 = vsub.s32 %v407_v12, %v409_v13  ;;  %v8087_v27 = vsub.s32 %v424_v18, %v409_v13  ;;  %v953_v54 = vld [vmem:[%s8100_s16] sm:$0xff]  ;;  %v954_v55 = vld [vmem:[%s8100_s16 + $0x8] sm:$0xff]  ;;  %933 = vst.msk [vmem:[#allocation2 + $0x10] sm:$0xf] %vm927_vm5, %v12278_v8  ;;  %s8006_s19 = smov 32  }
  0x14   : > { %v7854_v7 = vpack.c.bf16 %v328_v6, %v327_v4  ;;  %v8107_v0 = vpack.c.bf16 %v953_v54, %v953_v54  ;;  %v8109_v1 = vpack.c.bf16 %v954_v55, %v954_v55  ;;  %v956_v6 = vld [vmem:[%s8100_s16 + $0x18] sm:$0xff]  ;;  %v957_v18 = vld [vmem:[%s8100_s16 + $0x20] sm:$0xff]  ;;  %935 = vst.msk [vmem:[#allocation2 + $0x18] sm:$0xf] %vm927_vm5, %v12278_v8  ;;  %936 = vst.msk [vmem:[#allocation2 + $0x1c] sm:$0xf] %vm927_vm5, %v12278_v8 }
  0x15   : > { %7950 = vmatprep.mubr.msk.bf16.mxu0 %vm344_vm1, %v7853_v5  ;;  %12346 = vst [vmem:[#allocation4_spill] sm:$0xff] %v8083_v16  ;;  %12347 = vst [vmem:[#allocation5_spill] sm:$0xff] %v8087_v27  ;;  %v955_v5 = vld [vmem:[%s8100_s16 + $0x10] sm:$0xff]  ;;  %v8124_v15 = vpack.c.bf16 %v956_v6, %v956_v6  ;;  %s8007_s20 = smov 1   ;;  %vm1093_vm9 = vsmask.f32 7938 }
  0x16   : > { %7951 = vmatmul.mubr.msk.bf16.vlgmr.msra.gmra.mrb[0].mxu0 %vm344_vm1, %v7854_v7  ;;  %v989_v11 = vshrl.u32 %v8107_v0, 16  ;;  %v997_v12 = vshrl.u32 %v8109_v1, 16  ;;  %v8122_v14 = vpack.c.bf16 %v955_v5, %v955_v5  ;;  %938 = vst.msk [vmem:[#allocation2 + $0x24] sm:$0xf] %vm927_vm5, %v12278_v8  ;;  %939 = vst.msk [vmem:[#allocation2 + $0x28] sm:$0xf] %vm927_vm5, %v12278_v8 }
  0x17   : > { %4442 = vmatprep.mubr.bf16.mxu0 %v12278_v8  ;;  %941 = vst.msk [vmem:[#allocation2 + $0x30] sm:$0xf] %vm927_vm5, %v12278_v8  ;;  %942 = vst.msk [vmem:[#allocation2 + $0x34] sm:$0xf] %vm927_vm5, %v12278_v8  ;;  %vm579_vm11 = vcmask 392192   ;;  %vm1092_vm12 = vcmask 134152  }
  0x18   : > { %944 = vst.msk [vmem:[#allocation2 + $0x3c] sm:$0xf] %vm927_vm5, %v12278_v8  ;;  %945 = vst.msk [vmem:[#allocation2 + $0x40] sm:$0xf] %vm927_vm5, %v12278_v8  ;;  %v1009_v54 = vshll.u32 %v8122_v14, 16  ;;  %s8008_s23 = smov 127  }
  0x19   : > { %947 = vst.msk [vmem:[#allocation2 + $0x48] sm:$0xf] %vm927_vm5, %v12278_v8  ;;  %948 = vst.msk [vmem:[#allocation2 + $0x4c] sm:$0xf] %vm927_vm5, %v12278_v8  ;;  %vm1100_vm14 = vcmask 131080   ;;  %s8009_s24 = smov 126  }
  0x1a   : > { %950 = vst.msk [vmem:[#allocation2 + $0x54] sm:$0xf] %vm927_vm5, %v12278_v8  ;;  %951 = vst.msk [vmem:[#allocation2 + $0x58] sm:$0xf] %vm927_vm5, %v12278_v8  ;;  %s8010_s25 = smov 112   ;;  %s8011_s26 = smov 96  }
  0x1b   : > { %4453 = vst.msk [vmem:[#allocation3] sm:$0xf] %vm927_vm5, %v12278_v8  ;;  %4454 = vst.msk [vmem:[#allocation3 + $0x4] sm:$0xf] %vm927_vm5, %v12278_v8  ;;  %s8012_s29 = smov 80   ;;  %s8013_s30 = smov 64  }
  0x1c   : > { %4456 = vst.msk [vmem:[#allocation3 + $0xc] sm:$0xf] %vm927_vm5, %v12278_v8  ;;  %4457 = vst.msk [vmem:[#allocation3 + $0x10] sm:$0xf] %vm927_vm5, %v12278_v8 }
  0x1d   : > { %4459 = vst.msk [vmem:[#allocation3 + $0x18] sm:$0xf] %vm927_vm5, %v12278_v8  ;;  %4460 = vst.msk [vmem:[#allocation3 + $0x1c] sm:$0xf] %vm927_vm5, %v12278_v8 }
  0x1e   : > { %4462 = vst.msk [vmem:[#allocation3 + $0x24] sm:$0xf] %vm927_vm5, %v12278_v8  ;;  %4463 = vst.msk [vmem:[#allocation3 + $0x28] sm:$0xf] %vm927_vm5, %v12278_v8  ;;  %vm3375_vm5 = vcmask 1046532  }
  0x1f   : > { %vm8212_vm6 = vmor %vm985_vm2, %vm986_vm4  ;;  %931 = vst.msk [vmem:[#allocation2 + $0x8] sm:$0x1] %vm930_vm7, %v12278_v8  ;;  %vm3374_vm4 = vcmask 1042432  }
  0x20   : > { %934 = vst.msk [vmem:[#allocation2 + $0x14] sm:$0x1] %vm930_vm7, %v12278_v8  ;;  %937 = vst.msk [vmem:[#allocation2 + $0x20] sm:$0x1] %vm930_vm7, %v12278_v8 }
  0x21   : > { %940 = vst.msk [vmem:[#allocation2 + $0x2c] sm:$0x1] %vm930_vm7, %v12278_v8  ;;  %943 = vst.msk [vmem:[#allocation2 + $0x38] sm:$0x1] %vm930_vm7, %v12278_v8 }
  0x22   : > { %946 = vst.msk [vmem:[#allocation2 + $0x44] sm:$0x1] %vm930_vm7, %v12278_v8  ;;  %949 = vst.msk [vmem:[#allocation2 + $0x50] sm:$0x1] %vm930_vm7, %v12278_v8 }
  0x23   : > { %952 = vst.msk [vmem:[#allocation2 + $0x5c] sm:$0x1] %vm930_vm7, %v12278_v8  ;;  %4455 = vst.msk [vmem:[#allocation3 + $0x8] sm:$0x1] %vm930_vm7, %v12278_v8 }
  0x24   : > { %4458 = vst.msk [vmem:[#allocation3 + $0x14] sm:$0x1] %vm930_vm7, %v12278_v8  ;;  %4461 = vst.msk [vmem:[#allocation3 + $0x20] sm:$0x1] %vm930_vm7, %v12278_v8 }
  0x25   : > { %4464 = vst.msk [vmem:[#allocation3 + $0x2c] sm:$0x1] %vm930_vm7, %v12278_v8  ;;  %vm8261_vm13 = vmand %vm1092_vm12, %vm1093_vm9  ;;  %vm1546_vm9 = vcmask 523264  }
  0x26   : > { %vm8291_vm15 = vmand %vm1100_vm14, %vm985_vm2  ;;  %vm2234_vm2 = vsmask.f32 7440  ;;  %vm1549_vm14 = vcmask 654336  }
  0x27   : > { %vm8454_vm7 = vmor %vm3374_vm4, %vm3375_vm5  ;;  %vm4402_vm4 = vcmask 588800  }
  0xe9   : > { %v7952_v17 = vpop.f32.mrb[0].mxu0 }
  0xea   : > { %v412_v19 = vpack.c.bf16 %v7952_v17, %v7952_v17  ;;  %v389_v20 = vpop.f32.mrb[1].mxu0 }
  0xeb   : > { %v404_v21 = vpack.c.bf16 %v389_v20, %v389_v20  ;;  %v7953_v22 = vpop.f32.mrb[2].mxu0  ;;  %v1000_v20 = vshll.u32 %v8109_v1, 16 }
  0xec   : > { %v419_v23 = vrot.slane %v412_v19, %v8083_v16  ;;  %v446_v24 = vpack.c.bf16 %v7953_v22, %v7953_v22  ;;  %v392_v25 = vpop.f32.mrb[3].mxu0  ;;  %v8002_v19 = vmov 0.0  }
  0xed   : > { %v411_v26 = vrot.slane %v404_v21, %v8083_v16  ;;  %v438_v28 = vpack.c.bf16 %v392_v25, %v392_v25  ;;  %7954 = vmatprep.subr.bf16.mxu1 %v8002_v19  ;;  %v8138_v25 = vrot.slane %v997_v12, 7  ;;  %7956 = vmatprep.mubr.msk.bf16.mxu1 %vm8003_vm3, %v8002_v19 }
  0xee   : > { %v453_v29 = vrot.slane %v446_v24, %v8083_v16  ;;  %v958_v24 = vld [vmem:[%s8100_s16 + $0x28] sm:$0xff] }
  0xef   : > { %v420_v30 = vcombine.low %v411_v26, %v419_v23  ;;  %v421_v31 = vcombine.high %v411_v26, %v419_v23  ;;  %v445_v32 = vrot.slane %v438_v28, %v8083_v16  ;;  %v8135_v23 = vrot.slane %v989_v11, 7 }
  0xf0   : > { %v1006_v26 = vshrl.u32 %v8122_v14, 16  ;;  %v1014_v28 = vshrl.u32 %v8124_v15, 16 }
  0xf1   : > { %v428_v33 = vrot.slane %v420_v30, %v8087_v27  ;;  %v435_v34 = vrot.slane %v421_v31, %v8087_v27  ;;  %v454_v35 = vcombine.low %v445_v32, %v453_v29  ;;  %v455_v36 = vcombine.high %v445_v32, %v453_v29 }
  0xf2   : > { %v8142_v29 = vpack.c.bf16 %v957_v18, %v957_v18 }
  0xf3   : > { %v436_v37 = vcombine.high %v428_v33, %v12278_v8  ;;  %v462_v38 = vrot.slane %v454_v35, %v8087_v27  ;;  %v469_v39 = vrot.slane %v455_v36, %v8087_v27  ;;  %v437_v40 = vcombine.high %v435_v34, %v12278_v8 }
  0xf4   : > { %v476_v41 = vshrl.u32 %v428_v33, 16  ;;  %v492_v47 = vshrl.u32 %v435_v34, 16  ;;  %v8151_v35 = vpack.c.bf16 %v958_v24, %v958_v24 }
  0xf5   : > { %v470_v42 = vcombine.high %v462_v38, %v12278_v8  ;;  %v471_v43 = vcombine.high %v469_v39, %v12278_v8  ;;  %v474_v44 = vpack.i.b16 %v462_v38, %v428_v33  ;;  %v477_v45 = vshrl.u32 %v462_v38, 16 }
  0xf6   : > { %v484_v46 = vshrl.u32 %v436_v37, 16  ;;  %v490_v48 = vpack.i.b16 %v469_v39, %v435_v34  ;;  %v493_v49 = vshrl.u32 %v469_v39, 16  ;;  %v500_v56 = vshrl.u32 %v437_v40, 16 }
  0xf7   : > { %v478_v50 = vpack.i.b16 %v477_v45, %v476_v41  ;;  %v482_v51 = vpack.i.b16 %v470_v42, %v436_v37  ;;  %v485_v52 = vshrl.u32 %v470_v42, 16  ;;  %v498_v53 = vpack.i.b16 %v471_v43, %v437_v40  ;;  %v959_v40 = vld [vmem:[%s8100_s16 + $0x30] sm:$0xff]  ;;  %v960_v41 = vld [vmem:[%s8100_s16 + $0x38] sm:$0xff] }
  0xf8   : > { %v494_v57 = vpack.i.b16 %v493_v49, %v492_v47  ;;  %v501_v58 = vshrl.u32 %v471_v43, 16  ;;  %v504_v59 = vcombine.low %v474_v44, %v490_v48  ;;  %v992_v34 = vshll.u32 %v8107_v0, 16 }
  0xf9   : > { %v486_v60 = vpack.i.b16 %v485_v52, %v484_v46  ;;  %v512_v61 = vcombine.low %v482_v51, %v498_v53  ;;  %v995_v42 = vrot.slane %v8135_v23, 4  ;;  %v1002_v43 = vor.u32 %v1000_v20, %v8138_v25 }
  0xfa   : > { %v502_v62 = vpack.i.b16 %v501_v58, %v500_v56  ;;  %v529_v63 = vcombine.low %v478_v50, %v494_v57  ;;  %v511_v2 = vrot.slane %v504_v59, %v8083_v16  ;;  %v1017_v44 = vshll.u32 %v8124_v15, 16 }
  0xfb   : > { %v519_v3 = vrot.slane %v512_v61, %v8083_v16  ;;  %v1008_v46 = vrot.slane %v1006_v26, 7  ;;  %v1016_v47 = vrot.slane %v1014_v28, 7  ;;  %v1023_v48 = vshrl.u32 %v8142_v29, 16  ;;  %v1095_v28 = vld [vmem:[#allocation2] sm:$0xf] }
  0xfc   : > { %v537_v4 = vcombine.low %v486_v60, %v502_v62  ;;  %v536_v9 = vrot.slane %v529_v63, %v8083_v16  ;;  %v12348_v49 = vmov 0  ;;  %v1031_v50 = vshrl.u32 %v8151_v35, 16 }
  0xfd   : > { %v520_v7 = vcombine.low %v511_v2, %v519_v3  ;;  %v12349_v49 = vsel %vm8212_vm6, 4294967295, %v12348_v49  ;;  %v7861_v51 = vpack.c.bf16 %v959_v40, %v959_v40  ;;  %v7862_v52 = vpack.c.bf16 %v960_v41, %v960_v41 }
  0xfe   : > { %v544_v10 = vrot.slane %v537_v4, %v8083_v16  ;;  %12350 = vst [vmem:[#allocation6_spill] sm:$0xff] %v12349_v49  ;;  %v994_v53 = vor.u32 %v992_v34, %v8135_v23  ;;  %v1003_v55 = vsel %vm8212_vm6, %v995_v42, %v1002_v43  ;;  %v1012_v56 = vrot.slane %v1008_v46, 4  ;;  %v1105_v34 = vld [vmem:[#allocation2 + $0xc] sm:$0xf]  ;;  %v1119_v43 = vld [vmem:[#allocation2 + $0x24] sm:$0xf] }
  0xff   : > { %v8120_v13 = vrot.slane %v520_v7, %v8087_v27  ;;  %v1019_v57 = vor.u32 %v1017_v44, %v1016_v47  ;;  %v1025_v58 = vrot.slane %v1023_v48, 7  ;;  %v1033_v59 = vrot.slane %v1031_v50, 7  ;;  %v1102_v50 = vld [vmem:[#allocation2 + $0x8] sm:$0x1] }
 0x100   : > { %v545_v17 = vcombine.low %v536_v9, %v544_v10  ;;  %v1034_v60 = vshll.u32 %v8151_v35, 16  ;;  %v1040_v61 = vshrl.u32 %v7861_v51, 16  ;;  %v1048_v62 = vshrl.u32 %v7862_v52, 16 }
 0x101   : > { %v8133_v22 = vcombine.high %v8120_v13, %v12278_v8  ;;  %v557_v30 = vshrl.u32 %v8120_v13, 16  ;;  %v1011_v63 = vor.u32 %v1009_v54, %v1008_v46  ;;  %v1026_v0 = vshll.u32 %v8142_v29, 16 }
 0x102   : > { %v8129_v21 = vrot.slane %v545_v17, %v8087_v27  ;;  %v1020_v1 = vsel %vm8212_vm6, %v1012_v56, %v1019_v57  ;;  %v1029_v2 = vrot.slane %v1025_v58, 4  ;;  %v1036_v3 = vor.u32 %v1034_v60, %v1033_v59  ;;  %v1116_v56 = vld [vmem:[#allocation2 + $0x20] sm:$0x1]  ;;  %v1123_v60 = vld [vmem:[#allocation2 + $0x2c] sm:$0x1] }
 0x103   : > { %v563_v37 = vshrl.u32 %v8133_v22, 16  ;;  %v1042_v4 = vrot.slane %v1040_v61, 7  ;;  %v1050_v5 = vrot.slane %v1048_v62, 7  ;;  %v1051_v6 = vshll.u32 %v7862_v52, 16  ;;  %v1109_v52 = vld [vmem:[#allocation2 + $0x14] sm:$0x1] }
 0x104   : > { %v558_v31 = vshrl.u32 %v8129_v21, 16  ;;  %v553_v32 = vcombine.high %v8129_v21, %v12278_v8  ;;  %v556_v33 = vpack.i.b16 %v8129_v21, %v8120_v13  ;;  %v1028_v7 = vor.u32 %v1026_v0, %v1025_v58  ;;  %v7986_v13 = vld [vmem:[%s12271_s2] sm:$0xff]  }
 0x105   : > { %v1043_v9 = vshll.u32 %v7861_v51, 16  ;;  %v1037_v10 = vsel %vm8212_vm6, %v1029_v2, %v1036_v3  ;;  %v1046_v11 = vrot.slane %v1042_v4, 4  ;;  %v1053_v12 = vor.u32 %v1051_v6, %v1050_v5 }
 0x106   : > { %v559_v36 = vpack.i.b16 %v558_v31, %v557_v30  ;;  %v564_v38 = vshrl.u32 %v553_v32, 16  ;;  %v562_v39 = vpack.i.b16 %v553_v32, %v8133_v22  ;;  %v1004_v17 = vrot.slane %v8138_v25, 4 }
 0x107   : > { %v1045_v14 = vor.u32 %v1043_v9, %v1042_v4  ;;  %v1054_v15 = vsel %vm8212_vm6, %v1046_v11, %v1053_v12  ;;  %v1021_v18 = vrot.slane %v1016_v47, 4  ;;  %v1038_v19 = vrot.slane %v1033_v59, 4 }
 0x108   : > { %566 = vrot.lane.b32.xlu0 %v559_v36, %s8004_s17  ;;  %v565_v45 = vpack.i.b16 %v564_v38, %v563_v37  ;;  %v1055_v20 = vrot.slane %v1050_v5, 4  ;;  %v12351_v26 = vmov 0  ;;  %v1112_v38 = vld [vmem:[#allocation2 + $0x18] sm:$0xf]  ;;  %v12354_v48 = vmov 0 }
 0x109   : > { %v12352_v26 = vsel %vm8261_vm13, 4294967295, %v12351_v26  ;;  %v12355_v48 = vsel %vm8291_vm15, 4294967295, %v12354_v48 }
 0x10a   : > { %570 = vrot.lane.b32.xlu1 %v565_v45, %s8005_s18  ;;  %12353 = vst [vmem:[#allocation7_spill] sm:$0xff] %v12352_v26  ;;  %12356 = vst [vmem:[#allocation8_spill] sm:$0xff] %v12355_v48 }
 0x10c   : > { %568 = vrot.lane.b32.xlu0 %v562_v39, %s8006_s19 }
 0x10e   : > { %1056 = vrot.lane.b32.xlu1 %v994_v53, %s8007_s20 }
 0x110   : > { %1058 = vrot.lane.b32.xlu0 %v1003_v55, %s8007_s20 }
 0x112   : > { %1062 = vrot.lane.b32.xlu1 %v1011_v63, %s8007_s20 }
 0x114   : > { %1064 = vrot.lane.b32.xlu0 %v1020_v1, %s8007_s20 }
 0x116   : > { %1068 = vrot.lane.b32.xlu1 %v1028_v7, %s8007_s20 }
 0x118   : > { %1070 = vrot.lane.b32.xlu0 %v1037_v10, %s8007_s20 }
 0x11a   : > { %1074 = vrot.lane.b32.xlu1 %v1045_v14, %s8007_s20 }
 0x11c   : > { %1076 = vrot.lane.b32.xlu0 %v1054_v15, %s8007_s20 }
 0x11e   : > { %1060 = vrot.lane.b32.xlu1 %v1004_v17, %s8007_s20 }
 0x120   : > { %1066 = vrot.lane.b32.xlu0 %v1021_v18, %s8007_s20 }
 0x122   : > { %1072 = vrot.lane.b32.xlu1 %v1038_v19, %s8007_s20 }
 0x124   : > { %1078 = vrot.lane.b32.xlu0 %v1055_v20, %s8007_s20 }
 0x17a   : > { %v567_v22 = vpop.permute.xlu0 %566 }
 0x17b   : > { %v575_v24 = vsel %vm572_vm8, %v556_v33, %v567_v22 }
 0x17c   : > { %v571_v23 = vpop.permute.xlu1 %570 }
 0x17e   : > { %v569_v25 = vpop.permute.xlu0 %568 }
 0x17f   : > { %v578_v29 = vsel %vm576_vm10, %v575_v24, %v569_v25 }
 0x180   : > { %v581_v30 = vsel %vm579_vm11, %v578_v29, %v571_v23  ;;  %v1057_v31 = vpop.permute.xlu1 %1056 }
 0x181   : > { %v592_v32 = vsel %vm351_vm0, %v581_v30, 0  ;;  %v1096_v21 = vsel %vm8261_vm13, %v1057_v31, %v1095_v28 }
 0x182   : > { %7955 = vmatpush3.bf16.msra.mxu1 %v592_v32  ;;  %v1059_v33 = vpop.permute.xlu0 %1058  ;;  %1097 = vst [vmem:[#allocation2] sm:$0xf] %v1096_v21 }
 0x183   : > { %1099 = vst.msk [vmem:[#allocation2 + $0x4] sm:$0xf] %vm1092_vm12, %v1059_v33 }
 0x184   : > { %v1063_v35 = vpop.permute.xlu1 %1062 }
 0x185   : > { %7957 = vmatmul.mubr.msk.bf16.vlgmr.msra.gmra.mrb[0].mxu1 %vm344_vm1, %v7986_v13  ;;  %v1106_v36 = vsel %vm8261_vm13, %v1063_v35, %v1105_v34  ;;  %vm2233_vm1 = vsmask.f32 3328 }
 0x186   : > { %v1065_v37 = vpop.permute.xlu0 %1064  ;;  %1107 = vst [vmem:[#allocation2 + $0xc] sm:$0xf] %v1106_v36  ;;  %7448 = vmatprep.mubr.bf16.mxu1 %v12278_v8  ;;  %vm8374_vm3 = vmor %vm2233_vm1, %vm2234_vm2  ;;  %vm1552_vm1 = vcmask 785408   ;;  %vm1555_vm2 = vcmask 916480  }
 0x187   : > { %1108 = vst.msk [vmem:[#allocation2 + $0x10] sm:$0xf] %vm1092_vm12, %v1065_v37 }
 0x188   : > { %v1069_v39 = vpop.permute.xlu1 %1068 }
 0x189   : > { %v1113_v40 = vsel %vm8261_vm13, %v1069_v39, %v1112_v38  ;;  %v8306_v58 = vld [vmem:[#allocation2] sm:$0xf] }
 0x18a   : > { %v1071_v41 = vpop.permute.xlu0 %1070  ;;  %1114 = vst [vmem:[#allocation2 + $0x18] sm:$0xf] %v1113_v40  ;;  %v8281_v42 = vld [vmem:[#allocation2 + $0x4] sm:$0xf]  ;;  %v2237_v14 = vshrl.u32 %v8306_v58, 16  ;;  %v2240_v17 = vshll.u32 %v8306_v58, 16 }
 0x18b   : > { %1115 = vst.msk [vmem:[#allocation2 + $0x1c] sm:$0xf] %vm1092_vm12, %v1071_v41  ;;  %1591 = vrot.lane.b32.xlu1 %v8281_v42, %s8008_s23  ;;  %v2246_v4 = vshll.u32 %v8281_v42, 16  ;;  %v2250_v5 = vshrl.u32 %v8281_v42, 16 }
 0x18c   : > { %v1075_v44 = vpop.permute.xlu1 %1074  ;;  %v2239_v29 = vrot.slane %v2237_v14, 4  ;;  %v2242_v32 = vrot.slane %v2240_v17, 5 }
 0x18d   : > { %v1120_v45 = vsel %vm8261_vm13, %v1075_v44, %v1119_v43  ;;  %v8318_v1 = vld [vmem:[#allocation2 + $0xc] sm:$0xf]  ;;  %v8338_v11 = vrot.slane %v2246_v4, 5  ;;  %v2252_v12 = vrot.slane %v2250_v5, 4  ;;  %v12357_v44 = vmov 0 }
 0x18e   : > { %v1077_v46 = vpop.permute.xlu0 %1076  ;;  %v8288_v47 = vld [vmem:[#allocation2 + $0x10] sm:$0xf]  ;;  %1121 = vst [vmem:[#allocation2 + $0x24] sm:$0xf] %v1120_v45  ;;  %v2261_v13 = vshrl.u32 %v8318_v1, 16  ;;  %v2264_v33 = vshll.u32 %v8318_v1, 16 }
 0x18f   : > { %1122 = vst.msk [vmem:[#allocation2 + $0x28] sm:$0xf] %vm1092_vm12, %v1077_v46  ;;  %1595 = vrot.lane.b32.xlu0 %v8288_v47, %s8008_s23  ;;  %v2270_v6 = vshll.u32 %v8288_v47, 16  ;;  %v2274_v7 = vshrl.u32 %v8288_v47, 16  ;;  %v2253_v25 = vor.u32 %v2252_v12, %v8338_v11  ;;  %v12358_v44 = vsel %vm8374_vm3, 4294967295, %v12357_v44 }
 0x190   : > { %v1061_v51 = vpop.permute.xlu1 %1060  ;;  %12359 = vst [vmem:[#allocation9_spill] sm:$0xff] %v12358_v44  ;;  %v2243_v46 = vor.u32 %v2242_v32, %v2239_v29 }
 0x191   : > { %v1103_v53 = vsel %vm8291_vm15, %v1061_v51, %v1102_v50  ;;  %v8320_v2 = vld [vmem:[#allocation2 + $0x18] sm:$0xf]  ;;  %v8344_v18 = vrot.slane %v2270_v6, 5  ;;  %v2276_v19 = vrot.slane %v2274_v7, 4  ;;  %v2254_v39 = vrot.slane %v2253_v25, 4 }
 0x192   : > { %v8300_v54 = vld [vmem:[#allocation2 + $0x1c] sm:$0xf]  ;;  %1104 = vst [vmem:[#allocation2 + $0x8] sm:$0x1] %v1103_v53  ;;  %v1067_v55 = vpop.permute.xlu0 %1066  ;;  %v2285_v34 = vshrl.u32 %v8320_v2, 16  ;;  %v2288_v35 = vshll.u32 %v8320_v2, 16 }
 0x193   : > { %1599 = vrot.lane.b32.xlu1 %v8300_v54, %s8008_s23  ;;  %v1110_v57 = vsel %vm8291_vm15, %v1067_v55, %v1109_v52  ;;  %v2294_v9 = vshll.u32 %v8300_v54, 16  ;;  %v2298_v10 = vshrl.u32 %v8300_v54, 16  ;;  %v2277_v21 = vor.u32 %v2276_v19, %v8344_v18 }
 0x194   : > { %1111 = vst [vmem:[#allocation2 + $0x14] sm:$0x1] %v1110_v57  ;;  %v1073_v59 = vpop.permute.xlu1 %1072  ;;  %v2263_v50 = vrot.slane %v2261_v13, 4  ;;  %v2266_v52 = vrot.slane %v2264_v33, 5  ;;  %v2287_v53 = vrot.slane %v2285_v34, 4  ;;  %v2290_v55 = vrot.slane %v2288_v35, 5 }
 0x195   : > { %v1117_v61 = vsel %vm8291_vm15, %v1073_v59, %v1116_v56  ;;  %v8326_v3 = vld [vmem:[#allocation2 + $0x24] sm:$0xf]  ;;  %v8350_v20 = vrot.slane %v2294_v9, 5  ;;  %v2300_v22 = vrot.slane %v2298_v10, 4  ;;  %v2278_v51 = vrot.slane %v2277_v21, 4 }
 0x196   : > { %v8310_v62 = vld [vmem:[#allocation2 + $0x28] sm:$0xf]  ;;  %1118 = vst [vmem:[#allocation2 + $0x20] sm:$0x1] %v1117_v61  ;;  %v1079_v63 = vpop.permute.xlu0 %1078  ;;  %v2309_v59 = vshrl.u32 %v8326_v3, 16  ;;  %v2244_v5 = vrot.slane %v2243_v46, 4  ;;  %v2267_v6 = vor.u32 %v2266_v52, %v2263_v50  ;;  %v2291_v7 = vor.u32 %v2290_v55, %v2287_v53 }
 0x197   : > { %1603 = vrot.lane.b32.xlu0 %v8310_v62, %s8008_s23  ;;  %1589 = vrot.lane.b32.xlu1 %v8306_v58, %s8008_s23  ;;  %v1124_v0 = vsel %vm8291_vm15, %v1079_v63, %v1123_v60  ;;  %v2318_v23 = vshll.u32 %v8310_v62, 16  ;;  %v2322_v24 = vshrl.u32 %v8310_v62, 16  ;;  %v2301_v36 = vor.u32 %v2300_v22, %v8350_v20  ;;  %v3353_v53 = vld [vmem:[#allocation2 + $0x24] sm:$0xe] }
 0x198   : > { %1125 = vst [vmem:[#allocation2 + $0x2c] sm:$0x1] %v1124_v0  ;;  %v2312_v60 = vshll.u32 %v8326_v3, 16  ;;  %v2311_v9 = vrot.slane %v2309_v59, 4  ;;  %v8410_v22 = vsel %vm8374_vm3, %v2244_v5, %v8338_v11  ;;  %v2292_v25 = vrot.slane %v2291_v7, 4 }
 0x199   : > { %v8341_v15 = vld [vmem:[#allocation2 + $0x8] sm:$0x1]  ;;  %v2320_v37 = vrot.slane %v2318_v23, 5  ;;  %v2324_v38 = vrot.slane %v2322_v24, 4  ;;  %v2302_v56 = vrot.slane %v2301_v36, 4  ;;  %12361 = vst [vmem:[#allocation11_spill] sm:$0xff] %v8410_v22 }
 0x19a   : > { %v2256_v28 = vshll.u32 %v8341_v15, 16  ;;  %v2314_v10 = vrot.slane %v2312_v60, 5  ;;  %v2268_v24 = vrot.slane %v2267_v6, 4  ;;  %v8428_v11 = vsel %vm8374_vm3, %v2292_v25, %v8350_v20 }
 0x19b   : > { %1593 = vrot.lane.b32.xlu0 %v8318_v1, %s8008_s23  ;;  %1597 = vrot.lane.b32.xlu1 %v8320_v2, %s8008_s23  ;;  %v8356_v30 = vld [vmem:[#allocation2 + $0x14] sm:$0x1]  ;;  %v2325_v57 = vor.u32 %v2324_v38, %v2320_v37  ;;  %v3386_v20 = vrot.slane %v8288_v47, 5  ;;  %v3382_v33 = vrot.slane %v8341_v15, 5  ;;  %v3393_v34 = vrot.slane %v8300_v54, 5 }
 0x19c   : > { %v2258_v40 = vrot.slane %v2256_v28, 5  ;;  %v2280_v41 = vshll.u32 %v8356_v30, 16  ;;  %v2315_v28 = vor.u32 %v2314_v10, %v2311_v9  ;;  %v8423_v29 = vsel %vm8374_vm3, %v2268_v24, %v8344_v18  ;;  %v3350_v38 = vld [vmem:[#allocation2] sm:$0xe] }
 0x19d   : > { %v8358_v31 = vld [vmem:[#allocation2 + $0x20] sm:$0x1]  ;;  %v2326_v17 = vrot.slane %v2325_v57, 4  ;;  %12362 = vst [vmem:[#allocation12_spill] sm:$0xff] %v8423_v29  ;;  %v3379_v18 = vrot.slane %v8281_v42, 5  ;;  %v12363_v35 = vmov 0 }
 0x19e   : > { %v2304_v43 = vshll.u32 %v8358_v31, 16  ;;  %v8388_v61 = vsel %vm8374_vm3, %v2254_v39, %v2258_v40  ;;  %v2282_v63 = vrot.slane %v2280_v41, 5  ;;  %v2316_v32 = vrot.slane %v2315_v28, 4 }
 0x19f   : > { %1601 = vrot.lane.b32.xlu0 %v8326_v3, %s8008_s23  ;;  %1909 = vrot.lane.b32.xlu1 %v8281_v42, %s8009_s24  ;;  %v8378_v45 = vld [vmem:[#allocation2 + $0x2c] sm:$0x1]  ;;  %12360 = vst [vmem:[#allocation10_spill] sm:$0xff] %v8388_v61  ;;  %v3381_v21 = vrot.slane %v3379_v18, 4  ;;  %v12364_v35 = vsel %vm8454_vm7, 4294967295, %v12363_v35  ;;  %v3388_v42 = vrot.slane %v3386_v20, 4 }
 0x1a0   : > { %v2306_v0 = vrot.slane %v2304_v43, 5  ;;  %v2328_v4 = vshll.u32 %v8378_v45, 16  ;;  %v8397_v12 = vsel %vm8374_vm3, %v2278_v51, %v2282_v63  ;;  %v8436_v13 = vsel %vm8374_vm3, %v2316_v32, %v2320_v37  ;;  %12365 = vst [vmem:[#allocation13_spill] sm:$0xff] %v12364_v35  ;;  %v3352_v43 = vld [vmem:[#allocation2 + $0x18] sm:$0xe] }
 0x1a1   : > { %v3400_v36 = vrot.slane %v8310_v62, 5  ;;  %v3389_v15 = vrot.slane %v8356_v30, 5  ;;  %v3396_v37 = vrot.slane %v8358_v31, 5  ;;  %v7656_v39 = vrot.slane %v3350_v38, 9  ;;  %v3351_v31 = vld [vmem:[#allocation2 + $0xc] sm:$0xe] }
 0x1a2   : > { %v8401_v14 = vsel %vm8374_vm3, %v2302_v56, %v2306_v0  ;;  %v2330_v19 = vrot.slane %v2328_v4, 5  ;;  %v3403_v41 = vrot.slane %v8378_v45, 5  ;;  %v7657_v51 = vrot.slane %v3351_v31, 9 }
 0x1a3   : > { %1913 = vrot.lane.b32.xlu0 %v8288_v47, %s8009_s24  ;;  %1917 = vrot.lane.b32.xlu1 %v8300_v54, %s8009_s24  ;;  %v8465_v47 = vsel %vm8454_vm7, %v3381_v21, %v3382_v33  ;;  %v3395_v54 = vrot.slane %v3393_v34, 4  ;;  %v3402_v30 = vrot.slane %v3400_v36, 4  ;;  %v8492_v50 = vsel %vm8454_vm7, %v7656_v39, %v3379_v18 }
 0x1a4   : > { %v8414_v23 = vsel %vm8374_vm3, %v2326_v17, %v2330_v19  ;;  %v7658_v52 = vrot.slane %v3352_v43, 9  ;;  %v8500_v45 = vsel %vm8454_vm7, %v7657_v51, %v3386_v20  ;;  %v7659_v56 = vrot.slane %v3353_v53, 9 }
 0x1a5   : > { %v8479_v40 = vsel %vm8454_vm7, %v3395_v54, %v3396_v37  ;;  %v8488_v46 = vsel %vm8454_vm7, %v3402_v30, %v3403_v41 }
 0x1a6   : > { %v8504_v55 = vsel %vm8454_vm7, %v7658_v52, %v3393_v34  ;;  %v8512_v57 = vsel %vm8454_vm7, %v7659_v56, %v3400_v36 }
 0x1a7   : > { %1921 = vrot.lane.b32.xlu0 %v8310_v62, %s8009_s24  ;;  %1907 = vrot.lane.b32.xlu1 %v8306_v58, %s8009_s24  ;;  %v8475_v62 = vsel %vm8454_vm7, %v3388_v42, %v3389_v15 }
 0x1ab   : > { %1911 = vrot.lane.b32.xlu0 %v8318_v1, %s8009_s24  ;;  %1915 = vrot.lane.b32.xlu1 %v8320_v2, %s8009_s24 }
 0x1af   : > { %1919 = vrot.lane.b32.xlu0 %v8326_v3, %s8009_s24  ;;  %3034 = vrot.lane.b32.xlu1 %v8388_v61, %s8009_s24 }
 0x1b3   : > { %3038 = vrot.lane.b32.xlu0 %v8397_v12, %s8009_s24  ;;  %3042 = vrot.lane.b32.xlu1 %v8401_v14, %s8009_s24 }
 0x1b7   : > { %3046 = vrot.lane.b32.xlu0 %v8414_v23, %s8009_s24  ;;  %3032 = vrot.lane.b32.xlu1 %v8410_v22, %s8009_s24 }
 0x1bb   : > { %3036 = vrot.lane.b32.xlu0 %v8423_v29, %s8009_s24  ;;  %3040 = vrot.lane.b32.xlu1 %v8428_v11, %s8009_s24 }
 0x1bf   : > { %3044 = vrot.lane.b32.xlu0 %v8436_v13, %s8009_s24  ;;  %2716 = vrot.lane.b32.xlu1 %v8388_v61, %s8008_s23 }
 0x1c3   : > { %2720 = vrot.lane.b32.xlu0 %v8397_v12, %s8008_s23  ;;  %2724 = vrot.lane.b32.xlu1 %v8401_v14, %s8008_s23 }
 0x1c7   : > { %2728 = vrot.lane.b32.xlu0 %v8414_v23, %s8008_s23  ;;  %2714 = vrot.lane.b32.xlu1 %v8410_v22, %s8008_s23 }
 0x1cb   : > { %2718 = vrot.lane.b32.xlu0 %v8423_v29, %s8008_s23  ;;  %2722 = vrot.lane.b32.xlu1 %v8428_v11, %s8008_s23 }
 0x1cf   : > { %2726 = vrot.lane.b32.xlu0 %v8436_v13, %s8008_s23  ;;  %3721 = vrot.lane.b32.xlu1 %v8465_v47, %s8008_s23 }
 0x1d3   : > { %3725 = vrot.lane.b32.xlu0 %v8475_v62, %s8008_s23  ;;  %3729 = vrot.lane.b32.xlu1 %v8479_v40, %s8008_s23 }
 0x1d7   : > { %3733 = vrot.lane.b32.xlu0 %v8488_v46, %s8008_s23  ;;  %3719 = vrot.lane.b32.xlu1 %v8492_v50, %s8008_s23 }
 0x1db   : > { %3723 = vrot.lane.b32.xlu0 %v8500_v45, %s8008_s23  ;;  %3727 = vrot.lane.b32.xlu1 %v8504_v55, %s8008_s23 }
 0x1df   : > { %3731 = vrot.lane.b32.xlu0 %v8512_v57, %s8008_s23  ;;  %4037 = vrot.lane.b32.xlu1 %v8492_v50, %s8009_s24 }
 0x1e3   : > { %4039 = vrot.lane.b32.xlu0 %v8465_v47, %s8009_s24  ;;  %4041 = vrot.lane.b32.xlu1 %v8500_v45, %s8009_s24 }
 0x1e7   : > { %4043 = vrot.lane.b32.xlu0 %v8475_v62, %s8009_s24  ;;  %4045 = vrot.lane.b32.xlu1 %v8504_v55, %s8009_s24 }
 0x1eb   : > { %4047 = vrot.lane.b32.xlu0 %v8479_v40, %s8009_s24  ;;  %4049 = vrot.lane.b32.xlu1 %v8512_v57, %s8009_s24 }
 0x1ef   : > { %4051 = vrot.lane.b32.xlu0 %v8488_v46, %s8009_s24 }
 0x1fd   : > { %v8532_v59 = vpop.permute.xlu1 %1591 }
 0x1fe   : > { %12366 = vst [vmem:[#allocation14_spill] sm:$0xff] %v8532_v59 }
 0x201   : > { %v8534_v60 = vpop.permute.xlu0 %1595 }
 0x202   : > { %12367 = vst [vmem:[#allocation15_spill] sm:$0xff] %v8534_v60 }
 0x205   : > { %v8536_v63 = vpop.permute.xlu1 %1599 }
 0x206   : > { %12368 = vst [vmem:[#allocation16_spill] sm:$0xff] %v8536_v63 }
 0x209   : > { %v8538_v0 = vpop.permute.xlu0 %1603  ;;  %v8540_v4 = vpop.permute.xlu1 %1589 }
 0x20a   : > { %12369 = vst [vmem:[#allocation17_spill] sm:$0xff] %v8538_v0  ;;  %12370 = vst [vmem:[#allocation18_spill] sm:$0xff] %v8540_v4 }
 0x20d   : > { %v8542_v5 = vpop.permute.xlu0 %1593  ;;  %v8544_v6 = vpop.permute.xlu1 %1597 }
 0x20e   : > { %12371 = vst [vmem:[#allocation19_spill] sm:$0xff] %v8542_v5  ;;  %12372 = vst [vmem:[#allocation20_spill] sm:$0xff] %v8544_v6 }
 0x211   : > { %v8546_v7 = vpop.permute.xlu0 %1601  ;;  %v8548_v9 = vpop.permute.xlu1 %1909  ;;  %v12457_v44 = vld [vmem:[#allocation18_spill] sm:$0xff] }
 0x212   : > { %12373 = vst [vmem:[#allocation21_spill] sm:$0xff] %v8546_v7  ;;  %12374 = vst [vmem:[#allocation22_spill] sm:$0xff] %v8548_v9 }
 0x215   : > { %v8552_v17 = vpop.permute.xlu0 %1913  ;;  %v8560_v28 = vpop.permute.xlu1 %1917 }
 0x216   : > { %12375 = vst [vmem:[#allocation23_spill] sm:$0xff] %v8552_v17  ;;  %12376 = vst [vmem:[#allocation24_spill] sm:$0xff] %v8560_v28 }
 0x219   : > { %v8564_v32 = vpop.permute.xlu0 %1921  ;;  %v8570_v18 = vpop.permute.xlu1 %1907 }
 0x21a   : > { %12377 = vst [vmem:[#allocation25_spill] sm:$0xff] %v8564_v32  ;;  %12378 = vst [vmem:[#allocation26_spill] sm:$0xff] %v8570_v18 }
 0x21d   : > { %v8574_v20 = vpop.permute.xlu0 %1911  ;;  %v8576_v21 = vpop.permute.xlu1 %1915 }
 0x21e   : > { %12379 = vst [vmem:[#allocation27_spill] sm:$0xff] %v8574_v20  ;;  %12380 = vst [vmem:[#allocation28_spill] sm:$0xff] %v8576_v21  ;;  %v7989_v21 = vld [vmem:[#allocation2 + $0x1c] sm:$0xf] }
 0x221   : > { %v8578_v33 = vpop.permute.xlu0 %1919  ;;  %v8580_v34 = vpop.permute.xlu1 %3034 }
 0x222   : > { %12381 = vst [vmem:[#allocation29_spill] sm:$0xff] %v8578_v33  ;;  %12382 = vst [vmem:[#allocation30_spill] sm:$0xff] %v8580_v34 }
 0x225   : > { %v8582_v42 = vpop.permute.xlu0 %3038  ;;  %v8584_v36 = vpop.permute.xlu1 %3042 }
 0x226   : > { %12383 = vst [vmem:[#allocation31_spill] sm:$0xff] %v8582_v42  ;;  %12384 = vst [vmem:[#allocation32_spill] sm:$0xff] %v8584_v36 }
 0x229   : > { %v8586_v15 = vpop.permute.xlu0 %3046  ;;  %v8588_v54 = vpop.permute.xlu1 %3032 }
 0x22a   : > { %12385 = vst [vmem:[#allocation33_spill] sm:$0xff] %v8586_v15  ;;  %12386 = vst [vmem:[#allocation34_spill] sm:$0xff] %v8588_v54 }
 0x22d   : > { %v8590_v37 = vpop.permute.xlu0 %3036  ;;  %v8592_v38 = vpop.permute.xlu1 %3040 }
 0x22e   : > { %12387 = vst [vmem:[#allocation35_spill] sm:$0xff] %v8590_v37  ;;  %12388 = vst [vmem:[#allocation36_spill] sm:$0xff] %v8592_v38 }
 0x231   : > { %v8594_v39 = vpop.permute.xlu0 %3044  ;;  %v8596_v30 = vpop.permute.xlu1 %2716 }
 0x232   : > { %12389 = vst [vmem:[#allocation37_spill] sm:$0xff] %v8594_v39  ;;  %12390 = vst [vmem:[#allocation38_spill] sm:$0xff] %v8596_v30 }
 0x235   : > { %v8598_v41 = vpop.permute.xlu0 %2720  ;;  %v8600_v31 = vpop.permute.xlu1 %2724 }
 0x236   : > { %12391 = vst [vmem:[#allocation39_spill] sm:$0xff] %v8598_v41  ;;  %12392 = vst [vmem:[#allocation40_spill] sm:$0xff] %v8600_v31 }
 0x239   : > { %v8602_v43 = vpop.permute.xlu0 %2728  ;;  %v8604_v51 = vpop.permute.xlu1 %2714 }
 0x23a   : > { %12393 = vst [vmem:[#allocation41_spill] sm:$0xff] %v8602_v43  ;;  %12394 = vst [vmem:[#allocation42_spill] sm:$0xff] %v8604_v51 }
 0x23d   : > { %v8606_v52 = vpop.permute.xlu0 %2718  ;;  %v8608_v53 = vpop.permute.xlu1 %2722 }
 0x23e   : > { %12395 = vst [vmem:[#allocation43_spill] sm:$0xff] %v8606_v52  ;;  %12396 = vst [vmem:[#allocation44_spill] sm:$0xff] %v8608_v53 }
 0x241   : > { %v8610_v56 = vpop.permute.xlu0 %2726 }
 0x242   : > { %12397 = vst [vmem:[#allocation45_spill] sm:$0xff] %v8610_v56 }
 0x258   : > { %v8550_v10 = vpop.f32.mrb[0].mxu1 }
 0x259   : > { %v7958_v19 = vpop.f32.mrb[1].mxu1  ;;  %637 = vrot.lane.b32.xlu1 %v8550_v10, %s8010_s25 }
 0x25a   : > { %v8556_v24 = vpop.f32.mrb[2].mxu1  ;;  %v8612_v19 = vpop.permute.xlu1 %3721 }
 0x25b   : > { %v7959_v25 = vpop.f32.mrb[3].mxu1  ;;  %639 = vrot.lane.b32.xlu0 %v8556_v24, %s8010_s25  ;;  %12398 = vst [vmem:[#allocation46_spill] sm:$0xff] %v8612_v19 }
 0x25c   : > { %v8614_v25 = vpop.permute.xlu0 %3725 }
 0x25d   : > { %643 = vrot.lane.b32.xlu1 %v8550_v10, %s8011_s26  ;;  %12399 = vst [vmem:[#allocation47_spill] sm:$0xff] %v8614_v25 }
 0x25e   : > { %v8616_v8 = vpop.permute.xlu1 %3729 }
 0x25f   : > { %645 = vrot.lane.b32.xlu0 %v8556_v24, %s8011_s26  ;;  %12400 = vst [vmem:[#allocation48_spill] sm:$0xff] %v8616_v8 }
 0x260   : > { %v8618_v30 = vpop.permute.xlu0 %3733 }
 0x261   : > { %649 = vrot.lane.b32.xlu1 %v8550_v10, %s8012_s29  ;;  %12401 = vst [vmem:[#allocation49_spill] sm:$0xff] %v8618_v30 }
 0x262   : > { %v8620_v41 = vpop.permute.xlu1 %3719 }
 0x263   : > { %651 = vrot.lane.b32.xlu0 %v8556_v24, %s8012_s29  ;;  %12402 = vst [vmem:[#allocation50_spill] sm:$0xff] %v8620_v41 }
 0x264   : > { %v8622_v31 = vpop.permute.xlu0 %3723 }
 0x265   : > { %12403 = vst [vmem:[#allocation51_spill] sm:$0xff] %v8622_v31 }
 0x266   : > { %v8624_v42 = vpop.permute.xlu1 %3727 }
 0x267   : > { %12404 = vst [vmem:[#allocation52_spill] sm:$0xff] %v8624_v42 }
 0x268   : > { %v8626_v36 = vpop.permute.xlu0 %3731 }
 0x269   : > { %12405 = vst [vmem:[#allocation53_spill] sm:$0xff] %v8626_v36 }
 0x26a   : > { %v8628_v43 = vpop.permute.xlu1 %4037 }
 0x26b   : > { %12406 = vst [vmem:[#allocation54_spill] sm:$0xff] %v8628_v43 }
 0x26c   : > { %v8630_v15 = vpop.permute.xlu0 %4039 }
 0x26d   : > { %12407 = vst [vmem:[#allocation55_spill] sm:$0xff] %v8630_v15 }
 0x26e   : > { %v8632_v34 = vpop.permute.xlu1 %4041 }
 0x26f   : > { %12408 = vst [vmem:[#allocation56_spill] sm:$0xff] %v8632_v34 }
 0x270   : > { %v8634_v56 = vpop.permute.xlu0 %4043 }
 0x271   : > { %12409 = vst [vmem:[#allocation57_spill] sm:$0xff] %v8634_v56 }
 0x272   : > { %v8636_v52 = vpop.permute.xlu1 %4045 }
 0x273   : > { %12410 = vst [vmem:[#allocation58_spill] sm:$0xff] %v8636_v52 }
 0x274   : > { %v8638_v51 = vpop.permute.xlu0 %4047 }
 0x275   : > { %12411 = vst [vmem:[#allocation59_spill] sm:$0xff] %v8638_v51 }
 0x276   : > { %v8640_v53 = vpop.permute.xlu1 %4049 }
 0x277   : > { %12412 = vst [vmem:[#allocation60_spill] sm:$0xff] %v8640_v53 }
 0x278   : > { %v8642_v37 = vpop.permute.xlu0 %4051 }
 0x279   : > { %12413 = vst [vmem:[#allocation61_spill] sm:$0xff] %v8642_v37 }
 0x2cb   : > { %v638_v38 = vpop.permute.xlu1 %637 }
 0x2cd   : > { %v640_v54 = vpop.permute.xlu0 %639 }
 0x2cf   : > { %v644_v39 = vpop.permute.xlu1 %643 }
 0x2d0   : > { %v655_v19 = vcombine.low %v8550_v10, %v644_v39  ;;  %v656_v8 = vcombine.high %v8550_v10, %v644_v39 }
 0x2d1   : > { %v646_v30 = vpop.permute.xlu0 %645 }
 0x2d2   : > { %v663_v31 = vrot.slane %v655_v19, %v8083_v16  ;;  %v670_v52 = vrot.slane %v656_v8, %v8083_v16  ;;  %v723_v36 = vcombine.low %v8556_v24, %v646_v30  ;;  %v724_v53 = vcombine.high %v8556_v24, %v646_v30 }
 0x2d3   : > { %v650_v25 = vpop.permute.xlu1 %649 }
 0x2d4   : > { %v671_v34 = vcombine.low %v638_v38, %v650_v25  ;;  %v672_v43 = vcombine.high %v638_v38, %v650_v25  ;;  %v731_v38 = vrot.slane %v723_v36, %v8083_v16  ;;  %v738_v19 = vrot.slane %v724_v53, %v8083_v16 }
 0x2d5   : > { %v652_v41 = vpop.permute.xlu0 %651 }
 0x2d6   : > { %v679_v42 = vrot.slane %v671_v34, %v8083_v16  ;;  %v686_v37 = vrot.slane %v672_v43, %v8083_v16  ;;  %v739_v56 = vcombine.low %v640_v54, %v652_v41  ;;  %v740_v51 = vcombine.high %v640_v54, %v652_v41 }
 0x2d8   : > { %v687_v10 = vcombine.low %v663_v31, %v679_v42  ;;  %v688_v39 = vcombine.high %v663_v31, %v679_v42  ;;  %v703_v15 = vcombine.low %v670_v52, %v686_v37  ;;  %v704_v60 = vcombine.high %v670_v52, %v686_v37 }
 0x2d9   : > { %v747_v8 = vrot.slane %v739_v56, %v8083_v16  ;;  %v754_v25 = vrot.slane %v740_v51, %v8083_v16 }
 0x2da   : > { %v695_v24 = vrot.slane %v687_v10, %v8087_v27  ;;  %v702_v34 = vrot.slane %v688_v39, %v8087_v27  ;;  %v711_v30 = vrot.slane %v703_v15, %v8087_v27  ;;  %v718_v54 = vrot.slane %v704_v60, %v8087_v27 }
 0x2db   : > { %v755_v41 = vcombine.low %v731_v38, %v747_v8  ;;  %v756_v42 = vcombine.high %v731_v38, %v747_v8  ;;  %v771_v31 = vcombine.low %v738_v19, %v754_v25  ;;  %v772_v37 = vcombine.high %v738_v19, %v754_v25 }
 0x2dc   : > { %v791_v43 = vcombine.low %v695_v24, %v702_v34  ;;  %v7552_v36 = vcombine.high %v695_v24, %v702_v34  ;;  %v807_v52 = vcombine.low %v711_v30, %v718_v54  ;;  %v7553_v53 = vcombine.high %v711_v30, %v718_v54 }
 0x2dd   : > { %v763_v56 = vrot.slane %v755_v41, %v8087_v27  ;;  %v770_v51 = vrot.slane %v756_v42, %v8087_v27  ;;  %v779_v10 = vrot.slane %v771_v31, %v8087_v27  ;;  %v786_v39 = vrot.slane %v772_v37, %v8087_v27 }
 0x2de   : > { %v798_v15 = vrot.slane %v791_v43, %v8083_v16  ;;  %v806_v60 = vrot.slane %v7552_v36, %v8083_v16  ;;  %v814_v38 = vrot.slane %v807_v52, %v8083_v16  ;;  %v822_v19 = vrot.slane %v7553_v53, %v8083_v16 }
 0x2df   : > { %v859_v8 = vcombine.low %v763_v56, %v770_v51  ;;  %v7554_v25 = vcombine.high %v763_v56, %v770_v51  ;;  %v875_v24 = vcombine.low %v779_v10, %v786_v39  ;;  %v7555_v34 = vcombine.high %v779_v10, %v786_v39 }
 0x2e0   : > { %v823_v30 = vcombine.low %v798_v15, %v806_v60  ;;  %v839_v54 = vcombine.low %v814_v38, %v822_v19  ;;  %v824_v41 = vcombine.high %v798_v15, %v806_v60  ;;  %v840_v42 = vcombine.high %v814_v38, %v822_v19 }
 0x2e1   : > { %v866_v31 = vrot.slane %v859_v8, %v8083_v16  ;;  %v874_v37 = vrot.slane %v7554_v25, %v8083_v16  ;;  %v882_v43 = vrot.slane %v875_v24, %v8083_v16  ;;  %v890_v36 = vrot.slane %v7555_v34, %v8083_v16 }
 0x2e2   : > { %v831_v52 = vrot.slane %v823_v30, %v8087_v27  ;;  %v847_v53 = vrot.slane %v839_v54, %v8087_v27  ;;  %v838_v56 = vrot.slane %v824_v41, %v8087_v27  ;;  %v854_v51 = vrot.slane %v840_v42, %v8087_v27 }
 0x2e3   : > { %v891_v10 = vcombine.low %v866_v31, %v874_v37  ;;  %v907_v39 = vcombine.low %v882_v43, %v890_v36  ;;  %v892_v15 = vcombine.high %v866_v31, %v874_v37  ;;  %v908_v60 = vcombine.high %v882_v43, %v890_v36 }
 0x2e4   : > { %v855_v38 = vcombine.low %v831_v52, %v847_v53  ;;  %v856_v19 = vcombine.high %v831_v52, %v847_v53  ;;  %v857_v8 = vcombine.low %v838_v56, %v854_v51  ;;  %v858_v25 = vcombine.high %v838_v56, %v854_v51 }
 0x2e5   : > { %v899_v24 = vrot.slane %v891_v10, %v8087_v27  ;;  %v915_v34 = vrot.slane %v907_v39, %v8087_v27  ;;  %v906_v30 = vrot.slane %v892_v15, %v8087_v27  ;;  %v922_v54 = vrot.slane %v908_v60, %v8087_v27 }
 0x2e6   : > { %v7863_v63 = vpack.c.bf16 %v855_v38, %v855_v38  ;;  %v7865_v41 = vpack.c.bf16 %v856_v19, %v856_v19  ;;  %v7867_v59 = vpack.c.bf16 %v857_v8, %v857_v8  ;;  %v7869_v31 = vpack.c.bf16 %v858_v25, %v858_v25 }
 0x2e7   : > { %v924_v42 = vcombine.high %v899_v24, %v915_v34  ;;  %v926_v9 = vcombine.high %v906_v30, %v922_v54  ;;  %v923_v0 = vcombine.low %v899_v24, %v915_v34  ;;  %v925_v39 = vcombine.low %v906_v30, %v922_v54 }
 0x2e8   : > { %v1151_v37 = vshrl.u32 %v7863_v63, 16  ;;  %v1168_v43 = vshrl.u32 %v7865_v41, 16  ;;  %v1185_v53 = vshrl.u32 %v7867_v59, 16  ;;  %v1154_v51 = vshll.u32 %v7863_v63, 16 }
 0x2e9   : > { %v7866_v36 = vpack.c.bf16 %v924_v42, %v924_v42  ;;  %v7870_v52 = vpack.c.bf16 %v926_v9, %v926_v9  ;;  %v7864_v10 = vpack.c.bf16 %v923_v0, %v923_v0  ;;  %v1202_v60 = vshrl.u32 %v7869_v31, 16 }
 0x2ea   : > { %v1153_v56 = vrot.slane %v1151_v37, 7  ;;  %v1170_v15 = vrot.slane %v1168_v43, 7  ;;  %v1171_v32 = vshll.u32 %v7865_v41, 16  ;;  %v1187_v18 = vrot.slane %v1185_v53, 7 }
 0x2eb   : > { %v1176_v17 = vshrl.u32 %v7866_v36, 16  ;;  %v1210_v28 = vshrl.u32 %v7870_v52, 16  ;;  %v1159_v19 = vshrl.u32 %v7864_v10, 16  ;;  %v1162_v34 = vshll.u32 %v7864_v10, 16 }
 0x2ec   : > { %v1156_v38 = vor.u32 %v1154_v51, %v1153_v56  ;;  %v1179_v9 = vshll.u32 %v7866_v36, 16  ;;  %v1173_v37 = vor.u32 %v1171_v32, %v1170_v15  ;;  %v1204_v63 = vrot.slane %v1202_v60, 7 }
 0x2ed   : > { %v1178_v8 = vrot.slane %v1176_v17, 7  ;;  %v1212_v25 = vrot.slane %v1210_v28, 7  ;;  %v1161_v24 = vrot.slane %v1159_v19, 7  ;;  %v7868_v0 = vpack.c.bf16 %v925_v39, %v925_v39 }
 0x2ee   : > { %1218 = vrot.lane.b32.xlu1 %v1156_v38, %s8007_s20  ;;  %v1157_v30 = vrot.slane %v1153_v56, 4  ;;  %v1174_v43 = vrot.slane %v1170_v15, 4  ;;  %v1213_v17 = vshll.u32 %v7870_v52, 16  ;;  %v1188_v53 = vshll.u32 %v7867_v59, 16 }
 0x2ef   : > { %v1183_v42 = vrot.slane %v1178_v8, 4  ;;  %v1164_v54 = vor.u32 %v1162_v34, %v1161_v24  ;;  %v1181_v20 = vor.u32 %v1179_v9, %v1178_v8  ;;  %v1193_v51 = vshrl.u32 %v7868_v0, 16  ;;  %v1266_v9 = vld [vmem:[#allocation2 + $0x44] sm:$0x1] }
 0x2f0   : > { %v1217_v41 = vrot.slane %v1212_v25, 4  ;;  %v1196_v10 = vshll.u32 %v7868_v0, 16  ;;  %v1208_v56 = vrot.slane %v1204_v63, 4  ;;  %v1215_v39 = vor.u32 %v1213_v17, %v1212_v25 }
 0x2f1   : > { %1228 = vrot.lane.b32.xlu0 %v1183_v42, %s8007_s20  ;;  %v1165_v28 = vsel %vm8212_vm6, %v1157_v30, %v1164_v54  ;;  %v1182_v32 = vsel %vm8212_vm6, %v1174_v43, %v1181_v20  ;;  %v1195_v36 = vrot.slane %v1193_v51, 7  ;;  %v1190_v15 = vor.u32 %v1188_v53, %v1187_v18  ;;  %v1262_v42 = vld [vmem:[#allocation2 + $0x3c] sm:$0xf]  ;;  %v1269_v54 = vld [vmem:[#allocation2 + $0x48] sm:$0xf] }
 0x2f2   : > { %1224 = vrot.lane.b32.xlu1 %v1173_v37, %s8007_s20  ;;  %v1191_v60 = vrot.slane %v1187_v18, 4  ;;  %v1216_v52 = vsel %vm8212_vm6, %v1208_v56, %v1215_v39  ;;  %v1205_v59 = vshll.u32 %v7869_v31, 16  ;;  %v1166_v20 = vrot.slane %v1161_v24, 4  ;;  %v1255_v31 = vld [vmem:[#allocation2 + $0x30] sm:$0xf] }
 0x2f3   : > { %v1198_v38 = vor.u32 %v1196_v10, %v1195_v36  ;;  %v1200_v18 = vrot.slane %v1195_v36, 4  ;;  %v1280_v30 = vld [vmem:[#allocation2 + $0x5c] sm:$0x1]  ;;  %v1259_v39 = vld [vmem:[#allocation2 + $0x38] sm:$0x1] }
 0x2f4   : > { %v1207_v8 = vor.u32 %v1205_v59, %v1204_v63 }
 0x2f5   : > { %1240 = vrot.lane.b32.xlu0 %v1217_v41, %s8007_s20  ;;  %v1199_v19 = vsel %vm8212_vm6, %v1191_v60, %v1198_v38 }
 0x2f6   : > { %1230 = vrot.lane.b32.xlu1 %v1190_v15, %s8007_s20 }
 0x2f9   : > { %1220 = vrot.lane.b32.xlu0 %v1165_v28, %s8007_s20  ;;  %v1276_v28 = vld [vmem:[#allocation2 + $0x54] sm:$0xf] }
 0x2fa   : > { %1236 = vrot.lane.b32.xlu1 %v1207_v8, %s8007_s20  ;;  %v1273_v8 = vld [vmem:[#allocation2 + $0x50] sm:$0x1] }
 0x2fd   : > { %1226 = vrot.lane.b32.xlu0 %v1182_v32, %s8007_s20 }
 0x2fe   : > { %1222 = vrot.lane.b32.xlu1 %v1166_v20, %s8007_s20 }
 0x301   : > { %1232 = vrot.lane.b32.xlu0 %v1199_v19, %s8007_s20 }
 0x302   : > { %1234 = vrot.lane.b32.xlu1 %v1200_v18, %s8007_s20 }
 0x305   : > { %1238 = vrot.lane.b32.xlu0 %v1216_v52, %s8007_s20 }
 0x360   : > { %v1219_v25 = vpop.permute.xlu1 %1218 }
 0x361   : > { %v1256_v34 = vsel %vm8261_vm13, %v1219_v25, %v1255_v31 }
 0x362   : > { %1257 = vst [vmem:[#allocation2 + $0x30] sm:$0xf] %v1256_v34 }
 0x363   : > { %v1229_v24 = vpop.permute.xlu0 %1228 }
 0x364   : > { %v1267_v37 = vsel %vm8291_vm15, %v1229_v24, %v1266_v9  ;;  %v1225_v63 = vpop.permute.xlu1 %1224 }
 0x365   : > { %1268 = vst [vmem:[#allocation2 + $0x44] sm:$0x1] %v1267_v37  ;;  %v1263_v0 = vsel %vm8261_vm13, %v1225_v63, %v1262_v42 }
 0x366   : > { %1264 = vst [vmem:[#allocation2 + $0x3c] sm:$0xf] %v1263_v0 }
 0x367   : > { %v1241_v43 = vpop.permute.xlu0 %1240 }
 0x368   : > { %v1281_v51 = vsel %vm8291_vm15, %v1241_v43, %v1280_v30  ;;  %v1231_v17 = vpop.permute.xlu1 %1230 }
 0x369   : > { %1282 = vst [vmem:[#allocation2 + $0x5c] sm:$0x1] %v1281_v51  ;;  %v1270_v41 = vsel %vm8261_vm13, %v1231_v17, %v1269_v54  ;;  %v8710_v53 = vld [vmem:[#allocation2 + $0x30] sm:$0xf] }
 0x36a   : > { %1271 = vst [vmem:[#allocation2 + $0x48] sm:$0xf] %v1270_v41  ;;  %1605 = vrot.lane.b32.xlu1 %v8710_v53, %s8008_s23  ;;  %v1299_v60 = vcombine.low %v8306_v58, %v8710_v53  ;;  %v3354_v42 = vld [vmem:[#allocation2 + $0x30] sm:$0xe] }
 0x36b   : > { %v1221_v32 = vpop.permute.xlu0 %1220  ;;  %v7660_v43 = vrot.slane %v3354_v42, 9 }
 0x36c   : > { %1258 = vst.msk [vmem:[#allocation2 + $0x34] sm:$0xf] %vm1092_vm12, %v1221_v32  ;;  %v1237_v36 = vpop.permute.xlu1 %1236  ;;  %v8735_v58 = vrot.slane %v1299_v60, %v8083_v16 }
 0x36d   : > { %v1277_v10 = vsel %vm8261_vm13, %v1237_v36, %v1276_v28  ;;  %v8717_v56 = vld [vmem:[#allocation2 + $0x3c] sm:$0xf] }
 0x36e   : > { %1278 = vst [vmem:[#allocation2 + $0x54] sm:$0xf] %v1277_v10  ;;  %1609 = vrot.lane.b32.xlu0 %v8717_v56, %s8008_s23  ;;  %v1333_v31 = vcombine.low %v8318_v1, %v8717_v56  ;;  %v3355_v51 = vld [vmem:[#allocation2 + $0x3c] sm:$0xe]  ;;  %v8780_v10 = vld [vmem:[#allocation2 + $0x44] sm:$0x1] }
 0x36f   : > { %v1227_v15 = vpop.permute.xlu0 %1226  ;;  %v7661_v36 = vrot.slane %v3355_v51, 9 }
 0x370   : > { %1265 = vst.msk [vmem:[#allocation2 + $0x40] sm:$0xf] %vm1092_vm12, %v1227_v15  ;;  %v1223_v38 = vpop.permute.xlu1 %1222  ;;  %v8759_v30 = vrot.slane %v1333_v31, %v8083_v16 }
 0x371   : > { %v1260_v52 = vsel %vm8291_vm15, %v1223_v38, %v1259_v39  ;;  %v8726_v59 = vld [vmem:[#allocation2 + $0x48] sm:$0xf] }
 0x372   : > { %1261 = vst [vmem:[#allocation2 + $0x38] sm:$0x1] %v1260_v52  ;;  %v1307_v19 = vcombine.low %v8320_v2, %v8726_v59  ;;  %1613 = vrot.lane.b32.xlu1 %v8726_v59, %s8008_s23  ;;  %v3356_v17 = vld [vmem:[#allocation2 + $0x48] sm:$0xe]  ;;  %v2384_v48 = vshll.u32 %v8726_v59, 16 }
 0x373   : > { %v1233_v20 = vpop.permute.xlu0 %1232  ;;  %v8732_v18 = vld [vmem:[#allocation2 + $0x34] sm:$0xf]  ;;  %v7662_v39 = vrot.slane %v3356_v17, 9 }
 0x374   : > { %v8740_v25 = vrot.slane %v1307_v19, %v8083_v16  ;;  %1272 = vst.msk [vmem:[#allocation2 + $0x4c] sm:$0xf] %vm1092_vm12, %v1233_v20  ;;  %v1235_v34 = vpop.permute.xlu1 %1234  ;;  %v12280_v37 = vrot.slane %v8732_v18, 5  ;;  %v3417_v20 = vrot.slane %v8780_v10, 5 }
 0x375   : > { %v1274_v2 = vsel %vm8291_vm15, %v1235_v34, %v1273_v8  ;;  %v8745_v9 = vld [vmem:[#allocation2 + $0x54] sm:$0xf]  ;;  %v8802_v34 = vld [vmem:[#allocation2 + $0x5c] sm:$0x1] }
 0x376   : > { %1275 = vst [vmem:[#allocation2 + $0x50] sm:$0x1] %v1274_v2  ;;  %1923 = vrot.lane.b32.xlu1 %v8710_v53, %s8009_s24  ;;  %v1341_v1 = vcombine.low %v8326_v3, %v8745_v9  ;;  %1617 = vrot.lane.b32.xlu0 %v8745_v9, %s8008_s23  ;;  %v8776_v28 = vsel %vm8454_vm7, %v7660_v43, %v12280_v37  ;;  %v3357_v19 = vld [vmem:[#allocation2 + $0x54] sm:$0xe]  ;;  %v2381_v37 = vshrl.u32 %v8726_v59, 16 }
 0x377   : > { %v1239_v63 = vpop.permute.xlu0 %1238  ;;  %v8756_v0 = vld [vmem:[#allocation2 + $0x40] sm:$0xf]  ;;  %v3449_v38 = vcombine.low %v8492_v50, %v8776_v28  ;;  %v7663_v42 = vrot.slane %v3357_v19, 9 }
 0x378   : > { %v8762_v54 = vrot.slane %v1341_v1, %v8083_v16  ;;  %1279 = vst.msk [vmem:[#allocation2 + $0x58] sm:$0xf] %vm1092_vm12, %v1239_v63  ;;  %v3414_v3 = vrot.slane %v8756_v0, 5  ;;  %v2366_v49 = vshll.u32 %v8756_v0, 16 }
 0x379   : > { %v8812_v43 = vrot.slane %v3449_v38, %v8083_v16  ;;  %v8836_v19 = vld [vmem:[#allocation2 + $0x38] sm:$0x1] }
 0x37a   : > { %1931 = vrot.lane.b32.xlu1 %v8726_v59, %s8009_s24  ;;  %1927 = vrot.lane.b32.xlu0 %v8717_v56, %s8009_s24  ;;  %v3416_v60 = vrot.slane %v3414_v3, 4  ;;  %v8787_v52 = vsel %vm8454_vm7, %v7661_v36, %v3414_v3  ;;  %v3431_v3 = vrot.slane %v8802_v34, 5  ;;  %v2376_v59 = vshll.u32 %v8780_v10, 16 }
 0x37b   : > { %v8778_v32 = vld [vmem:[#allocation2 + $0x4c] sm:$0xf]  ;;  %v3483_v2 = vcombine.low %v8500_v45, %v8787_v52 }
 0x37c   : > { %v3421_v15 = vrot.slane %v8778_v32, 5  ;;  %v8809_v63 = vsel %vm8454_vm7, %v3416_v60, %v3417_v20  ;;  %v8901_v10 = vrot.slane %v2376_v59, 5  ;;  %v1316_v59 = vcombine.high %v8735_v58, %v8740_v25 }
 0x37d   : > { %v8826_v17 = vld [vmem:[#allocation2 + $0x50] sm:$0x1]  ;;  %v3551_v38 = vcombine.low %v8475_v62, %v8809_v63  ;;  %v8839_v20 = vrot.slane %v3483_v2, %v8083_v16  ;;  %v3410_v2 = vrot.slane %v8836_v19, 5 }
 0x37e   : > { %1935 = vrot.lane.b32.xlu0 %v8745_v9, %s8009_s24  ;;  %1607 = vrot.lane.b32.xlu1 %v8732_v18, %s8008_s23  ;;  %v8795_v8 = vsel %vm8454_vm7, %v7662_v39, %v3421_v15  ;;  %v3423_v62 = vrot.slane %v3421_v15, 4  ;;  %v3424_v36 = vrot.slane %v8826_v17, 5 }
 0x37f   : > { %v8798_v31 = vld [vmem:[#allocation2 + $0x58] sm:$0xf]  ;;  %v3457_v50 = vcombine.low %v8504_v55, %v8795_v8  ;;  %v8865_v15 = vrot.slane %v3551_v38, %v8083_v16 }
 0x380   : > { %v3428_v1 = vrot.slane %v8798_v31, 5  ;;  %v8880_v38 = vsel %vm8454_vm7, %v3423_v62, %v3424_v36  ;;  %v2342_v36 = vshll.u32 %v8732_v18, 16  ;;  %v2383_v62 = vrot.slane %v2381_v37, 4 }
 0x381   : > { %v8815_v51 = vrot.slane %v3457_v50, %v8083_v16 }
 0x382   : > { %1611 = vrot.lane.b32.xlu0 %v8756_v0, %s8008_s23  ;;  %1615 = vrot.lane.b32.xlu1 %v8778_v32, %s8008_s23  ;;  %v8823_v45 = vsel %vm8454_vm7, %v7663_v42, %v3428_v1  ;;  %v3430_v55 = vrot.slane %v3428_v1, 4  ;;  %v2333_v42 = vshrl.u32 %v8710_v53, 16  ;;  %v2336_v1 = vshll.u32 %v8710_v53, 16 }
 0x383   : > { %v3491_v60 = vcombine.low %v8512_v57, %v8823_v45  ;;  %v2360_v53 = vshll.u32 %v8717_v56, 16 }
 0x384   : > { %v8843_v50 = vsel %vm8454_vm7, %v3430_v55, %v3431_v3  ;;  %v2357_v55 = vshrl.u32 %v8717_v56, 16  ;;  %v2335_v41 = vrot.slane %v2333_v42, 4  ;;  %v2338_v24 = vrot.slane %v2336_v1, 5 }
 0x385   : > { %v8848_v39 = vrot.slane %v3491_v60, %v8083_v16  ;;  %v3559_v57 = vcombine.low %v8488_v46, %v8843_v50  ;;  %v12414_v46 = vrot.slane %v8732_v18, 5  ;;  %v2386_v56 = vrot.slane %v2384_v48, 5 }
 0x386   : > { %1925 = vrot.lane.b32.xlu1 %v8732_v18, %s8009_s24  ;;  %1619 = vrot.lane.b32.xlu0 %v8798_v31, %s8008_s23  ;;  %v2359_v1 = vrot.slane %v2357_v55, 4  ;;  %v2339_v3 = vor.u32 %v2338_v24, %v2335_v41  ;;  %v2408_v24 = vshll.u32 %v8745_v9, 16  ;;  %v12415_v48 = vcombine.low %v8735_v58, %v8740_v25  ;;  %v7987_v25 = vld [vmem:[#allocation2 + $0x4] sm:$0xf] }
 0x387   : > { %v8868_v60 = vrot.slane %v3559_v57, %v8083_v16  ;;  %v3409_v26 = vrot.slane %v12414_v46, 4  ;;  %v2362_v57 = vrot.slane %v2360_v53, 5  ;;  %v3525_v46 = vcombine.low %v8479_v40, %v8880_v38 }
 0x388   : > { %v2405_v40 = vshrl.u32 %v8745_v9, 16  ;;  %v8909_v37 = vrot.slane %v12415_v48, %v8087_v27  ;;  %v2340_v55 = vrot.slane %v2339_v3, 4  ;;  %v2387_v9 = vor.u32 %v2386_v56, %v2383_v62  ;;  %v7988_v48 = vld [vmem:[#allocation2 + $0x10] sm:$0xf] }
 0x389   : > { %v8889_v42 = vsel %vm8454_vm7, %v3409_v26, %v3410_v2  ;;  %v2363_v2 = vor.u32 %v2362_v57, %v2359_v1  ;;  %v3532_v41 = vrot.slane %v3525_v46, %v8083_v16  ;;  %v8920_v1 = vrot.slane %v2342_v36, 5 }
 0x38a   : > { %1933 = vrot.lane.b32.xlu1 %v8778_v32, %s8009_s24  ;;  %1929 = vrot.lane.b32.xlu0 %v8756_v0, %s8009_s24  ;;  %v3517_v26 = vcombine.low %v8465_v47, %v8889_v42  ;;  %12416 = vst [vmem:[#allocation62_spill] sm:$0xff] %v8909_v37  ;;  %v12417_v47 = vcombine.low %v8759_v30, %v8762_v54  ;;  %v8922_v57 = vrot.slane %v2366_v49, 5  ;;  %v2390_v46 = vshll.u32 %v8778_v32, 16 }
 0x38b   : > { %v1367_v49 = vcombine.low %v7987_v25, %v8732_v18  ;;  %v2364_v56 = vrot.slane %v2363_v2, 4  ;;  %v8934_v36 = vrot.slane %v2405_v40, 4  ;;  %v8936_v62 = vrot.slane %v2408_v24, 5  ;;  %v7990_v24 = vld [vmem:[#allocation2 + $0x28] sm:$0xf] }
 0x38c   : > { %v8916_v53 = vrot.slane %v12417_v47, %v8087_v27  ;;  %v3524_v3 = vrot.slane %v3517_v26, %v8083_v16  ;;  %v1438_v47 = vshrl.u32 %v8909_v37, 16  ;;  %v1401_v35 = vcombine.low %v7988_v48, %v8756_v0 }
 0x38d   : > { %v1375_v26 = vcombine.low %v7989_v21, %v8778_v32  ;;  %v8945_v6 = vsel %vm8374_vm3, %v2340_v55, %v8920_v1  ;;  %v8947_v2 = vrot.slane %v2387_v9, 4  ;;  %v8952_v40 = vsel %vm8374_vm3, %v2364_v56, %v8922_v57 }
 0x38e   : > { %3735 = vrot.lane.b32.xlu1 %v8776_v28, %s8008_s23  ;;  %1937 = vrot.lane.b32.xlu0 %v8798_v31, %s8009_s24  ;;  %12418 = vst [vmem:[#allocation63_spill] sm:$0xff] %v8916_v53  ;;  %v1439_v58 = vshrl.u32 %v8916_v53, 16  ;;  %v3533_v33 = vcombine.low %v3524_v3, %v3532_v41  ;;  %v3534_v5 = vcombine.high %v3524_v3, %v3532_v41  ;;  %v8965_v55 = vrot.slane %v2390_v46, 5 }
 0x38f   : > { %v1409_v48 = vcombine.low %v7990_v24, %v8798_v31  ;;  %v12420_v21 = vcombine.low %v8812_v43, %v8815_v51  ;;  %v2414_v9 = vshll.u32 %v8798_v31, 16  ;;  %v12422_v3 = vcombine.high %v8812_v43, %v8815_v51 }
 0x390   : > { %v8940_v4 = vpack.i.b16 %v1439_v58, %v1438_v47  ;;  %v12423_v25 = vmov 0   ;;  %v8981_v46 = vrot.slane %v3533_v33, %v8087_v27  ;;  %v1330_v24 = vrot.slane %v1316_v59, %v8087_v27 }
 0x391   : > { %v8959_v41 = vrot.slane %v12420_v21, %v8087_v27  ;;  %v8972_v47 = vrot.slane %v12422_v3, %v8087_v27  ;;  %v1331_v56 = vcombine.high %v8909_v37, %v12423_v25  ;;  %v1350_v21 = vcombine.high %v8759_v30, %v8762_v54 }
 0x392   : > { %3743 = vrot.lane.b32.xlu1 %v8795_v8, %s8008_s23  ;;  %3739 = vrot.lane.b32.xlu0 %v8787_v52, %s8008_s23  ;;  %12419 = vst [vmem:[#allocation64_spill] sm:$0xff] %v8940_v4  ;;  %12424 = vst [vmem:[#allocation66_spill] sm:$0xff] %v8981_v46  ;;  %v1382_v43 = vrot.slane %v1375_v26, %v8083_v16  ;;  %v12425_v51 = vcombine.low %v8839_v20, %v8848_v39  ;;  %v9009_v54 = vrot.slane %v2414_v9, 5 }
 0x393   : > { %12421 = vst [vmem:[#allocation65_spill] sm:$0xff] %v8959_v41  ;;  %v8994_v58 = vrot.slane %v3534_v5, %v8087_v27  ;;  %v1374_v33 = vrot.slane %v1367_v49, %v8083_v16  ;;  %v12428_v59 = vcombine.high %v8839_v20, %v8848_v39  ;;  %v2394_v5 = vshrl.u32 %v8778_v32, 16 }
 0x394   : > { %v8991_v3 = vrot.slane %v12425_v51, %v8087_v27  ;;  %v1364_v26 = vrot.slane %v1350_v21, %v8087_v27  ;;  %v12429_v49 = vcombine.low %v8865_v15, %v8868_v60  ;;  %v2346_v39 = vshrl.u32 %v8732_v18, 16 }
 0x395   : > { %v9003_v30 = vrot.slane %v12428_v59, %v8087_v27  ;;  %v2418_v20 = vshrl.u32 %v8798_v31, 16  ;;  %v1332_v9 = vcombine.high %v1330_v24, %v12423_v25  ;;  %v1450_v32 = vshrl.u32 %v1330_v24, 16 }
 0x396   : > { %4053 = vrot.lane.b32.xlu1 %v8776_v28, %s8009_s24  ;;  %3747 = vrot.lane.b32.xlu0 %v8823_v45, %s8008_s23  ;;  %v1365_v28 = vcombine.high %v8916_v53, %v12423_v25  ;;  %12426 = vst [vmem:[#allocation67_spill] sm:$0xff] %v8991_v3  ;;  %v9017_v51 = vrot.slane %v12429_v49, %v8087_v27  ;;  %v1451_v49 = vshrl.u32 %v1364_v26, 16  ;;  %v9032_v18 = vrot.slane %v2394_v5, 4 }
 0x397   : > { %v9021_v59 = vpack.i.b16 %v1364_v26, %v1330_v24  ;;  %v1408_v4 = vrot.slane %v1401_v35, %v8083_v16  ;;  %v1416_v53 = vrot.slane %v1409_v48, %v8083_v16  ;;  %v2370_v31 = vshrl.u32 %v8756_v0, 16 }
 0x398   : > { %v8996_v7 = vpack.i.b16 %v1365_v28, %v1331_v56  ;;  %12430 = vst [vmem:[#allocation69_spill] sm:$0xff] %v9017_v51  ;;  %v1383_v24 = vcombine.low %v1374_v33, %v1382_v43  ;;  %v2420_v37 = vrot.slane %v2418_v20, 4  ;;  %v9037_v22 = vpack.i.b16 %v1451_v49, %v1450_v32 }
 0x399   : > { %12431 = vst [vmem:[#allocation70_spill] sm:$0xff] %v9021_v59  ;;  %v1417_v35 = vcombine.low %v1408_v4, %v1416_v53  ;;  %v1444_v0 = vshrl.u32 %v1331_v56, 16  ;;  %v1445_v29 = vshrl.u32 %v1365_v28, 16  ;;  %v12434_v20 = vcombine.high %v8865_v15, %v8868_v60 }
 0x39a   : > { %12427 = vst [vmem:[#allocation68_spill] sm:$0xff] %v8996_v7  ;;  %4057 = vrot.lane.b32.xlu1 %v8787_v52, %s8009_s24  ;;  %3741 = vrot.lane.b32.xlu0 %v8809_v63, %s8008_s23  ;;  %v1384_v52 = vcombine.high %v1374_v33, %v1382_v43  ;;  %v1366_v7 = vcombine.high %v1364_v26, %v12423_v25 }
 0x39b   : > { %v9040_v48 = vrot.slane %v1383_v24, %v8087_v27  ;;  %v9044_v5 = vrot.slane %v1417_v35, %v8087_v27  ;;  %v9071_v32 = vpack.i.b16 %v1445_v29, %v1444_v0  ;;  %v2348_v24 = vrot.slane %v2346_v39, 4 }
 0x39c   : > { %v1398_v21 = vrot.slane %v1384_v52, %v8087_v27  ;;  %v9035_v59 = vpack.i.b16 %v1366_v7, %v1332_v9  ;;  %v1418_v52 = vcombine.high %v1408_v4, %v1416_v53  ;;  %v1457_v16 = vshrl.u32 %v1366_v7, 16 }
 0x39d   : > { %12432 = vst [vmem:[#allocation71_spill] sm:$0xff] %v9040_v48  ;;  %12433 = vst [vmem:[#allocation72_spill] sm:$0xff] %v9044_v5  ;;  %v1462_v4 = vshrl.u32 %v9040_v48, 16  ;;  %v1399_v53 = vcombine.high %v9040_v48, %v12423_v25  ;;  %v9057_v7 = vpack.i.b16 %v9003_v30, %v8972_v47  ;;  %v1463_v56 = vshrl.u32 %v9044_v5, 16 }
 0x39e   : > { %4061 = vrot.lane.b32.xlu1 %v8795_v8, %s8009_s24  ;;  %3749 = vrot.lane.b32.xlu0 %v8843_v50, %s8008_s23  ;;  %v1474_v26 = vshrl.u32 %v1398_v21, 16  ;;  %v1456_v8 = vshrl.u32 %v1332_v9, 16  ;;  %v1432_v61 = vrot.slane %v1418_v52, %v8087_v27  ;;  %v9068_v9 = vrot.slane %v12434_v20, %v8087_v27 }
 0x39f   : > { %v1400_v49 = vcombine.high %v1398_v21, %v12423_v25  ;;  %v9074_v52 = vpack.i.b16 %v1463_v56, %v1462_v4  ;;  %v2372_v29 = vrot.slane %v2370_v31, 4  ;;  %v2421_v15 = vor.u32 %v2420_v37, %v9009_v54 }
 0x3a0   : > { %v9053_v43 = vpack.i.b16 %v1457_v16, %v1456_v8  ;;  %v9059_v33 = vpack.i.b16 %v1432_v61, %v1398_v21  ;;  %v1475_v28 = vshrl.u32 %v1432_v61, 16  ;;  %v2400_v16 = vshll.u32 %v8826_v17, 16 }
 0x3a1   : > { %v2397_v17 = vor.u32 %v9032_v18, %v8965_v55  ;;  %v1434_v60 = vcombine.high %v1432_v61, %v12423_v25  ;;  %v1480_v39 = vshrl.u32 %v1400_v49, 16  ;;  %v1468_v21 = vshrl.u32 %v1399_v53, 16 }
 0x3a2   : > { %4065 = vrot.lane.b32.xlu1 %v8823_v45, %s8009_s24  ;;  %4055 = vrot.lane.b32.xlu0 %v8889_v42, %s8009_s24  ;;  %v1433_v45 = vcombine.high %v9044_v5, %v12423_v25  ;;  %v9076_v35 = vpack.i.b16 %v1475_v28, %v1474_v26  ;;  %v3600_v0 = vshrl.u32 %v8972_v47, 16  ;;  %v3589_v18 = vshrl.u32 %v8991_v3, 16  ;;  %v12475_v5 = vld [vmem:[#allocation61_spill] sm:$0xff] }
 0x3a3   : > { %v9089_v4 = vpack.i.b16 %v1434_v60, %v1400_v49  ;;  %v1481_v56 = vshrl.u32 %v1434_v60, 16  ;;  %v3549_v37 = vcombine.high %v8981_v46, %v12423_v25  ;;  %v3583_v61 = vcombine.high %v9017_v51, %v12423_v25 }
 0x3a4   : > { %v9078_v8 = vpack.i.b16 %v1433_v45, %v1399_v53  ;;  %v1469_v26 = vshrl.u32 %v1433_v45, 16  ;;  %v12437_v31 = vor.u32 %v8936_v62, %v8934_v36  ;;  %v2373_v45 = vor.u32 %v2372_v29, %v8922_v57 }
 0x3a5   : > { %12435 = vst [vmem:[#allocation73_spill] sm:$0xff] %v9089_v4  ;;  %v9108_v20 = vpack.i.b16 %v1481_v56, %v1480_v39  ;;  %v2352_v60 = vshll.u32 %v8836_v19, 16  ;;  %v2422_v4 = vrot.slane %v2421_v15, 4  ;;  %v3515_v36 = vcombine.high %v8991_v3, %v12423_v25 }
 0x3a6   : > { %3737 = vrot.lane.b32.xlu1 %v8889_v42, %s8008_s23  ;;  %4059 = vrot.lane.b32.xlu0 %v8809_v63, %s8009_s24  ;;  %v3601_v42 = vshrl.u32 %v9003_v30, 16  ;;  %v3588_v63 = vshrl.u32 %v8959_v41, 16  ;;  %v9093_v28 = vpack.i.b16 %v1469_v26, %v1468_v21  ;;  %v2412_v53 = vrot.slane %v12437_v31, 4 }
 0x3a7   : > { %v9115_v26 = vpack.i.b16 %v3583_v61, %v3549_v37  ;;  %v9124_v57 = vpack.i.b16 %v9068_v9, %v8994_v58  ;;  %v2398_v62 = vrot.slane %v2397_v17, 4  ;;  %v2402_v29 = vrot.slane %v2400_v16, 5 }
 0x3a8   : > { %12436 = vst [vmem:[#allocation74_spill] sm:$0xff] %v9093_v28  ;;  %v9110_v49 = vpack.i.b16 %v3601_v42, %v3600_v0  ;;  %v9113_v21 = vpack.i.b16 %v3589_v18, %v3588_v63  ;;  %v3481_v28 = vcombine.high %v8959_v41, %v12423_v25  ;;  %v9129_v19 = vsel %vm8374_vm3, %v2412_v53, %v9009_v54 }
 0x3a9   : > { %v12438_v39 = vshll.u32 %v8802_v34, 16  ;;  %v3595_v56 = vshrl.u32 %v3515_v36, 16  ;;  %v2393_v54 = vsel %vm8374_vm3, %v8947_v2, %v8965_v55  ;;  %v2354_v16 = vrot.slane %v2352_v60, 5 }
 0x3aa   : > { %3745 = vrot.lane.b32.xlu1 %v8880_v38, %s8008_s23  ;;  %4063 = vrot.lane.b32.xlu0 %v8880_v38, %s8009_s24  ;;  %v2349_v38 = vor.u32 %v2348_v24, %v8920_v1  ;;  %v2374_v1 = vrot.slane %v2373_v45, 4  ;;  %v9137_v24 = vpack.i.b16 %v3515_v36, %v3481_v28  ;;  %v3594_v15 = vshrl.u32 %v3481_v28, 16 }
 0x3ab   : > { %v2426_v0 = vrot.slane %v12438_v39, 5  ;;  %v3482_v34 = vcombine.high %v8972_v47, %v12423_v25  ;;  %v3516_v17 = vcombine.high %v9003_v30, %v12423_v25  ;;  %v2403_v2 = vsel %vm8374_vm3, %v2398_v62, %v2402_v29 }
 0x3ac   : > { %v2350_v42 = vrot.slane %v2349_v38, 4  ;;  %v9153_v28 = vpack.i.b16 %v3595_v56, %v3594_v15  ;;  %v3618_v18 = vshrl.u32 %v3549_v37, 16  ;;  %v3619_v47 = vshrl.u32 %v3583_v61, 16 }
 0x3ad   : > { %v9151_v63 = vsel %vm8374_vm3, %v2422_v4, %v2426_v0  ;;  %v9157_v55 = vpack.i.b16 %v3516_v17, %v3482_v34  ;;  %v3612_v30 = vshrl.u32 %v8981_v46, 16  ;;  %v3613_v4 = vshrl.u32 %v9017_v51, 16 }
 0x3ae   : > { %3048 = vrot.lane.b32.xlu1 %v8945_v6, %s8009_s24  ;;  %4067 = vrot.lane.b32.xlu0 %v8843_v50, %s8009_s24  ;;  %v2486_v50 = vcombine.low %v8436_v13, %v9129_v19  ;;  %v2379_v13 = vsel %vm8374_vm3, %v2374_v1, %v8901_v10  ;;  %v3550_v31 = vcombine.high %v8994_v58, %v12423_v25  ;;  %v3624_v38 = vshrl.u32 %v8994_v58, 16  ;;  %v12439_v1 = vld [vmem:[#allocation12_spill] sm:$0xff]  ;;  %v12440_v58 = vld [vmem:[#allocation10_spill] sm:$0xff] }
 0x3af   : > { %v2355_v37 = vsel %vm8374_vm3, %v2350_v42, %v2354_v16  ;;  %v2554_v61 = vcombine.low %v8414_v23, %v9151_v63  ;;  %v9173_v53 = vpack.i.b16 %v3619_v47, %v3618_v18  ;;  %v3584_v45 = vcombine.high %v9068_v9, %v12423_v25 }
 0x3b0   : > { %v2520_v10 = vcombine.low %v8401_v14, %v2403_v2  ;;  %v9178_v60 = vpack.i.b16 %v3613_v4, %v3612_v30  ;;  %v3625_v36 = vshrl.u32 %v9068_v9, 16  ;;  %v2546_v62 = vcombine.low %v8397_v12, %v2379_v13  ;;  %v12441_v12 = vld [vmem:[#allocation4_spill] sm:$0xff] }
 0x3b1   : > { %v3630_v29 = vshrl.u32 %v3550_v31, 16  ;;  %v3631_v39 = vshrl.u32 %v3584_v45, 16  ;;  %v9183_v0 = vpack.i.b16 %v3584_v45, %v3550_v31  ;;  %v2452_v23 = vcombine.low %v8428_v11, %v2393_v54  ;;  %v12442_v11 = vld [vmem:[#allocation11_spill] sm:$0xff] }
 0x3b2   : > { %3056 = vrot.lane.b32.xlu1 %v2393_v54, %s8009_s24  ;;  %3052 = vrot.lane.b32.xlu0 %v8952_v40, %s8009_s24  ;;  %v2478_v15 = vcombine.low %v12439_v1, %v8952_v40  ;;  %v9192_v14 = vpack.i.b16 %v3625_v36, %v3624_v38  ;;  %v2512_v9 = vcombine.low %v12440_v58, %v2355_v37  ;;  %v3606_v47 = vshrl.u32 %v3482_v34, 16 }
 0x3b3   : > { %v9196_v56 = vrot.slane %v2554_v61, %v12441_v12  ;;  %v9198_v16 = vpack.i.b16 %v3631_v39, %v3630_v29  ;;  %v2444_v42 = vcombine.low %v12442_v11, %v8945_v6  ;;  %v9203_v18 = vrot.slane %v2486_v50, %v12441_v12 }
 0x3b4   : > { %v3607_v30 = vshrl.u32 %v3516_v17, 16  ;;  %v9206_v4 = vrot.slane %v2520_v10, %v12441_v12  ;;  %v9209_v31 = vrot.slane %v2546_v62, %v12441_v12  ;;  %v9212_v45 = vrot.slane %v2452_v23, %v12441_v12 }
 0x3b5   : > { %v9215_v61 = vrot.slane %v2478_v15, %v12441_v12  ;;  %v9223_v34 = vrot.slane %v2512_v9, %v12441_v12  ;;  %v9228_v50 = vrot.slane %v2444_v42, %v12441_v12  ;;  %v12449_v42 = vld [vmem:[#allocation64_spill] sm:$0xff] }
 0x3b6   : > { %2730 = vrot.lane.b32.xlu1 %v8945_v6, %s8008_s23  ;;  %3060 = vrot.lane.b32.xlu0 %v9129_v19, %s8009_s24  ;;  %v9220_v6 = vpack.i.b16 %v3607_v30, %v3606_v47  ;;  %v2562_v17 = vcombine.low %v9209_v31, %v9196_v56  ;;  %v7572_v47 = vcombine.low %v12449_v42, %v12449_v42  ;;  %v12450_v30 = vld [vmem:[#allocation68_spill] sm:$0xff] }
 0x3b7   : > { %v2494_v10 = vcombine.low %v9215_v61, %v9203_v18 }
 0x3b8   : > { %v9240_v38 = vrot.slane %v2562_v17, %v8087_v27  ;;  %v7573_v17 = vcombine.low %v12450_v30, %v12450_v30 }
 0x3b9   : > { %v9243_v36 = vrot.slane %v2494_v10, %v8087_v27  ;;  %v12451_v10 = vld [vmem:[#allocation70_spill] sm:$0xff] }
 0x3ba   : > { %2738 = vrot.lane.b32.xlu1 %v2393_v54, %s8008_s23  ;;  %2734 = vrot.lane.b32.xlu0 %v8952_v40, %s8008_s23  ;;  %v2528_v54 = vcombine.low %v9223_v34, %v9206_v4  ;;  %v2460_v40 = vcombine.low %v9228_v50, %v9212_v45  ;;  %12443 = vst [vmem:[#allocation12_spill] sm:$0xff] %v9240_v38 }
 0x3bb   : > { %12444 = vst [vmem:[#allocation10_spill] sm:$0xff] %v9243_v36 }
 0x3bc   : > { %v9246_v62 = vrot.slane %v2528_v54, %v8087_v27  ;;  %v9253_v15 = vrot.slane %v2460_v40, %v8087_v27  ;;  %v7579_v54 = vcombine.low %v9074_v52, %v9074_v52  ;;  %v7574_v52 = vcombine.low %v9071_v32, %v9071_v32 }
 0x3be   : > { %3050 = vrot.lane.b32.xlu1 %v2355_v37, %s8009_s24  ;;  %2742 = vrot.lane.b32.xlu0 %v9129_v19, %s8008_s23  ;;  %12445 = vst [vmem:[#allocation11_spill] sm:$0xff] %v9246_v62  ;;  %12448 = vst [vmem:[#allocation75_spill] sm:$0xff] %v9253_v15 }
 0x3c2   : > { %3058 = vrot.lane.b32.xlu1 %v2403_v2, %s8009_s24  ;;  %3054 = vrot.lane.b32.xlu0 %v2379_v13, %s8009_s24 }
 0x3c6   : > { %2732 = vrot.lane.b32.xlu1 %v2355_v37, %s8008_s23  ;;  %3062 = vrot.lane.b32.xlu0 %v9151_v63, %s8009_s24  ;;  %v7575_v37 = vcombine.low %v12451_v10, %v12451_v10  ;;  %v12453_v10 = vld [vmem:[#allocation74_spill] sm:$0xff] }
 0x3ca   : > { %2740 = vrot.lane.b32.xlu1 %v2403_v2, %s8008_s23  ;;  %2736 = vrot.lane.b32.xlu0 %v2379_v13, %s8008_s23  ;;  %v7577_v2 = vcombine.low %v9035_v59, %v9035_v59  ;;  %v7582_v13 = vcombine.low %v9059_v33, %v9059_v33  ;;  %v7583_v59 = vcombine.low %v9076_v35, %v9076_v35 }
 0x3cb   : > { %v7580_v33 = vcombine.low %v9078_v8, %v9078_v8  ;;  %v7667_v8 = vcombine.low %v9057_v7, %v9057_v7 }
 0x3ce   : > { %1485 = vrot.lane.b32.xlu1 %v7572_v47, %s8004_s17  ;;  %2744 = vrot.lane.b32.xlu0 %v9151_v63, %s8008_s23  ;;  %v7576_v63 = vcombine.low %v9037_v22, %v9037_v22  ;;  %v7578_v22 = vcombine.low %v9053_v43, %v9053_v43  ;;  %v12452_v47 = vld [vmem:[#allocation73_spill] sm:$0xff] }
 0x3cf   : > { %v7584_v30 = vcombine.low %v12452_v47, %v12452_v47 }
 0x3d2   : > { %1489 = vrot.lane.b32.xlu1 %v7573_v17, %s8006_s19  ;;  %1497 = vrot.lane.b32.xlu0 %v7575_v37, %s8013_s30  ;;  %v7585_v17 = vcombine.low %v9108_v20, %v9108_v20  ;;  %v7581_v37 = vcombine.low %v12453_v10, %v12453_v10  ;;  %v2495_v20 = vcombine.high %v9215_v61, %v9203_v18 }
 0x3d3   : > { %v2461_v18 = vcombine.high %v9228_v50, %v9212_v45  ;;  %v7674_v45 = vcombine.low %v9124_v57, %v9124_v57  ;;  %v7669_v57 = vcombine.low %v9157_v55, %v9157_v55 }
 0x3d5   : > { %v9378_v50 = vrot.slane %v2461_v18, %v8087_v27  ;;  %v2608_v18 = vshrl.u32 %v9240_v38, 16 }
 0x3d6   : > { %1505 = vrot.lane.b32.xlu0 %v7577_v2, %s8011_s26  ;;  %1525 = vrot.lane.b32.xlu1 %v7582_v13, %s8013_s30  ;;  %v7668_v13 = vcombine.low %v9110_v49, %v9110_v49  ;;  %v7672_v49 = vcombine.low %v9115_v26, %v9115_v26  ;;  %v9361_v26 = vcombine.high %v9253_v15, %v12423_v25 }
 0x3d7   : > { %v2477_v1 = vcombine.high %v9378_v50, %v12423_v25 }
 0x3da   : > { %1501 = vrot.lane.b32.xlu1 %v7576_v63, %s8012_s29  ;;  %1513 = vrot.lane.b32.xlu0 %v7579_v54, %s8004_s17  ;;  %v7664_v63 = vcombine.low %v9113_v21, %v9113_v21  ;;  %v2563_v54 = vcombine.high %v9209_v31, %v9196_v56  ;;  %v7665_v21 = vcombine.low %v9137_v24, %v9137_v24 }
 0x3db   : > { %v2529_v56 = vcombine.high %v9223_v34, %v9206_v4  ;;  %v9364_v24 = vrot.slane %v2495_v20, %v8087_v27  ;;  %v7666_v4 = vcombine.low %v9153_v28, %v9153_v28 }
 0x3dc   : > { %v9299_v40 = vpop.permute.xlu1 %1605  ;;  %v2577_v31 = vrot.slane %v2563_v54, %v8087_v27 }
 0x3dd   : > { %v2594_v10 = vpack.i.b16 %v9364_v24, %v9378_v50 }
 0x3de   : > { %1529 = vrot.lane.b32.xlu1 %v7583_v59, %s8012_s29  ;;  %1517 = vrot.lane.b32.xlu0 %v7580_v33, %s8006_s19  ;;  %v2579_v19 = vcombine.high %v2577_v31, %v12423_v25 }
 0x3df   : > { %v7617_v20 = vcombine.low %v2594_v10, %v2594_v10 }
 0x3e0   : > { %v9307_v35 = vpop.permute.xlu0 %1609 }
 0x3e2   : > { %1509 = vrot.lane.b32.xlu1 %v7578_v22, %s8010_s25  ;;  %1493 = vrot.lane.b32.xlu0 %v7574_v52, %s8005_s18  ;;  %v9351_v22 = vcombine.high %v9243_v36, %v12423_v25 }
 0x3e4   : > { %v9309_v42 = vpop.permute.xlu1 %1613  ;;  %v2588_v34 = vpack.i.b16 %v9351_v22, %v9361_v26  ;;  %v2590_v23 = vshrl.u32 %v9351_v22, 16  ;;  %v12458_v22 = vld [vmem:[#allocation29_spill] sm:$0xff] }
 0x3e6   : > { %3647 = vrot.lane.b32.xlu1 %v7667_v8, %s8013_s30  ;;  %1533 = vrot.lane.b32.xlu0 %v7584_v30, %s8011_s26  ;;  %v2543_v8 = vrot.slane %v2529_v56, %v8087_v27  ;;  %v7615_v28 = vcombine.low %v2588_v34, %v2588_v34  ;;  %v9410_v56 = vcombine.high %v9240_v38, %v12423_v25 }
 0x3e8   : > { %v9317_v43 = vpop.permute.xlu1 %1923  ;;  %v9319_v32 = vpop.permute.xlu0 %1617 }
 0x3ea   : > { %1537 = vrot.lane.b32.xlu1 %v7585_v17, %s8010_s25  ;;  %1521 = vrot.lane.b32.xlu0 %v7581_v37, %s8005_s18  ;;  %v2618_v17 = vpack.i.b16 %v2577_v31, %v2543_v8 }
 0x3ec   : > { %v9327_v7 = vpop.permute.xlu1 %1931  ;;  %v9329_v2 = vpop.permute.xlu0 %1927 }
 0x3ee   : > { %3651 = vrot.lane.b32.xlu1 %v7668_v13, %s8012_s29  ;;  %3635 = vrot.lane.b32.xlu0 %v7664_v63, %s8004_s17  ;;  %v7624_v63 = vcombine.low %v2618_v17, %v2618_v17 }
 0x3f0   : > { %v9341_v59 = vpop.permute.xlu1 %1607  ;;  %v9343_v33 = vpop.permute.xlu0 %1935 }
 0x3f2   : > { %3667 = vrot.lane.b32.xlu1 %v7672_v49, %s8006_s19  ;;  %3639 = vrot.lane.b32.xlu0 %v7665_v21, %s8006_s19  ;;  %v7673_v49 = vcombine.low %v9173_v53, %v9173_v53  ;;  %v7671_v21 = vcombine.low %v9178_v60, %v9178_v60  ;;  %v2620_v53 = vshrl.u32 %v2577_v31, 16 }
 0x3f4   : > { %v9367_v61 = vpop.permute.xlu1 %1615  ;;  %v9369_v52 = vpop.permute.xlu0 %1611 }
 0x3f6   : > { %3643 = vrot.lane.b32.xlu1 %v7666_v4, %s8005_s18  ;;  %3675 = vrot.lane.b32.xlu0 %v7674_v45, %s8013_s30  ;;  %v2607_v4 = vshrl.u32 %v9246_v62, 16  ;;  %v9417_v45 = vcombine.high %v9246_v62, %v12423_v25 }
 0x3f8   : > { %v9383_v47 = vpop.permute.xlu1 %1925  ;;  %v9385_v30 = vpop.permute.xlu0 %1619  ;;  %v2609_v17 = vpack.i.b16 %v2608_v18, %v2607_v4  ;;  %v2612_v10 = vpack.i.b16 %v9410_v56, %v9417_v45  ;;  %v7676_v18 = vcombine.low %v9183_v0, %v9183_v0  ;;  %v2596_v4 = vshrl.u32 %v9364_v24, 16 }
 0x3f9   : > { %v2595_v0 = vshrl.u32 %v9378_v50, 16  ;;  %v1637_v50 = vcombine.low %v12457_v44, %v9299_v40  ;;  %v2613_v40 = vshrl.u32 %v9417_v45, 16 }
 0x3fa   : > { %2634 = vrot.lane.b32.xlu1 %v7615_v28, %s8006_s19  ;;  %3655 = vrot.lane.b32.xlu0 %v7669_v57, %s8011_s26  ;;  %v7677_v28 = vcombine.low %v9198_v16, %v9198_v16  ;;  %v7675_v57 = vcombine.low %v9192_v14, %v9192_v14  ;;  %v7621_v14 = vcombine.low %v2609_v17, %v2609_v17 }
 0x3fb   : > { %v7622_v9 = vcombine.low %v2612_v10, %v2612_v10  ;;  %v7670_v17 = vcombine.low %v9220_v6, %v9220_v6  ;;  %v2597_v11 = vpack.i.b16 %v2596_v4, %v2595_v0  ;;  %v2589_v4 = vshrl.u32 %v9361_v26, 16 }
 0x3fc   : > { %v9393_v37 = vpop.permute.xlu1 %1933  ;;  %v9395_v13 = vpop.permute.xlu0 %1929  ;;  %v1644_v26 = vrot.slane %v1637_v50, %v12441_v12 }
 0x3fe   : > { %2670 = vrot.lane.b32.xlu1 %v7624_v63, %s8013_s30  ;;  %2642 = vrot.lane.b32.xlu0 %v7617_v20, %s8013_s30  ;;  %v2619_v63 = vshrl.u32 %v2543_v8, 16  ;;  %v2584_v20 = vshrl.u32 %v9243_v36, 16 }
 0x400   : > { %v9399_v54 = vpop.permute.xlu1 %3735  ;;  %v9401_v55 = vpop.permute.xlu0 %1937 }
 0x402   : > { %3671 = vrot.lane.b32.xlu1 %v7673_v49, %s8005_s18  ;;  %3663 = vrot.lane.b32.xlu0 %v7671_v21, %s8004_s17  ;;  %v2621_v49 = vpack.i.b16 %v2620_v53, %v2619_v63  ;;  %v2583_v21 = vshrl.u32 %v9253_v15, 16  ;;  %v2545_v53 = vcombine.high %v2543_v8, %v12423_v25  ;;  %v12454_v63 = vld [vmem:[#allocation21_spill] sm:$0xff] }
 0x403   : > { %v1679_v31 = vcombine.low %v12454_v63, %v9319_v32  ;;  %v12456_v32 = vld [vmem:[#allocation19_spill] sm:$0xff] }
 0x404   : > { %v9419_v34 = vpop.permute.xlu1 %3743  ;;  %v9421_v60 = vpop.permute.xlu0 %3739  ;;  %v2624_v8 = vpack.i.b16 %v2579_v19, %v2545_v53  ;;  %v1671_v63 = vcombine.low %v12456_v32, %v9307_v35  ;;  %v2625_v3 = vshrl.u32 %v2545_v53, 16  ;;  %v2601_v35 = vshrl.u32 %v2477_v1, 16 }
 0x406   : > { %3687 = vrot.lane.b32.xlu1 %v7677_v28, %s8010_s25  ;;  %3679 = vrot.lane.b32.xlu0 %v7675_v57, %s8012_s29  ;;  %v2511_v28 = vcombine.high %v9364_v24, %v12423_v25  ;;  %v2585_v57 = vpack.i.b16 %v2584_v20, %v2583_v21  ;;  %v12455_v24 = vld [vmem:[#allocation20_spill] sm:$0xff]  ;;  %v7625_v20 = vcombine.low %v2621_v49, %v2621_v49  ;;  %v2626_v21 = vshrl.u32 %v2579_v19, 16 }
 0x407   : > { %v1645_v10 = vcombine.low %v12455_v24, %v9309_v42  ;;  %v2614_v42 = vshrl.u32 %v9410_v56, 16  ;;  %v1686_v19 = vrot.slane %v1679_v31, %v12441_v12  ;;  %v1997_v24 = vcombine.low %v12458_v22, %v9343_v33 }
 0x408   : > { %v9434_v16 = vpop.permute.xlu1 %4053  ;;  %v9436_v58 = vpop.permute.xlu0 %3747  ;;  %v2602_v6 = vshrl.u32 %v2511_v28, 16  ;;  %v7614_v41 = vcombine.low %v2585_v57, %v2585_v57  ;;  %v2600_v49 = vpack.i.b16 %v2511_v28, %v2477_v1  ;;  %v9472_v44 = vpack.i.b16 %v2626_v21, %v2625_v3  ;;  %v12459_v28 = vld [vmem:[#allocation28_spill] sm:$0xff]  ;;  %v12460_v3 = vld [vmem:[#allocation27_spill] sm:$0xff] }
 0x409   : > { %v1652_v0 = vrot.slane %v1645_v10, %v12441_v12  ;;  %v1678_v56 = vrot.slane %v1671_v63, %v12441_v12  ;;  %v7626_v53 = vcombine.low %v2624_v8, %v2624_v8  ;;  %v9480_v1 = vpack.i.b16 %v2590_v23, %v2589_v4  ;;  %v12461_v23 = vld [vmem:[#allocation26_spill] sm:$0xff] }
 0x40a   : > { %2658 = vrot.lane.b32.xlu1 %v7621_v14, %s8004_s17  ;;  %3683 = vrot.lane.b32.xlu0 %v7676_v18, %s8011_s26  ;;  %v2603_v31 = vpack.i.b16 %v2602_v6, %v2601_v35  ;;  %v1989_v33 = vcombine.low %v12460_v3, %v9329_v2  ;;  %v9487_v10 = vpack.i.b16 %v2614_v42, %v2613_v40  ;;  %v12462_v42 = vld [vmem:[#allocation25_spill] sm:$0xff] }
 0x40b   : > { %v1687_v45 = vcombine.low %v1678_v56, %v1686_v19  ;;  %v7618_v21 = vcombine.low %v2597_v11, %v2597_v11  ;;  %v7619_v8 = vcombine.low %v2600_v49, %v2600_v49  ;;  %v1653_v32 = vcombine.low %v1644_v26, %v1652_v0 }
 0x40c   : > { %v9457_v14 = vpop.permute.xlu1 %4057  ;;  %v9459_v18 = vpop.permute.xlu0 %3741  ;;  %v1955_v63 = vcombine.low %v12461_v23, %v9317_v43  ;;  %v9494_v6 = vrot.slane %v1997_v24, %v12441_v12  ;;  %v1654_v2 = vcombine.high %v1644_v26, %v1652_v0  ;;  %v1688_v50 = vcombine.high %v1678_v56, %v1686_v19  ;;  %v12465_v24 = vld [vmem:[#allocation23_spill] sm:$0xff] }
 0x40d   : > { %v2065_v35 = vcombine.low %v12462_v42, %v9401_v55  ;;  %v7620_v11 = vcombine.low %v2603_v31, %v2603_v31  ;;  %v9506_v43 = vrot.slane %v1989_v33, %v12441_v12  ;;  %v7616_v4 = vcombine.low %v9480_v1, %v9480_v1  ;;  %v12464_v55 = vld [vmem:[#allocation24_spill] sm:$0xff]  ;;  %v12467_v1 = vld [vmem:[#allocation17_spill] sm:$0xff]  ;;  %v12471_v23 = vld [vmem:[#allocation15_spill] sm:$0xff] }
 0x40e   : > { %2662 = vrot.lane.b32.xlu1 %v7622_v9, %s8006_s19  ;;  %3659 = vrot.lane.b32.xlu0 %v7670_v17, %s8010_s25  ;;  %v1963_v17 = vcombine.low %v12459_v28, %v9327_v7  ;;  %v7627_v7 = vcombine.low %v9472_v44, %v9472_v44  ;;  %v7623_v0 = vcombine.low %v9487_v10, %v9487_v10 }
 0x40f   : > { %v9513_v19 = vrot.slane %v1687_v45, %v8087_v27  ;;  %v2031_v22 = vcombine.low %v12464_v55, %v9393_v37  ;;  %v2057_v44 = vcombine.low %v12465_v24, %v9395_v13  ;;  %v9522_v40 = vrot.slane %v1653_v32, %v8087_v27 }
 0x410   : > { %v9476_v57 = vpop.permute.xlu1 %4061  ;;  %v9478_v9 = vpop.permute.xlu0 %3749  ;;  %v9503_v49 = vrot.slane %v1963_v17, %v12441_v12  ;;  %v9525_v56 = vrot.slane %v1955_v63, %v12441_v12  ;;  %v2006_v31 = vcombine.high %v9506_v43, %v9494_v6  ;;  %v1747_v26 = vcombine.low %v12467_v1, %v9385_v30  ;;  %v12469_v30 = vld [vmem:[#allocation14_spill] sm:$0xff] }
 0x411   : > { %12463 = vst [vmem:[#allocation64_spill] sm:$0xff] %v9513_v19  ;;  %12466 = vst [vmem:[#allocation68_spill] sm:$0xff] %v9522_v40  ;;  %v9532_v37 = vrot.slane %v1654_v2, %v8087_v27  ;;  %v9535_v13 = vrot.slane %v1688_v50, %v8087_v27  ;;  %v9540_v17 = vrot.slane %v2065_v35, %v12441_v12 }
 0x412   : > { %2674 = vrot.lane.b32.xlu1 %v7625_v20, %s8012_s29  ;;  %2630 = vrot.lane.b32.xlu0 %v7614_v41, %s8004_s17  ;;  %v1972_v10 = vcombine.high %v9525_v56, %v9503_v49  ;;  %v1705_v45 = vcombine.low %v12469_v30, %v9341_v59  ;;  %v1739_v63 = vcombine.low %v12471_v23, %v9369_v52  ;;  %v12472_v52 = vld [vmem:[#allocation55_spill] sm:$0xff] }
 0x413   : > { %v9556_v2 = vrot.slane %v2057_v44, %v12441_v12  ;;  %v9562_v50 = vcombine.high %v9513_v19, %v12423_v25  ;;  %v9565_v59 = vrot.slane %v2006_v31, %v8087_v27  ;;  %v9571_v35 = vcombine.high %v9522_v40, %v12423_v25 }
 0x414   : > { %v9500_v20 = vpop.permute.xlu1 %4065  ;;  %v4056_v41 = vpop.permute.xlu0 %4055  ;;  %v1787_v24 = vpack.i.b16 %v9535_v13, %v9532_v37  ;;  %v1777_v44 = vshrl.u32 %v9513_v19, 16  ;;  %v1746_v1 = vrot.slane %v1739_v63, %v12441_v12 }
 0x415   : > { %v4153_v42 = vcombine.low %v12472_v52, %v4056_v41  ;;  %v9584_v41 = vrot.slane %v1972_v10, %v8087_v27  ;;  %v1776_v10 = vshrl.u32 %v9522_v40, 16 }
 0x416   : > { %2678 = vrot.lane.b32.xlu1 %v7626_v53, %s8011_s26  ;;  %2646 = vrot.lane.b32.xlu0 %v7618_v21, %s8012_s29  ;;  %v12468_v53 = vld [vmem:[#allocation22_spill] sm:$0xff]  ;;  %v12470_v21 = vld [vmem:[#allocation16_spill] sm:$0xff]  ;;  %v7589_v51 = vcombine.low %v1787_v24, %v1787_v24 }
 0x417   : > { %v2023_v28 = vcombine.low %v12468_v53, %v9383_v47  ;;  %v1713_v32 = vcombine.low %v12470_v21, %v9367_v61  ;;  %v9553_v47 = vrot.slane %v2031_v22, %v12441_v12  ;;  %v1754_v61 = vrot.slane %v1747_v26, %v12441_v12  ;;  %v12473_v26 = vld [vmem:[#allocation59_spill] sm:$0xff] }
 0x418   : > { %v9542_v3 = vpop.permute.xlu1 %3737  ;;  %v4060_v33 = vpop.permute.xlu0 %4059  ;;  %v1781_v21 = vpack.i.b16 %v9562_v50, %v9571_v35  ;;  %v1778_v38 = vpack.i.b16 %v1777_v44, %v1776_v10  ;;  %v2106_v10 = vshrl.u32 %v9584_v41, 16 }
 0x419   : > { %v9574_v55 = vrot.slane %v2023_v28, %v12441_v12  ;;  %v1720_v31 = vrot.slane %v1713_v32, %v12441_v12  ;;  %v1712_v28 = vrot.slane %v1705_v45, %v12441_v12  ;;  %v1755_v23 = vcombine.low %v1746_v1, %v1754_v61 }
 0x41a   : > { %2654 = vrot.lane.b32.xlu1 %v7620_v11, %s8010_s25  ;;  %2650 = vrot.lane.b32.xlu0 %v7619_v8, %s8011_s26  ;;  %v2074_v8 = vcombine.high %v9556_v2, %v9540_v17  ;;  %v9598_v32 = vrot.slane %v4153_v42, %v12441_v12  ;;  %v2105_v45 = vpack.i.b16 %v9565_v59, %v9584_v41 }
 0x41b   : > { %v2040_v30 = vcombine.high %v9574_v55, %v9553_v47  ;;  %v1756_v52 = vcombine.high %v1746_v1, %v1754_v61  ;;  %v1721_v62 = vcombine.low %v1712_v28, %v1720_v31  ;;  %v2107_v1 = vshrl.u32 %v9565_v59, 16 }
 0x41c   : > { %v9578_v11 = vpop.permute.xlu1 %3745  ;;  %v4064_v22 = vpop.permute.xlu0 %4063  ;;  %v7603_v24 = vcombine.low %v2105_v45, %v2105_v45  ;;  %v7586_v45 = vcombine.low %v1778_v38, %v1778_v38 }
 0x41d   : > { %v4161_v53 = vcombine.low %v12473_v26, %v4064_v22  ;;  %v9614_v48 = vrot.slane %v2040_v30, %v8087_v27 }
 0x41e   : > { %2682 = vrot.lane.b32.xlu1 %v7627_v7, %s8010_s25  ;;  %2638 = vrot.lane.b32.xlu0 %v7616_v4, %s8005_s18  ;;  %v9606_v7 = vrot.slane %v2074_v8, %v8087_v27  ;;  %v12474_v4 = vld [vmem:[#allocation57_spill] sm:$0xff]  ;;  %v7587_v8 = vcombine.low %v1781_v21, %v1781_v21 }
 0x41f   : > { %v9601_v63 = vrot.slane %v4161_v53, %v12441_v12  ;;  %v4187_v22 = vcombine.low %v12474_v4, %v4060_v33  ;;  %v1722_v53 = vcombine.high %v1712_v28, %v1720_v31  ;;  %v9620_v33 = vrot.slane %v1755_v23, %v8087_v27 }
 0x420   : > { %v9609_v26 = vpop.permute.xlu1 %3048  ;;  %v4068_v46 = vpop.permute.xlu0 %4067  ;;  %v9624_v4 = vrot.slane %v1756_v52, %v8087_v27  ;;  %v9641_v28 = vrot.slane %v1721_v62, %v8087_v27  ;;  %v1971_v23 = vcombine.low %v9525_v56, %v9503_v49 }
 0x421   : > { %v4195_v61 = vcombine.low %v12475_v5, %v4068_v46  ;;  %12476 = vst [vmem:[#allocation70_spill] sm:$0xff] %v9620_v33  ;;  %v9627_v44 = vrot.slane %v4187_v22, %v12441_v12  ;;  %v9644_v30 = vrot.slane %v1722_v53, %v8087_v27  ;;  %v2108_v53 = vpack.i.b16 %v2107_v1, %v2106_v10 }
 0x422   : > { %2666 = vrot.lane.b32.xlu0 %v7623_v0, %s8005_s18  ;;  %1835 = vrot.lane.b32.xlu1 %v7589_v51, %s8013_s30  ;;  %v2129_v51 = vpack.i.b16 %v9606_v7, %v9614_v48  ;;  %v2005_v0 = vcombine.low %v9506_v43, %v9494_v6  ;;  %12477 = vst [vmem:[#allocation73_spill] sm:$0xff] %v9641_v28  ;;  %v1789_v6 = vshrl.u32 %v9535_v13, 16  ;;  %v1800_v38 = vshrl.u32 %v9641_v28, 16 }
 0x423   : > { %v9630_v31 = vrot.slane %v4195_v61, %v12441_v12  ;;  %v1811_v22 = vpack.i.b16 %v9624_v4, %v9644_v30  ;;  %v1801_v61 = vshrl.u32 %v9620_v33, 16  ;;  %v9669_v49 = vrot.slane %v1971_v23, %v8087_v27 }
 0x424   : > { %v9632_v46 = vpop.permute.xlu1 %3056  ;;  %v9634_v5 = vpop.permute.xlu0 %3052  ;;  %v7610_v52 = vcombine.low %v2129_v51, %v2129_v51  ;;  %v9673_v1 = vcombine.high %v9535_v13, %v12423_v25  ;;  %v7604_v21 = vcombine.low %v2108_v53, %v2108_v53  ;;  %v1670_v23 = vcombine.high %v9532_v37, %v12423_v25 }
 0x425   : > { %12479 = vst [vmem:[#allocation21_spill] sm:$0xff] %v9669_v49  ;;  %v1802_v42 = vpack.i.b16 %v1801_v61, %v1800_v38  ;;  %v9689_v13 = vcombine.high %v9641_v28, %v12423_v25  ;;  %v1783_v61 = vshrl.u32 %v9562_v50, 16  ;;  %v12481_v28 = vld [vmem:[#allocation50_spill] sm:$0xff]  ;;  %v9715_v39 = vcombine.high %v9669_v49, %v12423_v25 }
 0x426   : > { %1827 = vrot.lane.b32.xlu1 %v7587_v8, %s8006_s19  ;;  %2153 = vrot.lane.b32.xlu0 %v7603_v24, %s8013_s30  ;;  %v1788_v8 = vshrl.u32 %v9532_v37, 16  ;;  %v9663_v24 = vrot.slane %v2005_v0, %v8087_v27  ;;  %v7596_v0 = vcombine.low %v1811_v22, %v1811_v22  ;;  %v1793_v53 = vpack.i.b16 %v9673_v1, %v1670_v23 }
 0x427   : > { %v3767_v15 = vcombine.low %v12481_v28, %v9399_v54  ;;  %v2073_v54 = vcombine.low %v9556_v2, %v9540_v17  ;;  %v12483_v2 = vld [vmem:[#allocation51_spill] sm:$0xff] }
 0x428   : > { %v9654_v62 = vpop.permute.xlu1 %2730  ;;  %v9656_v43 = vpop.permute.xlu0 %3060  ;;  %12478 = vst [vmem:[#allocation74_spill] sm:$0xff] %v9663_v24  ;;  %v1790_v56 = vpack.i.b16 %v1789_v6, %v1788_v8  ;;  %v2095_v6 = vshrl.u32 %v9663_v24, 16  ;;  %v7591_v36 = vcombine.low %v1793_v53, %v1793_v53  ;;  %v3801_v53 = vcombine.low %v12483_v2, %v9421_v60 }
 0x42a   : > { %1823 = vrot.lane.b32.xlu0 %v7586_v45, %s8004_s17  ;;  %2181 = vrot.lane.b32.xlu1 %v7610_v52, %s8013_s30  ;;  %v9681_v45 = vcombine.high %v9620_v33, %v12423_v25  ;;  %v12480_v52 = vld [vmem:[#allocation52_spill] sm:$0xff]  ;;  %v7590_v38 = vcombine.low %v1790_v56, %v1790_v56  ;;  %v2094_v33 = vshrl.u32 %v9669_v49, 16 }
 0x42b   : > { %v3775_v22 = vcombine.low %v12480_v52, %v9419_v34  ;;  %v1782_v34 = vshrl.u32 %v9571_v35, 16  ;;  %v9708_v52 = vcombine.high %v9663_v24, %v12423_v25  ;;  %v12482_v35 = vld [vmem:[#allocation53_spill] sm:$0xff] }
 0x42c   : > { %v9675_v51 = vpop.permute.xlu1 %2738  ;;  %v9677_v10 = vpop.permute.xlu0 %2734  ;;  %v2096_v50 = vpack.i.b16 %v2095_v6, %v2094_v33  ;;  %v3809_v28 = vcombine.low %v12482_v35, %v9436_v58  ;;  %v2039_v6 = vcombine.low %v9574_v55, %v9553_v47  ;;  %v9736_v58 = vcombine.high %v9565_v59, %v12423_v25 }
 0x42d   : > { %v3782_v56 = vrot.slane %v3775_v22, %v12441_v12  ;;  %v1784_v29 = vpack.i.b16 %v1783_v61, %v1782_v34  ;;  %v3774_v22 = vrot.slane %v3767_v15, %v12441_v12  ;;  %v2099_v17 = vpack.i.b16 %v9708_v52, %v9715_v39 }
 0x42e   : > { %1863 = vrot.lane.b32.xlu0 %v7596_v0, %s8013_s30  ;;  %2157 = vrot.lane.b32.xlu1 %v7604_v21, %s8012_s29  ;;  %v7593_v0 = vcombine.low %v1802_v42, %v1802_v42  ;;  %v1805_v21 = vpack.i.b16 %v9681_v45, %v9689_v13  ;;  %v1794_v42 = vshrl.u32 %v1670_v23, 16  ;;  %v9727_v23 = vcombine.high %v9624_v4, %v12423_v25 }
 0x42f   : > { %v7600_v61 = vcombine.low %v2096_v50, %v2096_v50  ;;  %v9744_v47 = vcombine.high %v9644_v30, %v12423_v25  ;;  %v1795_v15 = vshrl.u32 %v9673_v1, 16  ;;  %v3783_v55 = vcombine.low %v3774_v22, %v3782_v56 }
 0x430   : > { %v9696_v8 = vpop.permute.xlu1 %3050  ;;  %v9698_v37 = vpop.permute.xlu0 %2742  ;;  %v7594_v33 = vcombine.low %v1805_v21, %v1805_v21  ;;  %v12484_v21 = vld [vmem:[#allocation54_spill] sm:$0xff]  ;;  %v9751_v34 = vcombine.high %v9584_v41, %v12423_v25  ;;  %v3816_v60 = vrot.slane %v3809_v28, %v12441_v12 }
 0x431   : > { %v4085_v59 = vcombine.low %v12484_v21, %v9434_v16  ;;  %v1817_v1 = vpack.i.b16 %v9727_v23, %v9744_v47  ;;  %v7601_v16 = vcombine.low %v2099_v17, %v2099_v17  ;;  %v1796_v28 = vpack.i.b16 %v1795_v15, %v1794_v42 }
 0x432   : > { %1839 = vrot.lane.b32.xlu0 %v7590_v38, %s8012_s29  ;;  %1851 = vrot.lane.b32.xlu1 %v7593_v0, %s8004_s17  ;;  %v3784_v0 = vcombine.high %v3774_v22, %v3782_v56  ;;  %v9764_v56 = vrot.slane %v2039_v6, %v8087_v27  ;;  %v2111_v41 = vpack.i.b16 %v9736_v58, %v9751_v34  ;;  %v1812_v22 = vshrl.u32 %v9644_v30, 16 }
 0x433   : > { %v9774_v2 = vrot.slane %v3783_v55, %v8087_v27  ;;  %v9780_v17 = vrot.slane %v4085_v59, %v12441_v12  ;;  %v12491_v59 = vld [vmem:[#allocation56_spill] sm:$0xff] }
 0x434   : > { %v9721_v24 = vpop.permute.xlu1 %3058  ;;  %v9723_v38 = vpop.permute.xlu0 %3054  ;;  %12487 = vst [vmem:[#allocation18_spill] sm:$0xff] %v9764_v56  ;;  %v9777_v6 = vrot.slane %v3784_v0, %v8087_v27  ;;  %v4119_v49 = vcombine.low %v12491_v59, %v9457_v14  ;;  %v7605_v19 = vcombine.low %v2111_v41, %v2111_v41  ;;  %v2118_v41 = vshrl.u32 %v9764_v56, 16 }
 0x435   : > { %12488 = vst [vmem:[#allocation29_spill] sm:$0xff] %v9774_v2  ;;  %v7592_v59 = vcombine.low %v1796_v28, %v1796_v28 }
 0x436   : > { %1843 = vrot.lane.b32.xlu0 %v7591_v36, %s8011_s26  ;;  %1855 = vrot.lane.b32.xlu1 %v7594_v33, %s8006_s19  ;;  %v9754_v36 = vrot.slane %v2073_v54, %v8087_v27  ;;  %v7588_v33 = vcombine.low %v1784_v29, %v1784_v29  ;;  %v3808_v54 = vrot.slane %v3801_v53, %v12441_v12  ;;  %v1813_v29 = vshrl.u32 %v9624_v4, 16  ;;  %v12489_v53 = vld [vmem:[#allocation60_spill] sm:$0xff] }
 0x437   : > { %v4127_v21 = vcombine.low %v12489_v53, %v9500_v20  ;;  %v7598_v4 = vcombine.low %v1817_v1, %v1817_v1  ;;  %v12492_v53 = vld [vmem:[#allocation47_spill] sm:$0xff]  ;;  %v9805_v1 = vcombine.high %v9764_v56, %v12423_v25 }
 0x438   : > { %12485 = vst [vmem:[#allocation20_spill] sm:$0xff] %v9754_v36  ;;  %v9757_v50 = vpop.permute.xlu1 %2732  ;;  %v9759_v35 = vpop.permute.xlu0 %3062  ;;  %v9792_v55 = vcombine.high %v9754_v36, %v12423_v25  ;;  %v3818_v0 = vcombine.high %v3808_v54, %v3816_v60  ;;  %v2119_v20 = vshrl.u32 %v9754_v36, 16  ;;  %v3869_v40 = vcombine.low %v12492_v53, %v9459_v18 }
 0x439   : > { %12486 = vst [vmem:[#allocation19_spill] sm:$0xff] %v9757_v50  ;;  %v1814_v14 = vpack.i.b16 %v1813_v29, %v1812_v22  ;;  %v2130_v29 = vshrl.u32 %v9614_v48, 16 }
 0x43a   : > { %2141 = vrot.lane.b32.xlu0 %v7600_v61, %s8004_s17  ;;  %1831 = vrot.lane.b32.xlu1 %v7588_v33, %s8005_s18  ;;  %v3817_v61 = vcombine.low %v3808_v54, %v3816_v60  ;;  %v12490_v33 = vld [vmem:[#allocation58_spill] sm:$0xff]  ;;  %v9808_v60 = vrot.slane %v4127_v21, %v12441_v12  ;;  %v2131_v54 = vshrl.u32 %v9606_v7, 16  ;;  %v2123_v53 = vpack.i.b16 %v9792_v55, %v9805_v1 }
 0x43b   : > { %v4093_v42 = vcombine.low %v12490_v33, %v9476_v57  ;;  %v12493_v57 = vld [vmem:[#allocation49_spill] sm:$0xff]  ;;  %v4126_v21 = vrot.slane %v4119_v49, %v12441_v12  ;;  %v2120_v22 = vpack.i.b16 %v2119_v20, %v2118_v41  ;;  %v7597_v56 = vcombine.low %v1814_v14, %v1814_v14 }
 0x43c   : > { %v9786_v15 = vpop.permute.xlu1 %2740  ;;  %v9788_v30 = vpop.permute.xlu0 %2736  ;;  %v3877_v33 = vcombine.low %v12493_v57, %v9478_v9  ;;  %v9813_v18 = vrot.slane %v3817_v61, %v8087_v27  ;;  %v2101_v57 = vshrl.u32 %v9708_v52, 16  ;;  %v9826_v61 = vrot.slane %v3818_v0, %v8087_v27 }
 0x43d   : > { %v4100_v9 = vrot.slane %v4093_v42, %v12441_v12  ;;  %v3876_v42 = vrot.slane %v3869_v40, %v12441_v12  ;;  %v4136_v28 = vcombine.high %v4126_v21, %v9808_v60  ;;  %v2132_v49 = vpack.i.b16 %v2131_v54, %v2130_v29  ;;  %v12496_v29 = vld [vmem:[#allocation48_spill] sm:$0xff] }
 0x43e   : > { %2145 = vrot.lane.b32.xlu0 %v7601_v16, %s8006_s19  ;;  %1871 = vrot.lane.b32.xlu1 %v7598_v4, %s8011_s26  ;;  %12494 = vst [vmem:[#allocation28_spill] sm:$0xff] %v9813_v18  ;;  %v3884_v36 = vrot.slane %v3877_v33, %v12441_v12  ;;  %v2100_v20 = vshrl.u32 %v9715_v39, 16  ;;  %v2113_v40 = vshrl.u32 %v9736_v58, 16  ;;  %v2112_v54 = vshrl.u32 %v9751_v34, 16 }
 0x43f   : > { %v4101_v41 = vcombine.low %v9780_v17, %v4100_v9  ;;  %v4102_v33 = vcombine.high %v9780_v17, %v4100_v9  ;;  %v3843_v50 = vcombine.low %v12496_v29, %v9578_v11  ;;  %v2056_v58 = vcombine.high %v9614_v48, %v12423_v25  ;;  %v12498_v11 = vld [vmem:[#allocation46_spill] sm:$0xff] }
 0x440   : > { %v9816_v16 = vpop.permute.xlu1 %1485  ;;  %v9818_v4 = vpop.permute.xlu0 %2744  ;;  %v2102_v14 = vpack.i.b16 %v2101_v57, %v2100_v20  ;;  %v3885_v39 = vcombine.low %v3876_v42, %v3884_v36  ;;  %v9854_v17 = vrot.slane %v4136_v28, %v8087_v27  ;;  %v7611_v9 = vcombine.low %v2132_v49, %v2132_v49 }
 0x441   : > { %12495 = vst [vmem:[#allocation27_spill] sm:$0xff] %v9816_v16  ;;  %v7608_v16 = vcombine.low %v2123_v53, %v2123_v53  ;;  %v3886_v53 = vcombine.high %v3876_v42, %v3884_v36  ;;  %v1818_v34 = vshrl.u32 %v9744_v47, 16  ;;  %v2114_v48 = vpack.i.b16 %v2113_v40, %v2112_v54 }
 0x442   : > { %2161 = vrot.lane.b32.xlu0 %v7605_v19, %s8011_s26  ;;  %1847 = vrot.lane.b32.xlu1 %v7592_v59, %s8010_s25  ;;  %v9842_v19 = vcombine.high %v9606_v7, %v12423_v25  ;;  %v7607_v59 = vcombine.low %v2120_v22, %v2120_v22  ;;  %v1819_v7 = vshrl.u32 %v9727_v23, 16  ;;  %v9858_v22 = vrot.slane %v4101_v41, %v8087_v27 }
 0x443   : > { %v9868_v36 = vrot.slane %v4102_v33, %v8087_v27  ;;  %v4135_v42 = vcombine.low %v4126_v21, %v9808_v60  ;;  %v2125_v47 = vshrl.u32 %v9792_v55, 16  ;;  %v1807_v28 = vshrl.u32 %v9681_v45, 16 }
 0x444   : > { %v9835_v52 = vpop.permute.xlu1 %1489  ;;  %v9837_v0 = vpop.permute.xlu0 %1497  ;;  %12497 = vst [vmem:[#allocation26_spill] sm:$0xff] %v9858_v22  ;;  %v2135_v23 = vpack.i.b16 %v9842_v19, %v2056_v58  ;;  %v9874_v49 = vrot.slane %v3885_v39, %v8087_v27  ;;  %v1820_v20 = vpack.i.b16 %v1819_v7, %v1818_v34  ;;  %v9880_v41 = vrot.slane %v3886_v53, %v8087_v27 }
 0x445   : > { %v4235_v60 = vpack.i.b16 %v9854_v17, %v9868_v36  ;;  %v2124_v55 = vshrl.u32 %v9805_v1, 16  ;;  %v1806_v45 = vshrl.u32 %v9689_v13, 16  ;;  %v7602_v33 = vcombine.low %v2102_v14, %v2102_v14 }
 0x446   : > { %1867 = vrot.lane.b32.xlu0 %v7597_v56, %s8012_s29  ;;  %2173 = vrot.lane.b32.xlu1 %v7608_v16, %s8006_s19  ;;  %v3835_v56 = vcombine.low %v12498_v11, %v9542_v3  ;;  %12500 = vst [vmem:[#allocation24_spill] sm:$0xff] %v9874_v49  ;;  %v3850_v3 = vrot.slane %v3843_v50, %v12441_v12  ;;  %v2137_v14 = vshrl.u32 %v9842_v19, 16  ;;  %v12503_v11 = vld [vmem:[#allocation37_spill] sm:$0xff] }
 0x447   : > { %v7612_v54 = vcombine.low %v2135_v23, %v2135_v23  ;;  %v9892_v39 = vrot.slane %v4135_v42, %v8087_v27  ;;  %v3917_v29 = vpack.i.b16 %v9826_v61, %v9777_v6  ;;  %v9896_v7 = vpack.i.b16 %v2125_v47, %v2124_v55  ;;  %v12504_v47 = vld [vmem:[#allocation34_spill] sm:$0xff]  ;;  %v12505_v55 = vld [vmem:[#allocation36_spill] sm:$0xff] }
 0x448   : > { %v9862_v57 = vpop.permute.xlu1 %1525  ;;  %v9864_v16 = vpop.permute.xlu0 %1505  ;;  %v3842_v21 = vrot.slane %v3835_v56, %v12441_v12  ;;  %v9898_v1 = vpack.i.b16 %v1807_v28, %v1806_v45  ;;  %v7599_v53 = vcombine.low %v1820_v20, %v1820_v20  ;;  %v3122_v56 = vcombine.low %v12503_v11, %v9656_v43 }
 0x449   : > { %12499 = vst [vmem:[#allocation25_spill] sm:$0xff] %v9864_v16  ;;  %12502 = vst [vmem:[#allocation17_spill] sm:$0xff] %v9892_v39  ;;  %v2136_v23 = vshrl.u32 %v2056_v58, 16  ;;  %v4169_v42 = vcombine.low %v9598_v32, %v9601_v63  ;;  %v3080_v28 = vcombine.low %v12504_v47, %v9609_v26  ;;  %v3088_v45 = vcombine.low %v12505_v55, %v9632_v46 }
 0x44a   : > { %2169 = vrot.lane.b32.xlu0 %v7607_v59, %s8004_s17  ;;  %2185 = vrot.lane.b32.xlu1 %v7611_v9, %s8012_s29  ;;  %v7606_v59 = vcombine.low %v2114_v48, %v2114_v48  ;;  %v3851_v13 = vcombine.low %v3842_v21, %v3850_v3  ;;  %v3907_v9 = vshrl.u32 %v9813_v18, 16  ;;  %v3852_v34 = vcombine.high %v3842_v21, %v3850_v3  ;;  %v12507_v21 = vld [vmem:[#allocation35_spill] sm:$0xff] }
 0x44b   : > { %v7695_v48 = vcombine.low %v4235_v60, %v4235_v60  ;;  %v3906_v3 = vshrl.u32 %v9774_v2, 16  ;;  %v3114_v43 = vcombine.low %v12507_v21, %v9634_v5  ;;  %v7681_v60 = vcombine.low %v3917_v29, %v3917_v29 }
 0x44c   : > { %v9887_v40 = vpop.permute.xlu1 %1501  ;;  %v9889_v50 = vpop.permute.xlu0 %1513  ;;  %v7609_v58 = vcombine.low %v9896_v7, %v9896_v7  ;;  %v9924_v26 = vrot.slane %v3851_v13, %v8087_v27  ;;  %v2138_v46 = vpack.i.b16 %v2137_v14, %v2136_v23  ;;  %v9929_v11 = vrot.slane %v3852_v34, %v8087_v27  ;;  %v12512_v23 = vld [vmem:[#allocation44_spill] sm:$0xff] }
 0x44d   : > { %12501 = vst [vmem:[#allocation23_spill] sm:$0xff] %v9887_v40  ;;  %v4203_v5 = vcombine.low %v9627_v44, %v9630_v31  ;;  %v3129_v29 = vrot.slane %v3122_v56, %v12441_v12  ;;  %v9936_v7 = vcombine.high %v9813_v18, %v12423_v25  ;;  %v9948_v14 = vrot.slane %v3080_v28, %v12441_v12 }
 0x44e   : > { %2149 = vrot.lane.b32.xlu0 %v7602_v33, %s8005_s18  ;;  %2165 = vrot.lane.b32.xlu1 %v7606_v59, %s8010_s25  ;;  %v7595_v33 = vcombine.low %v9898_v1, %v9898_v1  ;;  %12508 = vst [vmem:[#allocation14_spill] sm:$0xff] %v9924_v26  ;;  %v3908_v59 = vpack.i.b16 %v3907_v9, %v3906_v3  ;;  %v4224_v55 = vshrl.u32 %v9858_v22, 16  ;;  %v12514_v3 = vld [vmem:[#allocation42_spill] sm:$0xff] }
 0x44f   : > { %v9939_v1 = vrot.slane %v4169_v42, %v8087_v27  ;;  %v9951_v9 = vrot.slane %v3088_v45, %v12441_v12  ;;  %v2770_v42 = vcombine.low %v12512_v23, %v9675_v51  ;;  %v7613_v47 = vcombine.low %v2138_v46, %v2138_v46 }
 0x450   : > { %v9912_v20 = vpop.permute.xlu1 %1529  ;;  %v9914_v19 = vpop.permute.xlu0 %1517  ;;  %v7678_v28 = vcombine.low %v3908_v59, %v3908_v59  ;;  %v9970_v45 = vcombine.high %v9892_v39, %v12423_v25  ;;  %v9973_v51 = vrot.slane %v4203_v5, %v8087_v27  ;;  %v2762_v21 = vcombine.low %v12514_v3, %v9654_v62 }
 0x451   : > { %12506 = vst [vmem:[#allocation22_spill] sm:$0xff] %v9912_v20  ;;  %12509 = vst [vmem:[#allocation16_spill] sm:$0xff] %v9939_v1  ;;  %v9991_v5 = vcombine.high %v9858_v22, %v12423_v25  ;;  %v3919_v62 = vshrl.u32 %v9826_v61, 16  ;;  %v12517_v23 = vcombine.high %v9627_v44, %v9630_v31  ;;  %v3918_v31 = vshrl.u32 %v9777_v6, 16 }
 0x452   : > { %2189 = vrot.lane.b32.xlu0 %v7612_v54, %s8011_s26  ;;  %4283 = vrot.lane.b32.xlu1 %v7695_v48, %s8013_s30  ;;  %v12510_v54 = vcombine.high %v9598_v32, %v9601_v63  ;;  %v3121_v48 = vrot.slane %v3114_v43, %v12441_v12  ;;  %v9962_v32 = vcombine.high %v9774_v2, %v12423_v25  ;;  %v4225_v63 = vshrl.u32 %v9892_v39, 16 }
 0x453   : > { %12513 = vst [vmem:[#allocation55_spill] sm:$0xff] %v9973_v51  ;;  %v9998_v3 = vrot.slane %v12517_v23, %v8087_v27  ;;  %v4229_v44 = vpack.i.b16 %v9970_v45, %v9991_v5  ;;  %v10013_v23 = vrot.slane %v2762_v21, %v12441_v12  ;;  %v10033_v21 = vcombine.high %v9826_v61, %v12423_v25 }
 0x454   : > { %v9945_v13 = vrot.slane %v12510_v54, %v8087_v27  ;;  %v9953_v34 = vpop.permute.xlu1 %1509  ;;  %v9955_v56 = vpop.permute.xlu0 %1493  ;;  %v3131_v43 = vcombine.high %v3121_v48, %v3129_v29  ;;  %v9987_v54 = vpack.i.b16 %v9880_v41, %v9929_v11  ;;  %v4226_v18 = vpack.i.b16 %v4225_v63, %v4224_v55 }
 0x455   : > { %12511 = vst [vmem:[#allocation15_spill] sm:$0xff] %v9953_v34  ;;  %v3130_v2 = vcombine.low %v3121_v48, %v3129_v29  ;;  %v12518_v34 = vld [vmem:[#allocation43_spill] sm:$0xff]  ;;  %v12519_v29 = vld [vmem:[#allocation45_spill] sm:$0xff]  ;;  %v10029_v55 = vpack.i.b16 %v3919_v62, %v3918_v31  ;;  %v7693_v61 = vcombine.low %v4229_v44, %v4229_v44  ;;  %v12522_v62 = vld [vmem:[#allocation30_spill] sm:$0xff]  ;;  %v3931_v39 = vshrl.u32 %v9874_v49, 16 }
 0x456   : > { %1875 = vrot.lane.b32.xlu1 %v7599_v53, %s8010_s25  ;;  %3965 = vrot.lane.b32.xlu0 %v7681_v60, %s8013_s30  ;;  %v3911_v53 = vpack.i.b16 %v9936_v7, %v9962_v32  ;;  %v3097_v60 = vcombine.high %v9948_v14, %v9951_v9  ;;  %v2796_v22 = vcombine.low %v12518_v34, %v9677_v10 }
 0x457   : > { %v2804_v48 = vcombine.low %v12519_v29, %v9698_v37  ;;  %v7688_v34 = vcombine.low %v9987_v54, %v9987_v54  ;;  %v10043_v29 = vrot.slane %v3130_v2, %v8087_v27  ;;  %v12523_v2 = vld [vmem:[#allocation33_spill] sm:$0xff] }
 0x458   : > { %v9981_v46 = vpop.permute.xlu1 %3647  ;;  %v9983_v59 = vpop.permute.xlu0 %1533  ;;  %v7679_v63 = vcombine.low %v3911_v53, %v3911_v53  ;;  %v10021_v10 = vrot.slane %v3097_v60, %v8087_v27  ;;  %v10039_v53 = vcombine.high %v9777_v6, %v12423_v25  ;;  %v3930_v60 = vshrl.u32 %v9924_v26, 16 }
 0x459   : > { %12515 = vst [vmem:[#allocation59_spill] sm:$0xff] %v9981_v46  ;;  %12516 = vst [vmem:[#allocation57_spill] sm:$0xff] %v9983_v59  ;;  %v10003_v46 = vrot.slane %v2770_v42, %v12441_v12  ;;  %v10016_v42 = vrot.slane %v3131_v43, %v8087_v27  ;;  %v7692_v43 = vcombine.low %v4226_v18, %v4226_v18  ;;  %v12530_v59 = vld [vmem:[#allocation39_spill] sm:$0xff] }
 0x45a   : > { %2177 = vrot.lane.b32.xlu1 %v7609_v58, %s8005_s18  ;;  %1859 = vrot.lane.b32.xlu0 %v7595_v33, %s8005_s18  ;;  %12521 = vst [vmem:[#allocation52_spill] sm:$0xff] %v10043_v29  ;;  %v10046_v54 = vrot.slane %v2796_v22, %v12441_v12  ;;  %v3148_v18 = vcombine.low %v12522_v62, %v9696_v8  ;;  %v12524_v22 = vld [vmem:[#allocation41_spill] sm:$0xff] }
 0x45b   : > { %v2779_v37 = vcombine.high %v10013_v23, %v10003_v46  ;;  %v2811_v31 = vrot.slane %v2804_v48, %v12441_v12  ;;  %v3230_v6 = vpack.i.b16 %v10016_v42, %v10021_v10  ;;  %v2872_v16 = vcombine.low %v12524_v22, %v9818_v4  ;;  %v12528_v22 = vld [vmem:[#allocation31_spill] sm:$0xff] }
 0x45c   : > { %v10023_v58 = vpop.permute.xlu1 %1537  ;;  %v10025_v33 = vpop.permute.xlu0 %1521  ;;  %v7682_v8 = vcombine.low %v10029_v55, %v10029_v55  ;;  %v10068_v44 = vpack.i.b16 %v10033_v21, %v10039_v53  ;;  %v2778_v48 = vcombine.low %v10013_v23, %v10003_v46  ;;  %v12529_v55 = vld [vmem:[#allocation40_spill] sm:$0xff]  ;;  %v2864_v20 = vcombine.low %v12530_v59, %v9788_v30  ;;  %v12532_v23 = vld [vmem:[#allocation38_spill] sm:$0xff] }
 0x45d   : > { %12520 = vst [vmem:[#allocation61_spill] sm:$0xff] %v10023_v58  ;;  %v3190_v58 = vcombine.low %v12523_v2, %v9759_v35  ;;  %v10073_v62 = vrot.slane %v2779_v37, %v8087_v27  ;;  %v12527_v35 = vld [vmem:[#allocation32_spill] sm:$0xff]  ;;  %v10077_v2 = vpack.i.b16 %v3931_v39, %v3930_v60  ;;  %v10088_v46 = vrot.slane %v3148_v18, %v12441_v12  ;;  %v12531_v39 = vld [vmem:[#allocation19_spill] sm:$0xff] }
 0x45e   : > { %2193 = vrot.lane.b32.xlu1 %v7613_v47, %s8010_s25  ;;  %3953 = vrot.lane.b32.xlu0 %v7678_v28, %s8004_s17  ;;  %v3156_v4 = vcombine.low %v12527_v35, %v9721_v24  ;;  %v2813_v24 = vcombine.high %v10046_v54, %v2811_v31  ;;  %v2830_v37 = vcombine.low %v12532_v23, %v12531_v39 }
 0x45f   : > { %v7645_v60 = vcombine.low %v3230_v6, %v3230_v6  ;;  %v2812_v18 = vcombine.low %v10046_v54, %v2811_v31  ;;  %v3942_v54 = vshrl.u32 %v9929_v11, 16  ;;  %v4220_v39 = vcombine.high %v9998_v3, %v12423_v25 }
 0x460   : > { %v10060_v47 = vpop.permute.xlu1 %3651  ;;  %v10062_v28 = vpop.permute.xlu0 %3635  ;;  %v10111_v6 = vrot.slane %v3156_v4, %v12441_v12  ;;  %v10134_v31 = vrot.slane %v2813_v24, %v8087_v27  ;;  %v10137_v4 = vrot.slane %v2830_v37, %v12441_v12  ;;  %v4186_v24 = vcombine.high %v9945_v13, %v12423_v25 }
 0x461   : > { %12525 = vst [vmem:[#allocation50_spill] sm:$0xff] %v10060_v47  ;;  %12526 = vst [vmem:[#allocation53_spill] sm:$0xff] %v10062_v28  ;;  %v3182_v47 = vcombine.low %v12528_v22, %v9723_v38  ;;  %v2838_v28 = vcombine.low %v12529_v55, %v9786_v15  ;;  %v10094_v38 = vrot.slane %v3190_v58, %v12441_v12 }
 0x462   : > { %3957 = vrot.lane.b32.xlu1 %v7679_v63, %s8006_s19  ;;  %4271 = vrot.lane.b32.xlu0 %v7692_v43, %s8004_s17  ;;  %v10097_v15 = vrot.slane %v2872_v16, %v12441_v12  ;;  %v7683_v63 = vcombine.low %v10068_v44, %v10068_v44  ;;  %v10107_v43 = vcombine.high %v9924_v26, %v12423_v25 }
 0x463   : > { %v10115_v16 = vcombine.high %v9874_v49, %v12423_v25  ;;  %v10119_v58 = vpack.i.b16 %v9998_v3, %v9945_v13  ;;  %v10122_v35 = vrot.slane %v3182_v47, %v12441_v12  ;;  %v10125_v44 = vrot.slane %v2838_v28, %v12441_v12 }
 0x464   : > { %v10099_v30 = vpop.permute.xlu1 %3667  ;;  %v10101_v59 = vpop.permute.xlu0 %3639  ;;  %v10128_v22 = vrot.slane %v2864_v20, %v12441_v12  ;;  %v4260_v47 = vshrl.u32 %v9945_v13, 16  ;;  %v4261_v28 = vshrl.u32 %v9998_v3, 16  ;;  %v3164_v23 = vcombine.low %v10088_v46, %v10111_v6 }
 0x465   : > { %12533 = vst [vmem:[#allocation51_spill] sm:$0xff] %v10099_v30  ;;  %12534 = vst [vmem:[#allocation54_spill] sm:$0xff] %v10101_v59  ;;  %v3198_v20 = vcombine.low %v10122_v35, %v10094_v38  ;;  %v3935_v37 = vpack.i.b16 %v10115_v16, %v10107_v43  ;;  %v3913_v12 = vshrl.u32 %v9936_v7, 16  ;;  %v10164_v13 = vpack.i.b16 %v4220_v39, %v4186_v24 }
 0x466   : > { %3993 = vrot.lane.b32.xlu1 %v7688_v34, %s8013_s30  ;;  %4275 = vrot.lane.b32.xlu0 %v7693_v61, %s8006_s19  ;;  %v2880_v34 = vcombine.low %v10128_v22, %v10097_v15  ;;  %v10158_v59 = vpack.i.b16 %v4261_v28, %v4260_v47  ;;  %v4266_v3 = vshrl.u32 %v4186_v24, 16  ;;  %v10167_v30 = vrot.slane %v2812_v18, %v8087_v27 }
 0x467   : > { %v7685_v49 = vcombine.low %v10077_v2, %v10077_v2  ;;  %v3943_v7 = vshrl.u32 %v9880_v41, 16  ;;  %v3912_v47 = vshrl.u32 %v9962_v32, 16  ;;  %v10174_v28 = vrot.slane %v3198_v20, %v8087_v27 }
 0x468   : > { %v10145_v55 = vpop.permute.xlu1 %3643  ;;  %v10147_v61 = vpop.permute.xlu0 %3675  ;;  %12537 = vst [vmem:[#allocation56_spill] sm:$0xff] %v10167_v30  ;;  %v2912_v18 = vpack.i.b16 %v10134_v31, %v10073_v62  ;;  %v12541_v2 = vcombine.low %v9948_v14, %v9951_v9  ;;  %v10194_v20 = vrot.slane %v2778_v48, %v8087_v27  ;;  %v10197_v40 = vrot.slane %v3164_v23, %v8087_v27 }
 0x469   : > { %12535 = vst [vmem:[#allocation60_spill] sm:$0xff] %v10145_v55  ;;  %12536 = vst [vmem:[#allocation58_spill] sm:$0xff] %v10147_v61  ;;  %v2846_v55 = vcombine.low %v10137_v4, %v10125_v44  ;;  %v4267_v61 = vshrl.u32 %v4220_v39, 16  ;;  %v3914_v26 = vpack.i.b16 %v3913_v12, %v3912_v47  ;;  %v3925_v14 = vshrl.u32 %v10033_v21, 16 }
 0x46a   : > { %3969 = vrot.lane.b32.xlu1 %v7682_v8, %s8012_s29  ;;  %3278 = vrot.lane.b32.xlu0 %v7645_v60, %s8013_s30  ;;  %12538 = vst [vmem:[#allocation47_spill] sm:$0xff] %v10174_v28  ;;  %v10177_v8 = vrot.slane %v2880_v34, %v8087_v27  ;;  %v10191_v32 = vrot.slane %v12541_v2, %v8087_v27  ;;  %12543 = vst [vmem:[#allocation37_spill] sm:$0xff] %v10194_v20 }
 0x46b   : > { %v10185_v39 = vpack.i.b16 %v4267_v61, %v4266_v3  ;;  %v3944_v34 = vpack.i.b16 %v3943_v7, %v3942_v54  ;;  %12544 = vst [vmem:[#allocation34_spill] sm:$0xff] %v10197_v40  ;;  %v7686_v61 = vcombine.low %v3935_v37, %v3935_v37  ;;  %v7631_v23 = vcombine.low %v2912_v18, %v2912_v18 }
 0x46c   : > { %12539 = vst [vmem:[#allocation49_spill] sm:$0xff] %v10177_v8  ;;  %v10179_v60 = vpop.permute.xlu1 %2634  ;;  %v10181_v24 = vpop.permute.xlu0 %3655  ;;  %12542 = vst [vmem:[#allocation46_spill] sm:$0xff] %v10191_v32  ;;  %v3924_v37 = vshrl.u32 %v10039_v53, 16  ;;  %v10228_v3 = vcombine.high %v9880_v41, %v12423_v25  ;;  %v7680_v2 = vcombine.low %v3914_v26, %v3914_v26  ;;  %v4249_v53 = vshrl.u32 %v9973_v51, 16 }
 0x46d   : > { %12540 = vst [vmem:[#allocation48_spill] sm:$0xff] %v10181_v24  ;;  %v10200_v24 = vrot.slane %v2846_v55, %v8087_v27  ;;  %v7689_v7 = vcombine.low %v3944_v34, %v3944_v34  ;;  %v4248_v41 = vshrl.u32 %v9939_v1, 16  ;;  %v3219_v34 = vshrl.u32 %v10191_v32, 16 }
 0x46e   : > { %3973 = vrot.lane.b32.xlu1 %v7683_v63, %s8011_s26  ;;  %3981 = vrot.lane.b32.xlu0 %v7685_v49, %s8004_s17  ;;  %v10217_v49 = vcombine.high %v9929_v11, %v12423_v25  ;;  %v3926_v47 = vpack.i.b16 %v3925_v14, %v3924_v37 }
 0x46f   : > { %12545 = vst [vmem:[#allocation36_spill] sm:$0xff] %v10200_v24  ;;  %v4250_v63 = vpack.i.b16 %v4249_v53, %v4248_v41 }
 0x470   : > { %v10211_v54 = vpop.permute.xlu1 %2670  ;;  %v10213_v55 = vpop.permute.xlu0 %2642  ;;  %v3947_v9 = vpack.i.b16 %v10228_v3, %v10217_v49  ;;  %v7684_v14 = vcombine.low %v3926_v47, %v3926_v47  ;;  %v2901_v47 = vshrl.u32 %v10194_v20, 16 }
 0x472   : > { %3985 = vrot.lane.b32.xlu1 %v7686_v61, %s8006_s19  ;;  %2960 = vrot.lane.b32.xlu0 %v7631_v23, %s8013_s30  ;;  %v3220_v61 = vshrl.u32 %v10043_v29, 16  ;;  %v10244_v23 = vcombine.high %v9973_v51, %v12423_v25  ;;  %v7690_v21 = vcombine.low %v3947_v9, %v3947_v9  ;;  %v4231_v51 = vshrl.u32 %v9970_v45, 16 }
 0x473   : > { %v10274_v45 = vcombine.high %v10194_v20, %v12423_v25  ;;  %v3165_v20 = vcombine.high %v10088_v46, %v10111_v6 }
 0x474   : > { %v10230_v11 = vpop.permute.xlu1 %3671  ;;  %v10232_v18 = vpop.permute.xlu0 %3663  ;;  %v3221_v12 = vpack.i.b16 %v3220_v61, %v3219_v34  ;;  %v7699_v61 = vcombine.low %v4250_v63, %v4250_v63 }
 0x475   : > { %12546 = vst [vmem:[#allocation35_spill] sm:$0xff] %v10230_v11  ;;  %12547 = vst [vmem:[#allocation44_spill] sm:$0xff] %v10232_v18  ;;  %v3244_v18 = vshrl.u32 %v10174_v28, 16 }
 0x476   : > { %3997 = vrot.lane.b32.xlu1 %v7689_v7, %s8012_s29  ;;  %3961 = vrot.lane.b32.xlu0 %v7680_v2, %s8005_s18  ;;  %v2902_v7 = vshrl.u32 %v10167_v30, 16  ;;  %v10253_v2 = vcombine.high %v9939_v1, %v12423_v25  ;;  %v7642_v41 = vcombine.low %v3221_v12, %v3221_v12  ;;  %v10267_v1 = vcombine.high %v10167_v30, %v12423_v25 }
 0x478   : > { %v10246_v26 = vpop.permute.xlu1 %3687  ;;  %v10248_v37 = vpop.permute.xlu0 %3679  ;;  %v4253_v48 = vpack.i.b16 %v10244_v23, %v10253_v2  ;;  %v2903_v34 = vpack.i.b16 %v2902_v7, %v2901_v47 }
 0x479   : > { %12548 = vst [vmem:[#allocation42_spill] sm:$0xff] %v10246_v26  ;;  %12549 = vst [vmem:[#allocation43_spill] sm:$0xff] %v10248_v37 }
 0x47a   : > { %3977 = vrot.lane.b32.xlu1 %v7684_v14, %s8010_s25  ;;  %4001 = vrot.lane.b32.xlu0 %v7690_v21, %s8011_s26  ;;  %v4230_v21 = vshrl.u32 %v9991_v5, 16  ;;  %v3199_v14 = vcombine.high %v10122_v35, %v10094_v38  ;;  %v7700_v63 = vcombine.low %v4253_v48, %v4253_v48  ;;  %v7628_v30 = vcombine.low %v2903_v34, %v2903_v34 }
 0x47b   : > { %v2906_v5 = vpack.i.b16 %v10267_v1, %v10274_v45  ;;  %v3231_v38 = vshrl.u32 %v10021_v10, 16  ;;  %v2881_v48 = vcombine.high %v10128_v22, %v10097_v15  ;;  %v2847_v15 = vcombine.high %v10137_v4, %v10125_v44 }
 0x47c   : > { %v10261_v9 = vpop.permute.xlu1 %2658  ;;  %v10263_v53 = vpop.permute.xlu0 %3683  ;;  %v4232_v12 = vpack.i.b16 %v4231_v51, %v4230_v21  ;;  %v10295_v51 = vcombine.high %v10191_v32, %v12423_v25  ;;  %v10299_v35 = vrot.slane %v3199_v14, %v8087_v27  ;;  %v10314_v14 = vrot.slane %v3165_v20, %v8087_v27 }
 0x47d   : > { %12550 = vst [vmem:[#allocation45_spill] sm:$0xff] %v10263_v53  ;;  %v7629_v6 = vcombine.low %v2906_v5, %v2906_v5  ;;  %v10322_v22 = vcombine.high %v10021_v10, %v12423_v25  ;;  %v10337_v10 = vrot.slane %v2847_v15, %v8087_v27  ;;  %v10351_v15 = vcombine.high %v10134_v31, %v12423_v25 }
 0x47e   : > { %4299 = vrot.lane.b32.xlu1 %v7699_v61, %s8004_s17  ;;  %3266 = vrot.lane.b32.xlu0 %v7642_v41, %s8004_s17  ;;  %v10286_v61 = vcombine.high %v10043_v29, %v12423_v25  ;;  %v3232_v41 = vshrl.u32 %v10016_v42, 16  ;;  %v7694_v34 = vcombine.low %v4232_v12, %v4232_v12  ;;  %v10325_v12 = vrot.slane %v2881_v48, %v8087_v27 }
 0x47f   : > { %v3937_v48 = vshrl.u32 %v10115_v16, 16  ;;  %v10358_v16 = vcombine.high %v10073_v62, %v12423_v25  ;;  %v10391_v53 = vcombine.high %v10200_v24, %v12423_v25 }
 0x480   : > { %v10278_v7 = vpop.permute.xlu1 %2662  ;;  %v10280_v47 = vpop.permute.xlu0 %3659 }
 0x481   : > { %12551 = vst [vmem:[#allocation30_spill] sm:$0xff] %v10280_v47  ;;  %v10311_v47 = vcombine.high %v10016_v42, %v12423_v25  ;;  %v3254_v42 = vpack.i.b16 %v10299_v35, %v10314_v14 }
 0x482   : > { %4303 = vrot.lane.b32.xlu1 %v7700_v63, %s8006_s19  ;;  %2948 = vrot.lane.b32.xlu0 %v7628_v30, %s8004_s17  ;;  %v3224_v30 = vpack.i.b16 %v10286_v61, %v10295_v51  ;;  %v3233_v63 = vpack.i.b16 %v3232_v41, %v3231_v38  ;;  %v3936_v38 = vshrl.u32 %v10107_v43, 16 }
 0x483   : > { %v3236_v4 = vpack.i.b16 %v10311_v47, %v10322_v22  ;;  %v7652_v32 = vcombine.low %v3254_v42, %v3254_v42 }
 0x484   : > { %v10303_v21 = vpop.permute.xlu1 %2674  ;;  %v10305_v46 = vpop.permute.xlu0 %2630  ;;  %v7643_v41 = vcombine.low %v3224_v30, %v3224_v30  ;;  %v7646_v44 = vcombine.low %v3233_v63, %v3233_v63  ;;  %v3938_v29 = vpack.i.b16 %v3937_v48, %v3936_v38  ;;  %v10368_v38 = vcombine.high %v10174_v28, %v12423_v25 }
 0x485   : > { %v7647_v43 = vcombine.low %v3236_v4, %v3236_v4  ;;  %v3949_v48 = vshrl.u32 %v10228_v3, 16 }
 0x486   : > { %4279 = vrot.lane.b32.xlu1 %v7694_v34, %s8005_s18  ;;  %2952 = vrot.lane.b32.xlu0 %v7629_v6, %s8006_s19  ;;  %v2936_v34 = vpack.i.b16 %v10325_v12, %v10337_v10  ;;  %v2914_v6 = vshrl.u32 %v10134_v31, 16  ;;  %v7687_v4 = vcombine.low %v3938_v29, %v3938_v29  ;;  %v2918_v31 = vpack.i.b16 %v10351_v15, %v10358_v16 }
 0x488   : > { %v10329_v5 = vpop.permute.xlu1 %2678  ;;  %v10331_v20 = vpop.permute.xlu0 %2646 }
 0x489   : > { %12552 = vst [vmem:[#allocation33_spill] sm:$0xff] %v10329_v5 }
 0x48a   : > { %3270 = vrot.lane.b32.xlu1 %v7643_v41, %s8006_s19  ;;  %3282 = vrot.lane.b32.xlu0 %v7646_v44, %s8012_s29  ;;  %v2913_v41 = vshrl.u32 %v10073_v62, 16  ;;  %v7638_v44 = vcombine.low %v2936_v34, %v2936_v34  ;;  %v10375_v62 = vcombine.high %v10197_v40, %v12423_v25  ;;  %v10380_v34 = vcombine.high %v10177_v8, %v12423_v25 }
 0x48c   : > { %v10345_v30 = vpop.permute.xlu1 %2654  ;;  %v10347_v63 = vpop.permute.xlu0 %2650  ;;  %v2915_v27 = vpack.i.b16 %v2914_v6, %v2913_v41  ;;  %v3248_v41 = vpack.i.b16 %v10368_v38, %v10375_v62  ;;  %v2930_v3 = vpack.i.b16 %v10380_v34, %v10391_v53 }
 0x48d   : > { %12553 = vst [vmem:[#allocation41_spill] sm:$0xff] %v10345_v30  ;;  %12554 = vst [vmem:[#allocation32_spill] sm:$0xff] %v10347_v63 }
 0x48e   : > { %3306 = vrot.lane.b32.xlu1 %v7652_v32, %s8013_s30  ;;  %3286 = vrot.lane.b32.xlu0 %v7647_v43, %s8011_s26  ;;  %v3948_v32 = vshrl.u32 %v10217_v49, 16  ;;  %v7632_v29 = vcombine.low %v2915_v27, %v2915_v27  ;;  %v7633_v49 = vcombine.low %v2918_v31, %v2918_v31  ;;  %v4254_v27 = vshrl.u32 %v10253_v2, 16 }
 0x48f   : > { %v3256_v31 = vshrl.u32 %v10299_v35, 16  ;;  %v3243_v2 = vshrl.u32 %v10197_v40, 16 }
 0x490   : > { %v10360_v26 = vpop.permute.xlu1 %2682  ;;  %v10362_v42 = vpop.permute.xlu0 %2638 }
 0x491   : > { %12555 = vst [vmem:[#allocation31_spill] sm:$0xff] %v10360_v26 }
 0x492   : > { %2988 = vrot.lane.b32.xlu1 %v7638_v44, %s8013_s30  ;;  %3989 = vrot.lane.b32.xlu0 %v7687_v4, %s8005_s18  ;;  %v3950_v44 = vpack.i.b16 %v3949_v48, %v3948_v32  ;;  %v4255_v4 = vshrl.u32 %v10244_v23, 16  ;;  %v7650_v23 = vcombine.low %v3248_v41, %v3248_v41  ;;  %v3245_v41 = vpack.i.b16 %v3244_v18, %v3243_v2 }
 0x494   : > { %v10382_v6 = vpop.permute.xlu1 %1835  ;;  %v10384_v43 = vpop.permute.xlu0 %2666  ;;  %v7691_v48 = vcombine.low %v3950_v44, %v3950_v44  ;;  %v4256_v11 = vpack.i.b16 %v4255_v4, %v4254_v27  ;;  %v3215_v44 = vcombine.high %v10299_v35, %v12423_v25  ;;  %v2926_v4 = vshrl.u32 %v10177_v8, 16 }
 0x495   : > { %v3181_v27 = vcombine.high %v10314_v14, %v12423_v25 }
 0x496   : > { %2964 = vrot.lane.b32.xlu1 %v7632_v29, %s8012_s29  ;;  %2968 = vrot.lane.b32.xlu0 %v7633_v49, %s8011_s26  ;;  %v3255_v29 = vshrl.u32 %v10314_v14, 16  ;;  %v7636_v49 = vcombine.low %v2930_v3, %v2930_v3  ;;  %v7701_v5 = vcombine.low %v4256_v11, %v4256_v11  ;;  %v2925_v3 = vshrl.u32 %v10200_v24, 16 }
 0x498   : > { %v10399_v37 = vpop.permute.xlu1 %1827  ;;  %v10401_v32 = vpop.permute.xlu0 %2153  ;;  %v3257_v30 = vpack.i.b16 %v3256_v31, %v3255_v29  ;;  %v2938_v31 = vshrl.u32 %v10325_v12, 16  ;;  %v3260_v29 = vpack.i.b16 %v3215_v44, %v3181_v27  ;;  %v2927_v2 = vpack.i.b16 %v2926_v4, %v2925_v3 }
 0x499   : > { %v2907_v4 = vshrl.u32 %v10274_v45, 16 }
 0x49a   : > { %3298 = vrot.lane.b32.xlu1 %v7650_v23, %s8006_s19  ;;  %4005 = vrot.lane.b32.xlu0 %v7691_v48, %s8010_s25  ;;  %v3226_v23 = vshrl.u32 %v10286_v61, 16  ;;  %v7653_v35 = vcombine.low %v3257_v30, %v3257_v30  ;;  %v7649_v48 = vcombine.low %v3245_v41, %v3245_v41  ;;  %v7654_v24 = vcombine.low %v3260_v29, %v3260_v29 }
 0x49b   : > { %v7635_v8 = vcombine.low %v2927_v2, %v2927_v2  ;;  %v3238_v30 = vshrl.u32 %v10311_v47, 16  ;;  %v2908_v41 = vshrl.u32 %v10267_v1, 16  ;;  %v2897_v1 = vcombine.high %v10325_v12, %v12423_v25 }
 0x49c   : > { %v10408_v26 = vpop.permute.xlu1 %2181  ;;  %v10410_v63 = vpop.permute.xlu0 %1823  ;;  %v2920_v12 = vshrl.u32 %v10351_v15, 16 }
 0x49d   : > { %v2909_v47 = vpack.i.b16 %v2908_v41, %v2907_v4 }
 0x49e   : > { %2980 = vrot.lane.b32.xlu1 %v7636_v49, %s8006_s19  ;;  %4307 = vrot.lane.b32.xlu0 %v7701_v5, %s8005_s18  ;;  %v2937_v49 = vshrl.u32 %v10337_v10, 16  ;;  %v3225_v5 = vshrl.u32 %v10295_v51, 16  ;;  %v3237_v51 = vshrl.u32 %v10322_v22, 16  ;;  %v3262_v22 = vshrl.u32 %v3215_v44, 16 }
 0x4a0   : > { %v10422_v11 = vpop.permute.xlu1 %2157  ;;  %v10424_v18 = vpop.permute.xlu0 %1863  ;;  %v2939_v14 = vpack.i.b16 %v2938_v31, %v2937_v49  ;;  %v3227_v40 = vpack.i.b16 %v3226_v23, %v3225_v5  ;;  %v2932_v31 = vshrl.u32 %v10380_v34, 16  ;;  %v3239_v29 = vpack.i.b16 %v3238_v30, %v3237_v51 }
 0x4a1   : > { %v7630_v49 = vcombine.low %v2909_v47, %v2909_v47 }
 0x4a2   : > { %3310 = vrot.lane.b32.xlu1 %v7653_v35, %s8012_s29  ;;  %3294 = vrot.lane.b32.xlu0 %v7649_v48, %s8004_s17  ;;  %v7639_v3 = vcombine.low %v2939_v14, %v2939_v14  ;;  %v7644_v48 = vcombine.low %v3227_v40, %v3227_v40  ;;  %v7648_v40 = vcombine.low %v3239_v29, %v3239_v29  ;;  %v3261_v14 = vshrl.u32 %v3181_v27, 16 }
 0x4a3   : > { %v3249_v27 = vshrl.u32 %v10375_v62, 16 }
 0x4a4   : > { %v10430_v28 = vpop.permute.xlu1 %1851  ;;  %v10432_v61 = vpop.permute.xlu0 %1839 }
 0x4a6   : > { %3314 = vrot.lane.b32.xlu1 %v7654_v24, %s8011_s26  ;;  %2976 = vrot.lane.b32.xlu0 %v7635_v8, %s8004_s17  ;;  %v2931_v24 = vshrl.u32 %v10391_v53, 16  ;;  %v2863_v8 = vcombine.high %v10337_v10, %v12423_v25  ;;  %v2919_v53 = vshrl.u32 %v10358_v16, 16  ;;  %v3263_v10 = vpack.i.b16 %v3262_v22, %v3261_v14 }
 0x4a7   : > { %v4237_v22 = vshrl.u32 %v9854_v17, 16 }
 0x4a8   : > { %v10441_v23 = vpop.permute.xlu1 %1855  ;;  %v10443_v35 = vpop.permute.xlu0 %1843  ;;  %v2933_v45 = vpack.i.b16 %v2932_v31, %v2931_v24  ;;  %v2942_v5 = vpack.i.b16 %v2897_v1, %v2863_v8  ;;  %v2921_v4 = vpack.i.b16 %v2920_v12, %v2919_v53  ;;  %v3250_v31 = vshrl.u32 %v10368_v38, 16 }
 0x4a9   : > { %v2943_v15 = vshrl.u32 %v2863_v8, 16  ;;  %v4236_v38 = vshrl.u32 %v9868_v36, 16  ;;  %v4118_v12 = vcombine.high %v9868_v36, %v12423_v25 }
 0x4aa   : > { %2992 = vrot.lane.b32.xlu1 %v7639_v3, %s8012_s29  ;;  %3274 = vrot.lane.b32.xlu0 %v7644_v48, %s8005_s18  ;;  %v7637_v30 = vcombine.low %v2933_v45, %v2933_v45  ;;  %v7640_v51 = vcombine.low %v2942_v5, %v2942_v5  ;;  %v2944_v3 = vshrl.u32 %v2897_v1, 16  ;;  %v7655_v48 = vcombine.low %v3263_v10, %v3263_v10 }
 0x4ab   : > { %v7634_v47 = vcombine.low %v2921_v4, %v2921_v4  ;;  %v3251_v45 = vpack.i.b16 %v3250_v31, %v3249_v27  ;;  %v4152_v5 = vcombine.high %v9854_v17, %v12423_v25  ;;  %v7702_v10 = vcombine.low %v10119_v58, %v10119_v58  ;;  %v12557_v31 = vld [vmem:[#allocation64_spill] sm:$0xff] }
 0x4ac   : > { %v10452_v34 = vpop.permute.xlu1 %1831  ;;  %v10454_v2 = vpop.permute.xlu0 %2141  ;;  %v2945_v24 = vpack.i.b16 %v2944_v3, %v2943_v15  ;;  %v12556_v3 = vld [vmem:[#allocation68_spill] sm:$0xff]  ;;  %v4242_v17 = vshrl.u32 %v4118_v12, 16  ;;  %v7703_v58 = vcombine.low %v10158_v59, %v10158_v59 }
 0x4ad   : > { %v4243_v4 = vshrl.u32 %v4152_v5, 16  ;;  %v1775_v15 = vpack.i.b16 %v12557_v31, %v12556_v3  ;;  %v12565_v59 = vld [vmem:[#allocation72_spill] sm:$0xff]  ;;  %v12569_v3 = vld [vmem:[#allocation11_spill] sm:$0xff] }
 0x4ae   : > { %3290 = vrot.lane.b32.xlu1 %v7648_v40, %s8010_s25  ;;  %2956 = vrot.lane.b32.xlu0 %v7630_v49, %s8005_s18  ;;  %v7641_v62 = vcombine.low %v2945_v24, %v2945_v24  ;;  %v7651_v40 = vcombine.low %v3251_v45, %v3251_v45  ;;  %v4238_v49 = vpack.i.b16 %v4237_v22, %v4236_v38  ;;  %v12558_v24 = vld [vmem:[#allocation27_spill] sm:$0xff]  ;;  %v12560_v22 = vld [vmem:[#allocation62_spill] sm:$0xff] }
 0x4af   : > { %v1879_v25 = vsel %vm572_vm8, %v1775_v15, %v10410_v63  ;;  %v12559_v45 = vld [vmem:[#allocation63_spill] sm:$0xff]  ;;  %v12562_v63 = vld [vmem:[#allocation10_spill] sm:$0xff] }
 0x4b0   : > { %v10460_v41 = vpop.permute.xlu1 %1871  ;;  %v10462_v44 = vpop.permute.xlu0 %2145  ;;  %v12561_v38 = vpack.i.b16 %v12559_v45, %v12560_v22 }
 0x4b2   : > { %2984 = vrot.lane.b32.xlu1 %v7637_v30, %s8005_s18  ;;  %2996 = vrot.lane.b32.xlu0 %v7640_v51, %s8011_s26  ;;  %v7696_v30 = vcombine.low %v4238_v49, %v4238_v49  ;;  %v4241_v51 = vpack.i.b16 %v4152_v5, %v4118_v12  ;;  %v12563_v49 = vld [vmem:[#allocation75_spill] sm:$0xff] }
 0x4b3   : > { %v12564_v5 = vpack.i.b16 %v12562_v63, %v12563_v49 }
 0x4b4   : > { %v10468_v16 = vpop.permute.xlu1 %1847  ;;  %v10470_v29 = vpop.permute.xlu0 %2161 }
 0x4b5   : > { %v2686_v12 = vsel %vm572_vm8, %v12564_v5, %v10305_v46  ;;  %v1881_v46 = vsel %vm576_vm10, %v1879_v25, %v10399_v37  ;;  %v12571_v25 = vld [vmem:[#allocation21_spill] sm:$0xff] }
 0x4b6   : > { %3318 = vrot.lane.b32.xlu1 %v7655_v48, %s8010_s25  ;;  %2972 = vrot.lane.b32.xlu0 %v7634_v47, %s8010_s25  ;;  %v7697_v48 = vcombine.low %v4241_v51, %v4241_v51  ;;  %v4244_v47 = vpack.i.b16 %v4243_v4, %v4242_v17  ;;  %v12568_v4 = vld [vmem:[#allocation12_spill] sm:$0xff] }
 0x4b7   : > { %v12570_v31 = vpack.i.b16 %v12568_v4, %v12569_v3 }
 0x4b8   : > { %v10476_v1 = vpop.permute.xlu1 %2173  ;;  %v10478_v8 = vpop.permute.xlu0 %1867 }
 0x4b9   : > { %v2701_v15 = vsel %vm572_vm8, %v12570_v31, %v10261_v9  ;;  %v2688_v9 = vsel %vm576_vm10, %v2686_v12, %v10179_v60  ;;  %v12573_v60 = vld [vmem:[#allocation18_spill] sm:$0xff] }
 0x4ba   : > { %3000 = vrot.lane.b32.xlu1 %v7641_v62, %s8010_s25  ;;  %3302 = vrot.lane.b32.xlu0 %v7651_v40, %s8005_s18  ;;  %v1541_v62 = vsel %vm572_vm8, %v12561_v38, %v12558_v24  ;;  %v2703_v17 = vsel %vm576_vm10, %v2701_v15, %v10278_v7  ;;  %v7698_v24 = vcombine.low %v4244_v47, %v4244_v47  ;;  %v12572_v47 = vld [vmem:[#allocation74_spill] sm:$0xff] }
 0x4bb   : > { %v1543_v40 = vsel %vm576_vm10, %v1541_v62, %v9835_v52  ;;  %v2705_v37 = vsel %vm579_vm11, %v2703_v17, %v10384_v43  ;;  %v2093_v22 = vpack.i.b16 %v12572_v47, %v12571_v25  ;;  %v12574_v43 = vld [vmem:[#allocation20_spill] sm:$0xff]  ;;  %v12575_v62 = vld [vmem:[#allocation73_spill] sm:$0xff]  ;;  %v12583_v25 = vld [vmem:[#allocation31_spill] sm:$0xff] }
 0x4bc   : > { %v10486_v14 = vpop.permute.xlu1 %2185  ;;  %v2170_v53 = vpop.permute.xlu0 %2169  ;;  %v1545_v52 = vsel %vm579_vm11, %v1543_v40, %v9955_v56  ;;  %v7704_v56 = vcombine.low %v10164_v13, %v10164_v13  ;;  %v2707_v38 = vsel %vm1546_vm9, %v2705_v37, %v10211_v54  ;;  %v12576_v40 = vld [vmem:[#allocation70_spill] sm:$0xff]  ;;  %v12582_v37 = vld [vmem:[#allocation32_spill] sm:$0xff] }
 0x4bd   : > { %v1799_v63 = vpack.i.b16 %v12576_v40, %v12575_v62  ;;  %v2197_v49 = vsel %vm572_vm8, %v2093_v22, %v10454_v2  ;;  %v12584_v22 = vld [vmem:[#allocation61_spill] sm:$0xff] }
 0x4be   : > { %4287 = vrot.lane.b32.xlu1 %v7696_v30, %s8012_s29  ;;  %4311 = vrot.lane.b32.xlu0 %v7702_v10, %s8013_s30  ;;  %v12566_v30 = vld [vmem:[#allocation71_spill] sm:$0xff]  ;;  %v2199_v54 = vsel %vm576_vm10, %v2197_v49, %v10462_v44  ;;  %v12586_v62 = vld [vmem:[#allocation41_spill] sm:$0xff] }
 0x4bf   : > { %v12567_v10 = vpack.i.b16 %v12565_v59, %v12566_v30  ;;  %v1894_v44 = vsel %vm572_vm8, %v1799_v63, %v10430_v28 }
 0x4c0   : > { %v10496_v36 = vpop.permute.xlu1 %2165  ;;  %v2150_v27 = vpop.permute.xlu0 %2149 }
 0x4c1   : > { %v1560_v51 = vsel %vm572_vm8, %v12567_v10, %v9889_v50  ;;  %v2201_v10 = vsel %vm579_vm11, %v2199_v54, %v2150_v27  ;;  %v1896_v27 = vsel %vm576_vm10, %v1894_v44, %v10441_v23 }
 0x4c2   : > { %4291 = vrot.lane.b32.xlu1 %v7697_v48, %s8011_s26  ;;  %4315 = vrot.lane.b32.xlu0 %v7703_v58, %s8012_s29  ;;  %v1883_v48 = vsel %vm579_vm11, %v1881_v46, %v10452_v34  ;;  %v1562_v45 = vsel %vm576_vm10, %v1560_v51, %v9914_v19  ;;  %v2690_v34 = vsel %vm579_vm11, %v2688_v9, %v10362_v42  ;;  %v4396_v42 = vld [vmem:[%s12274_s5] sm:$0xf]  ;;  %v12579_v46 = vld [vmem:[#allocation33_spill] sm:$0xff] }
 0x4c3   : > { %v1564_v7 = vsel %vm579_vm11, %v1562_v45, %v10025_v33  ;;  %v1548_v19 = vsel %vm1546_vm9, %v1545_v52, %v9837_v0  ;;  %v1885_v13 = vsel %vm1546_vm9, %v1883_v48, %v10382_v6  ;;  %v2117_v33 = vpack.i.b16 %v12574_v43, %v12573_v60  ;;  %v12580_v48 = vld [vmem:[#allocation57_spill] sm:$0xff] }
 0x4c4   : > { %v10532_v58 = vpop.permute.xlu1 %4283  ;;  %v2190_v50 = vpop.permute.xlu0 %2189  ;;  %v7705_v6 = vcombine.low %v10185_v39, %v10185_v39  ;;  %v1566_v12 = vsel %vm1546_vm9, %v1564_v7, %v9862_v57  ;;  %v2692_v59 = vsel %vm1546_vm9, %v2690_v34, %v10213_v55  ;;  %v1887_v2 = vsel %vm1549_vm14, %v1885_v13, %v10432_v61  ;;  %v12577_v39 = vld [vmem:[#allocation23_spill] sm:$0xff] }
 0x4c5   : > { %v2212_v30 = vsel %vm572_vm8, %v2117_v33, %v2170_v53  ;;  %v1551_v57 = vsel %vm1549_vm14, %v1548_v19, %v12577_v39  ;;  %v2709_v55 = vsel %vm1549_vm14, %v2707_v38, %v10303_v21  ;;  %v12578_v53 = vld [vmem:[#allocation22_spill] sm:$0xff]  ;;  %v2694_v61 = vsel %vm1549_vm14, %v2692_v59, %v10331_v20  ;;  %v12585_v33 = vld [vmem:[#allocation15_spill] sm:$0xff] }
 0x4c6   : > { %4295 = vrot.lane.b32.xlu1 %v7698_v24, %s8010_s25  ;;  %4319 = vrot.lane.b32.xlu0 %v7704_v56, %s8011_s26  ;;  %v1568_v51 = vsel %vm1549_vm14, %v1566_v12, %v12578_v53  ;;  %v2214_v4 = vsel %vm576_vm10, %v2212_v30, %v10476_v1  ;;  %v1889_v21 = vsel %vm1552_vm1, %v1887_v2, %v10443_v35 }
 0x4c7   : > { %v2203_v28 = vsel %vm1546_vm9, %v2201_v10, %v10401_v32  ;;  %v2711_v20 = vsel %vm1552_vm1, %v2709_v55, %v12579_v46  ;;  %v1891_v23 = vsel %vm1555_vm2, %v1889_v21, %v10468_v16  ;;  %v1570_v24 = vsel %vm1552_vm1, %v1568_v51, %v12580_v48  ;;  %v12589_v46 = vld [vmem:[#allocation66_spill] sm:$0xff] }
 0x4c8   : > { %v1876_v0 = vpop.permute.xlu1 %1875  ;;  %v10565_v5 = vpop.permute.xlu0 %3965  ;;  %v2205_v56 = vsel %vm1549_vm14, %v2203_v28, %v10422_v11  ;;  %v4357_v7 = vrot.slane %v1891_v23, 4  ;;  %v2713_v11 = vsel %vm1555_vm2, %v2711_v20, %v12583_v25 }
 0x4c9   : > { %v2207_v19 = vsel %vm1552_vm1, %v2205_v56, %v10470_v29  ;;  %v4362_v38 = vrot.slane %v2713_v11, 4 }
 0x4ca   : > { %4323 = vrot.lane.b32.xlu0 %v7705_v6, %s8010_s25  ;;  %4399 = vperm.xlu1 %7984, %v4396_v42   ;;  %v2209_v29 = vsel %vm1555_vm2, %v2207_v19, %v10496_v36  ;;  %v12597_v19 = vld [vmem:[#allocation45_spill] sm:$0xff] }
 0x4cc   : > { %v2178_v52 = vpop.permute.xlu1 %2177  ;;  %v1860_v3 = vpop.permute.xlu0 %1859 }
 0x4cd   : > { %v2216_v31 = vsel %vm579_vm11, %v2214_v4, %v2178_v52  ;;  %v1898_v15 = vsel %vm579_vm11, %v1896_v27, %v1860_v3 }
 0x4ce   : > { %v2218_v1 = vsel %vm1546_vm9, %v2216_v31, %v10408_v26  ;;  %v1900_v17 = vsel %vm1546_vm9, %v1898_v15, %v10424_v18  ;;  %v12581_v18 = vld [vmem:[#allocation25_spill] sm:$0xff]  ;;  %v12587_v31 = vld [vmem:[#allocation44_spill] sm:$0xff] }
 0x4cf   : > { %v1902_v35 = vsel %vm1549_vm14, %v1900_v17, %v10478_v8  ;;  %v2220_v32 = vsel %vm1549_vm14, %v2218_v1, %v10486_v14  ;;  %v1554_v8 = vsel %vm1552_vm1, %v1551_v57, %v12581_v18  ;;  %v2696_v14 = vsel %vm1552_vm1, %v2694_v61, %v12582_v37  ;;  %v12588_v15 = vld [vmem:[#allocation69_spill] sm:$0xff] }
 0x4d0   : > { %v1904_v16 = vsel %vm1552_vm1, %v1902_v35, %v10460_v41  ;;  %v2194_v45 = vpop.permute.xlu1 %2193  ;;  %v2222_v26 = vsel %vm1552_vm1, %v2220_v32, %v2190_v50  ;;  %v10619_v9 = vpop.permute.xlu0 %3953  ;;  %v1572_v50 = vsel %vm1555_vm2, %v1570_v24, %v12584_v22  ;;  %v1557_v42 = vsel %vm1555_vm2, %v1554_v8, %v12585_v33  ;;  %v12591_v35 = vld [vmem:[#allocation14_spill] sm:$0xff]  ;;  %v12592_v32 = vld [vmem:[#allocation24_spill] sm:$0xff]  ;;  %v12593_v24 = vld [vmem:[#allocation51_spill] sm:$0xff] }
 0x4d1   : > { %v1906_v34 = vsel %vm1555_vm2, %v1904_v16, %v1876_v0  ;;  %v2224_v41 = vsel %vm1555_vm2, %v2222_v26, %v2194_v45  ;;  %v2698_v40 = vsel %vm1555_vm2, %v2696_v14, %v12586_v62  ;;  %v4372_v63 = vsel %vm351_vm0, %v1557_v42, %v4357_v7  ;;  %v12594_v8 = vld [vmem:[#allocation35_spill] sm:$0xff] }
 0x4d2   : > { %v4358_v47 = vrot.slane %v1906_v34, 4  ;;  %v4381_v49 = vsel %vm351_vm0, %v2224_v41, %v4362_v38  ;;  %v4361_v0 = vrot.slane %v2698_v40, 4  ;;  %v12590_v20 = vpack.i.b16 %v12588_v15, %v12589_v46  ;;  %v12595_v34 = vld [vmem:[#allocation58_spill] sm:$0xff]  ;;  %v12596_v22 = vld [vmem:[#allocation43_spill] sm:$0xff] }
 0x4d3   : > { %v3929_v48 = vpack.i.b16 %v12592_v32, %v12591_v35  ;;  %v12600_v15 = vld [vmem:[#allocation46_spill] sm:$0xff] }
 0x4d4   : > { %v10633_v13 = vpop.permute.xlu1 %3957  ;;  %v10635_v60 = vpop.permute.xlu0 %4271  ;;  %v4375_v43 = vsel %vm351_vm0, %v1572_v50, %v4358_v47  ;;  %v4378_v59 = vsel %vm351_vm0, %v2209_v29, %v4361_v0  ;;  %v3706_v23 = vsel %vm572_vm8, %v12590_v20, %v12587_v31  ;;  %v12599_v31 = vld [vmem:[#allocation52_spill] sm:$0xff] }
 0x4d5   : > { %4410 = vmatprep.subr.bf16.mxu0 %v4375_v43  ;;  %v3708_v56 = vsel %vm576_vm10, %v3706_v23, %v12593_v24  ;;  %v12602_v24 = vld [vmem:[#allocation56_spill] sm:$0xff] }
 0x4d6   : > { %4411 = vmatpush1.bf16.msra.mxu0 %v4372_v63  ;;  %v3710_v37 = vsel %vm579_vm11, %v3708_v56, %v12594_v8  ;;  %v12598_v63 = vld [vmem:[#allocation42_spill] sm:$0xff]  ;;  %v12603_v56 = vld [vmem:[#allocation37_spill] sm:$0xff] }
 0x4d7   : > { %4412 = vmatprep.subr.bf16.mxu0 %v4381_v49  ;;  %v3712_v25 = vsel %vm1546_vm9, %v3710_v37, %v12595_v34 }
 0x4d8   : > { %v3994_v6 = vpop.permute.xlu1 %3993  ;;  %v10646_v12 = vpop.permute.xlu0 %4275  ;;  %v3714_v50 = vsel %vm1549_vm14, %v3712_v25, %v12596_v22 }
 0x4d9   : > { %v3716_v43 = vsel %vm1552_vm1, %v3714_v50, %v12597_v19  ;;  %v12608_v50 = vld [vmem:[#allocation36_spill] sm:$0xff] }
 0x4da   : > { %4413 = vmatpush1.bf16.msra.mxu0 %v4378_v59  ;;  %v3718_v49 = vsel %vm1555_vm2, %v3716_v43, %v12598_v63 }
 0x4dc   : > { %v10649_v54 = vpop.permute.xlu1 %3969  ;;  %v3279_v30 = vpop.permute.xlu0 %3278 }
 0x4e0   : > { %v10651_v2 = vpop.permute.xlu1 %3973  ;;  %v3982_v10 = vpop.permute.xlu0 %3981 }
 0x4e1   : > { %v4024_v16 = vsel %vm572_vm8, %v3929_v48, %v3982_v10 }
 0x4e4   : > { %v3986_v39 = vpop.permute.xlu1 %3985  ;;  %v2961_v57 = vpop.permute.xlu0 %2960 }
 0x4e5   : > { %v4026_v45 = vsel %vm576_vm10, %v4024_v16, %v3986_v39  ;;  %v12604_v16 = vpack.i.b16 %v12602_v24, %v12603_v56  ;;  %v12617_v56 = vld [vmem:[#allocation54_spill] sm:$0xff] }
 0x4e8   : > { %v3998_v55 = vpop.permute.xlu1 %3997  ;;  %v10653_v44 = vpop.permute.xlu0 %3961 }
 0x4ec   : > { %v10655_v36 = vpop.permute.xlu1 %3977  ;;  %v4002_v53 = vpop.permute.xlu0 %4001 }
 0x4f0   : > { %v10657_v51 = vpop.permute.xlu1 %4299  ;;  %v3267_v61 = vpop.permute.xlu0 %3266 }
 0x4f4   : > { %v10659_v27 = vpop.permute.xlu1 %4303  ;;  %v2949_v52 = vpop.permute.xlu0 %2948 }
 0x4f8   : > { %v10661_v4 = vpop.permute.xlu1 %4279  ;;  %v2953_v3 = vpop.permute.xlu0 %2952 }
 0x4fc   : > { %v3271_v21 = vpop.permute.xlu1 %3270  ;;  %v3283_v28 = vpop.permute.xlu0 %3282 }
 0x500   : > { %v10668_v1 = vpop.permute.xlu1 %3306  ;;  %v3287_v17 = vpop.permute.xlu0 %3286 }
 0x504   : > { %v2989_v26 = vpop.permute.xlu1 %2988  ;;  %v3990_v18 = vpop.permute.xlu0 %3989 }
 0x505   : > { %v4028_v14 = vsel %vm579_vm11, %v4026_v45, %v3990_v18  ;;  %v3004_v45 = vsel %vm572_vm8, %v12604_v16, %v2949_v52 }
 0x506   : > { %v4030_v7 = vsel %vm1546_vm9, %v4028_v14, %v3994_v6  ;;  %v3006_v8 = vsel %vm576_vm10, %v3004_v45, %v2953_v3  ;;  %v12607_v3 = vld [vmem:[#allocation49_spill] sm:$0xff] }
 0x507   : > { %v4032_v41 = vsel %vm1549_vm14, %v4030_v7, %v3998_v55  ;;  %v12606_v7 = vld [vmem:[#allocation28_spill] sm:$0xff]  ;;  %v12609_v19 = vpack.i.b16 %v12607_v3, %v12608_v50 }
 0x508   : > { %v2965_v11 = vpop.permute.xlu1 %2964  ;;  %v2969_v47 = vpop.permute.xlu0 %2968  ;;  %v4034_v42 = vsel %vm1552_vm1, %v4032_v41, %v4002_v53  ;;  %v12601_v53 = vpack.i.b16 %v12599_v31, %v12600_v15  ;;  %v12611_v31 = vld [vmem:[#allocation34_spill] sm:$0xff] }
 0x50a   : > { %v3322_v46 = vsel %vm572_vm8, %v12601_v53, %v3267_v61 }
 0x50b   : > { %v3324_v20 = vsel %vm576_vm10, %v3322_v46, %v3271_v21  ;;  %v12605_v21 = vld [vmem:[#allocation29_spill] sm:$0xff] }
 0x50c   : > { %v3299_v33 = vpop.permute.xlu1 %3298  ;;  %v4006_v38 = vpop.permute.xlu0 %4005  ;;  %v3905_v34 = vpack.i.b16 %v12606_v7, %v12605_v21  ;;  %v12613_v46 = vld [vmem:[#allocation53_spill] sm:$0xff]  ;;  %v12619_v7 = vld [vmem:[#allocation59_spill] sm:$0xff] }
 0x50d   : > { %v4036_v62 = vsel %vm1555_vm2, %v4034_v42, %v4006_v38 }
 0x50e   : > { %v4370_v40 = vrot.slane %v4036_v62, 4  ;;  %v4009_v41 = vsel %vm572_vm8, %v3905_v34, %v10619_v9 }
 0x510   : > { %v2981_v29 = vpop.permute.xlu1 %2980  ;;  %v10691_v0 = vpop.permute.xlu0 %4307  ;;  %v10694_v6 = vsel %vm351_vm0, %v3718_v49, %v4370_v40  ;;  %v12610_v49 = vld [vmem:[#allocation47_spill] sm:$0xff] }
 0x514   : > { %v3311_v59 = vpop.permute.xlu1 %3310  ;;  %v3295_v10 = vpop.permute.xlu0 %3294 }
 0x518   : > { %v3315_v39 = vpop.permute.xlu1 %3314  ;;  %v2977_v55 = vpop.permute.xlu0 %2976 }
 0x519   : > { %v3019_v43 = vsel %vm572_vm8, %v12609_v19, %v2977_v55  ;;  %v12612_v55 = vpack.i.b16 %v12610_v49, %v12611_v31 }
 0x51a   : > { %v3021_v9 = vsel %vm576_vm10, %v3019_v43, %v2981_v29  ;;  %v12614_v29 = vld [vmem:[#allocation67_spill] sm:$0xff] }
 0x51b   : > { %v3337_v15 = vsel %vm572_vm8, %v12612_v55, %v3295_v10 }
 0x51c   : > { %v2993_v23 = vpop.permute.xlu1 %2992  ;;  %v3275_v35 = vpop.permute.xlu0 %3274  ;;  %v3339_v10 = vsel %vm576_vm10, %v3337_v15, %v3299_v33 }
 0x51d   : > { %v3326_v32 = vsel %vm579_vm11, %v3324_v20, %v3275_v35  ;;  %v12615_v20 = vld [vmem:[#allocation65_spill] sm:$0xff] }
 0x51e   : > { %v3328_v48 = vsel %vm1546_vm9, %v3326_v32, %v3279_v30  ;;  %v12616_v35 = vpack.i.b16 %v12614_v29, %v12615_v20 }
 0x51f   : > { %v3330_v18 = vsel %vm1549_vm14, %v3328_v48, %v3283_v28  ;;  %v4011_v28 = vsel %vm576_vm10, %v4009_v41, %v10633_v13 }
 0x520   : > { %v3291_v37 = vpop.permute.xlu1 %3290  ;;  %v2957_v14 = vpop.permute.xlu0 %2956  ;;  %v3332_v25 = vsel %vm1552_vm1, %v3330_v18, %v3287_v17  ;;  %v12618_v18 = vld [vmem:[#allocation60_spill] sm:$0xff] }
 0x521   : > { %v3008_v61 = vsel %vm579_vm11, %v3006_v8, %v2957_v14  ;;  %v3334_v42 = vsel %vm1555_vm2, %v3332_v25, %v3291_v37  ;;  %v12620_v25 = vld [vmem:[#allocation26_spill] sm:$0xff] }
 0x522   : > { %v3010_v30 = vsel %vm1546_vm9, %v3008_v61, %v2961_v57  ;;  %v4013_v57 = vsel %vm579_vm11, %v4011_v28, %v10653_v44  ;;  %v4365_v17 = vrot.slane %v3334_v42, 4  ;;  %v12622_v28 = vld [vmem:[#allocation50_spill] sm:$0xff] }
 0x523   : > { %v3012_v38 = vsel %vm1549_vm14, %v3010_v30, %v2965_v11  ;;  %v4015_v13 = vsel %vm1546_vm9, %v4013_v57, %v10565_v5  ;;  %v12621_v30 = vld [vmem:[#allocation17_spill] sm:$0xff]  ;;  %v12624_v57 = vld [vmem:[#allocation55_spill] sm:$0xff] }
 0x524   : > { %v2985_v22 = vpop.permute.xlu1 %2984  ;;  %v2997_v52 = vpop.permute.xlu0 %2996  ;;  %v3014_v40 = vsel %vm1552_vm1, %v3012_v38, %v2969_v47  ;;  %v3691_v47 = vsel %vm572_vm8, %v12616_v35, %v12613_v46  ;;  %v4017_v5 = vsel %vm1549_vm14, %v4015_v13, %v10649_v54  ;;  %v4223_v41 = vpack.i.b16 %v12621_v30, %v12620_v25  ;;  %v4395_v46 = vld [vmem:[%s12273_s4] sm:$0x3] }
 0x525   : > { %v3023_v11 = vsel %vm579_vm11, %v3021_v9, %v2985_v22  ;;  %v3693_v16 = vsel %vm576_vm10, %v3691_v47, %v12617_v56  ;;  %v4019_v54 = vsel %vm1552_vm1, %v4017_v5, %v10651_v2 }
 0x526   : > { %v3025_v32 = vsel %vm1546_vm9, %v3023_v11, %v2989_v26  ;;  %v3695_v8 = vsel %vm579_vm11, %v3693_v16, %v12618_v18 }
 0x527   : > { %v3027_v26 = vsel %vm1549_vm14, %v3025_v32, %v2993_v23  ;;  %v3697_v34 = vsel %vm1546_vm9, %v3695_v8, %v12619_v7 }
 0x528   : > { %v3319_v62 = vpop.permute.xlu1 %3318  ;;  %v2973_v63 = vpop.permute.xlu0 %2972  ;;  %v3029_v2 = vsel %vm1552_vm1, %v3027_v26, %v2997_v52  ;;  %v3699_v3 = vsel %vm1549_vm14, %v3697_v34, %v12622_v28  ;;  %v12623_v52 = vld [vmem:[#allocation48_spill] sm:$0xff] }
 0x529   : > { %v3016_v53 = vsel %vm1555_vm2, %v3014_v40, %v2973_v63 }
 0x52a   : > { %v4384_v44 = vsel %vm351_vm0, %v3016_v53, %v4365_v17  ;;  %v12625_v17 = vld [vmem:[#allocation16_spill] sm:$0xff] }
 0x52b   : > { %v12626_v9 = vpack.i.b16 %v12624_v57, %v12625_v17 }
 0x52c   : > { %v3001_v48 = vpop.permute.xlu1 %3000  ;;  %v3303_v24 = vpop.permute.xlu0 %3302 }
 0x52d   : > { %v3341_v45 = vsel %vm579_vm11, %v3339_v10, %v3303_v24 }
 0x52e   : > { %v3343_v37 = vsel %vm1546_vm9, %v3341_v45, %v10668_v1  ;;  %v4021_v1 = vsel %vm1555_vm2, %v4019_v54, %v10655_v36 }
 0x52f   : > { %v3345_v14 = vsel %vm1549_vm14, %v3343_v37, %v3311_v59  ;;  %v4327_v59 = vsel %vm572_vm8, %v4223_v41, %v10635_v60  ;;  %v4369_v38 = vrot.slane %v4021_v1, 4  ;;  %v3701_v60 = vsel %vm1552_vm1, %v3699_v3, %v12623_v52  ;;  %v12628_v1 = vld [vmem:[#allocation4_spill] sm:$0xff] }
 0x530   : > { %v3347_v33 = vsel %vm1552_vm1, %v3345_v14, %v3315_v39  ;;  %v4288_v61 = vpop.permute.xlu1 %4287  ;;  %v4312_v21 = vpop.permute.xlu0 %4311  ;;  %v3031_v39 = vsel %vm1555_vm2, %v3029_v2, %v3001_v48  ;;  %v4329_v50 = vsel %vm576_vm10, %v4327_v59, %v10646_v12  ;;  %v12627_v12 = vld [vmem:[#allocation30_spill] sm:$0xff] }
 0x531   : > { %v3349_v22 = vsel %vm1555_vm2, %v3347_v33, %v3319_v62  ;;  %v4331_v36 = vsel %vm579_vm11, %v4329_v50, %v10661_v4  ;;  %v4342_v62 = vsel %vm572_vm8, %v12626_v9, %v10657_v51  ;;  %v3703_v40 = vsel %vm1555_vm2, %v3701_v60, %v12627_v12  ;;  %v12629_v12 = vld [vmem:[#allocation5_spill] sm:$0xff] }
 0x532   : > { %v4366_v23 = vrot.slane %v3349_v22, 4  ;;  %v4344_v63 = vsel %vm576_vm10, %v4342_v62, %v10659_v27  ;;  %v4333_v4 = vsel %vm1546_vm9, %v4331_v36, %v10532_v58  ;;  %v4390_v51 = vsel %vm351_vm0, %v3703_v40, %v4369_v38 }
 0x533   : > { %v4346_v31 = vsel %vm579_vm11, %v4344_v63, %v10691_v0  ;;  %v4335_v55 = vsel %vm1549_vm14, %v4333_v4, %v4288_v61 }
 0x534   : > { %v4292_v19 = vpop.permute.xlu1 %4291  ;;  %v4316_v43 = vpop.permute.xlu0 %4315  ;;  %v4387_v42 = vsel %vm351_vm0, %v3031_v39, %v4366_v23 }
 0x535   : > { %4414 = vmatprep.subr.bf16.mxu0 %v4387_v42  ;;  %v4337_v15 = vsel %vm1552_vm1, %v4335_v55, %v4292_v19 }
 0x536   : > { %4415 = vmatpush1.bf16.msra.mxu0 %v4384_v44 }
 0x537   : > { %4416 = vmatprep.subr.bf16.mxu0 %v10694_v6  ;;  %v4348_v6 = vsel %vm1546_vm9, %v4346_v31, %v4312_v21 }
 0x538   : > { %v4296_v13 = vpop.permute.xlu1 %4295  ;;  %v4320_v49 = vpop.permute.xlu0 %4319  ;;  %v4350_v11 = vsel %vm1549_vm14, %v4348_v6, %v4316_v43 }
 0x539   : > { %v4339_v27 = vsel %vm1555_vm2, %v4337_v15, %v4296_v13  ;;  %v4352_v58 = vsel %vm1552_vm1, %v4350_v11, %v4320_v49 }
 0x53a   : > { %4417 = vmatpush1.bf16.msra.mxu0 %v4390_v51  ;;  %v4406_v0 = vsel %vm351_vm0, %v4339_v27, 0 }
 0x53c   : > { %v4324_v53 = vpop.permute.xlu0 %4323 }
 0x53d   : > { %v4354_v44 = vsel %vm1555_vm2, %v4352_v58, %v4324_v53 }
 0x53e   : > { %7706 = vmatprep.subr.msk.bf16.mxu0 %vm351_vm0, %v4354_v44 }
 0x53f   : > { %4419 = vmatpush1.bf16.msra.mxu0 %v4406_v0 }
 0x542   : > { %7707 = vmatmul.mubr.msk.bf16.vlgmr.msra.gmra.mrb[4].mxu0 %vm4402_vm4, %v4395_v46 }
 0x549   : > { %v4400_v29 = vpop.permute.xlu1 %4399 }
 0x615   : > { %v4444_v20 = vpop.f32.mrb[4].mxu0 }
 0x616   : > { %v4445_v35 = vadd.f32 %v4444_v20, %v4400_v29  ;;  %v4446_v47 = vpop.f32.mrb[5].mxu0 }
 0x617   : > { %v4448_v5 = vpop.f32.mrb[6].mxu0  ;;  %v4447_v24 = vadd.f32 %v4446_v47, %v4400_v29 }
 0x618   : > { %v4451_v32 = vmax.f32 %v4445_v35, 0.0  ;;  %v4449_v48 = vpop.f32.mrb[7].mxu0 }
 0x619   : > { %v4452_v56 = vmax.f32 %v4447_v24, 0.0 }
 0x61a   : > { %v4465_v10 = vpack.c.bf16 %v4451_v32, %v4451_v32 }
 0x61b   : > { %v4466_v16 = vpack.c.bf16 %v4452_v56, %v4452_v56 }
 0x61c   : > { %4471 = vrot.lane.b32.xlu1 %v4465_v10, %s8011_s26  ;;  %4468 = vrot.lane.b32.xlu0 %v4465_v10, %s8010_s25 }
 0x620   : > { %4477 = vrot.lane.b32.xlu1 %v4465_v10, %s8013_s30  ;;  %4474 = vrot.lane.b32.xlu0 %v4465_v10, %s8012_s29 }
 0x624   : > { %4483 = vrot.lane.b32.xlu1 %v4465_v10, %s8006_s19  ;;  %4480 = vrot.lane.b32.xlu0 %v4465_v10, %s8005_s18 }
 0x628   : > { %4490 = vrot.lane.b32.xlu1 %v4466_v16, %s8010_s25  ;;  %4486 = vrot.lane.b32.xlu0 %v4465_v10, %s8004_s17 }
 0x62c   : > { %4496 = vrot.lane.b32.xlu1 %v4466_v16, %s8012_s29  ;;  %4493 = vrot.lane.b32.xlu0 %v4466_v16, %s8011_s26 }
 0x630   : > { %4502 = vrot.lane.b32.xlu1 %v4466_v16, %s8005_s18  ;;  %4499 = vrot.lane.b32.xlu0 %v4466_v16, %s8013_s30 }
 0x634   : > { %4508 = vrot.lane.b32.xlu1 %v4466_v16, %s8004_s17  ;;  %4505 = vrot.lane.b32.xlu0 %v4466_v16, %s8006_s19 }
 0x68e   : > { %v4472_v45 = vpop.permute.xlu1 %4471  ;;  %v4469_v18 = vpop.permute.xlu0 %4468 }
 0x692   : > { %v4478_v8 = vpop.permute.xlu1 %4477  ;;  %v4475_v37 = vpop.permute.xlu0 %4474 }
 0x693   : > { %v4511_v25 = vcombine.low %v4465_v10, %v4478_v8 }
 0x695   : > { %v4518_v28 = vrot.slane %v4511_v25, %v12628_v1 }
 0x696   : > { %v4484_v54 = vpop.permute.xlu1 %4483  ;;  %v4481_v26 = vpop.permute.xlu0 %4480 }
 0x697   : > { %v4519_v7 = vcombine.low %v4472_v45, %v4484_v54  ;;  %v4561_v30 = vcombine.low %v4469_v18, %v4481_v26 }
 0x699   : > { %v4526_v2 = vrot.slane %v4519_v7, %v12628_v1  ;;  %v4568_v3 = vrot.slane %v4561_v30, %v12628_v1 }
 0x69a   : > { %v4491_v14 = vpop.permute.xlu1 %4490  ;;  %v4487_v33 = vpop.permute.xlu0 %4486 }
 0x69b   : > { %v4569_v34 = vcombine.low %v4475_v37, %v4487_v33  ;;  %v4543_v38 = vcombine.low %v4518_v28, %v4526_v2 }
 0x69d   : > { %v4576_v23 = vrot.slane %v4569_v34, %v12628_v1  ;;  %v4550_v40 = vrot.slane %v4543_v38, %v12629_v12 }
 0x69e   : > { %v4497_v61 = vpop.permute.xlu1 %4496  ;;  %v4494_v21 = vpop.permute.xlu0 %4493 }
 0x69f   : > { %v4593_v36 = vcombine.low %v4568_v3, %v4576_v23 }
 0x6a1   : > { %v4600_v63 = vrot.slane %v4593_v36, %v12629_v12 }
 0x6a2   : > { %v4503_v41 = vpop.permute.xlu1 %4502  ;;  %v4500_v22 = vpop.permute.xlu0 %4499 }
 0x6a3   : > { %v4577_v59 = vcombine.low %v4491_v14, %v4503_v41  ;;  %v4527_v39 = vcombine.low %v4466_v16, %v4500_v22 }
 0x6a5   : > { %v4584_v52 = vrot.slane %v4577_v59, %v12628_v1  ;;  %v4534_v60 = vrot.slane %v4527_v39, %v12628_v1 }
 0x6a6   : > { %v4509_v50 = vpop.permute.xlu1 %4508  ;;  %v4506_v19 = vpop.permute.xlu0 %4505 }
 0x6a7   : > { %v4585_v43 = vcombine.low %v4497_v61, %v4509_v50  ;;  %v4535_v42 = vcombine.low %v4494_v21, %v4506_v19 }
 0x6a9   : > { %v4592_v57 = vrot.slane %v4585_v43, %v12628_v1  ;;  %v4542_v17 = vrot.slane %v4535_v42, %v12628_v1 }
 0x6ab   : > { %v4601_v9 = vcombine.low %v4584_v52, %v4592_v57  ;;  %v4551_v62 = vcombine.low %v4534_v60, %v4542_v17 }
 0x6ad   : > { %v4608_v4 = vrot.slane %v4601_v9, %v12629_v12  ;;  %v4558_v13 = vrot.slane %v4551_v62, %v12629_v12 }
 0x6af   : > { %v4609_v49 = vcombine.low %v4600_v63, %v4608_v4  ;;  %v4610_v31 = vcombine.high %v4600_v63, %v4608_v4  ;;  %v4559_v55 = vcombine.low %v4550_v40, %v4558_v13  ;;  %v4560_v51 = vcombine.high %v4550_v40, %v4558_v13 }
 0x6b1   : > { %v4615_v6 = vshrl.u32 %v4609_v49, 16  ;;  %v4613_v15 = vpack.i.b16 %v4609_v49, %v4559_v55  ;;  %v4614_v11 = vshrl.u32 %v4559_v55, 16  ;;  %v4621_v27 = vshrl.u32 %v4610_v31, 16 }
 0x6b2   : > { %v4619_v58 = vpack.i.b16 %v4610_v31, %v4560_v51  ;;  %v4620_v53 = vshrl.u32 %v4560_v51, 16  ;;  %v4743_v51 = vld [vmem:[#allocation3] sm:$0xf] }
 0x6b3   : > { %v4616_v44 = vpack.i.b16 %v4615_v6, %v4614_v11  ;;  %v7708_v0 = vcombine.low %v4613_v15, %v4613_v15  ;;  %v7709_v46 = vcombine.high %v4613_v15, %v4613_v15 }
 0x6b4   : > { %v7712_v29 = vcombine.low %v4619_v58, %v4619_v58  ;;  %v7713_v20 = vcombine.high %v4619_v58, %v4619_v58  ;;  %v4622_v5 = vpack.i.b16 %v4621_v27, %v4620_v53  ;;  %v4757_v58 = vld [vmem:[#allocation3 + $0x18] sm:$0xf] }
 0x6b5   : > { %v4640_v35 = vshrl.u32 %v7708_v0, 16  ;;  %v4648_v47 = vshrl.u32 %v7709_v46, 16  ;;  %v4643_v32 = vshll.u32 %v7708_v0, 16  ;;  %v4651_v16 = vshll.u32 %v7709_v46, 16  ;;  %v4747_v46 = vld [vmem:[#allocation3 + $0x8] sm:$0x1] }
 0x6b6   : > { %v4674_v48 = vshrl.u32 %v7712_v29, 16  ;;  %v4682_v10 = vshrl.u32 %v7713_v20, 16  ;;  %v7711_v45 = vcombine.high %v4616_v44, %v4616_v44  ;;  %v4685_v14 = vshll.u32 %v7713_v20, 16 }
 0x6b7   : > { %v4642_v24 = vrot.slane %v4640_v35, 7  ;;  %v4650_v56 = vrot.slane %v4648_v47, 7  ;;  %v4677_v33 = vshll.u32 %v7712_v29, 16  ;;  %v7715_v21 = vcombine.high %v4622_v5, %v4622_v5  ;;  %v4754_v29 = vld [vmem:[#allocation3 + $0x14] sm:$0x1] }
 0x6b8   : > { %v4676_v18 = vrot.slane %v4674_v48, 7  ;;  %v4684_v8 = vrot.slane %v4682_v10, 7  ;;  %v4665_v61 = vshrl.u32 %v7711_v45, 16  ;;  %v7710_v41 = vcombine.low %v4616_v44, %v4616_v44  ;;  %v4761_v10 = vld [vmem:[#allocation3 + $0x20] sm:$0x1] }
 0x6b9   : > { %v4645_v37 = vor.u32 %v4643_v32, %v4642_v24  ;;  %v4646_v54 = vrot.slane %v4642_v24, 4  ;;  %v4653_v26 = vor.u32 %v4651_v16, %v4650_v56  ;;  %v4699_v23 = vshrl.u32 %v7715_v21, 16  ;;  %v4768_v24 = vld [vmem:[#allocation3 + $0x2c] sm:$0x1] }
 0x6ba   : > { %v4680_v25 = vrot.slane %v4676_v18, 4  ;;  %v4687_v30 = vor.u32 %v4685_v14, %v4684_v8  ;;  %v4679_v22 = vor.u32 %v4677_v33, %v4676_v18  ;;  %v4667_v2 = vrot.slane %v4665_v61, 7  ;;  %v4764_v61 = vld [vmem:[#allocation3 + $0x24] sm:$0xf] }
 0x6bb   : > { %4707 = vrot.lane.b32.xlu0 %v4645_v37, %s8007_s20  ;;  %v4654_v34 = vsel %vm8212_vm6, %v4646_v54, %v4653_v26  ;;  %v4657_v39 = vshrl.u32 %v7710_v41, 16  ;;  %v7714_v28 = vcombine.low %v4622_v5, %v4622_v5  ;;  %v4655_v3 = vrot.slane %v4650_v56, 4  ;;  %v4750_v37 = vld [vmem:[#allocation3 + $0xc] sm:$0xf] }
 0x6bc   : > { %4709 = vrot.lane.b32.xlu1 %v4654_v34, %s8007_s20  ;;  %v4688_v59 = vsel %vm8212_vm6, %v4680_v25, %v4687_v30  ;;  %v4672_v50 = vrot.slane %v4667_v2, 4  ;;  %v4701_v19 = vrot.slane %v4699_v23, 7  ;;  %v4689_v38 = vrot.slane %v4684_v8, 4 }
 0x6bd   : > { %v4659_v43 = vrot.slane %v4657_v39, 7  ;;  %v4691_v42 = vshrl.u32 %v7714_v28, 16  ;;  %v4668_v36 = vshll.u32 %v7711_v45, 16  ;;  %v4660_v60 = vshll.u32 %v7710_v41, 16 }
 0x6be   : > { %v4706_v52 = vrot.slane %v4701_v19, 4  ;;  %v4702_v40 = vshll.u32 %v7715_v21, 16  ;;  %v4694_v4 = vshll.u32 %v7714_v28, 16 }
 0x6bf   : > { %4719 = vrot.lane.b32.xlu0 %v4679_v22, %s8007_s20  ;;  %v4663_v57 = vrot.slane %v4659_v43, 4  ;;  %v4670_v17 = vor.u32 %v4668_v36, %v4667_v2  ;;  %v4693_v9 = vrot.slane %v4691_v42, 7  ;;  %v4662_v62 = vor.u32 %v4660_v60, %v4659_v43 }
 0x6c0   : > { %4721 = vrot.lane.b32.xlu1 %v4688_v59, %s8007_s20  ;;  %v4704_v49 = vor.u32 %v4702_v40, %v4701_v19 }
 0x6c1   : > { %v4671_v63 = vsel %vm8212_vm6, %v4663_v57, %v4670_v17  ;;  %v4697_v13 = vrot.slane %v4693_v9, 4  ;;  %v4696_v31 = vor.u32 %v4694_v4, %v4693_v9 }
 0x6c3   : > { %4711 = vrot.lane.b32.xlu0 %v4655_v3, %s8007_s20  ;;  %v4705_v55 = vsel %vm8212_vm6, %v4697_v13, %v4704_v49  ;;  %vm7371_vm6 = vcmask 1041408  }
 0x6c4   : > { %4717 = vrot.lane.b32.xlu1 %v4672_v50, %s8007_s20 }
 0x6c7   : > { %4723 = vrot.lane.b32.xlu0 %v4689_v38, %s8007_s20 }
 0x6c8   : > { %4729 = vrot.lane.b32.xlu1 %v4706_v52, %s8007_s20 }
 0x6cb   : > { %4713 = vrot.lane.b32.xlu0 %v4662_v62, %s8007_s20 }
 0x6cc   : > { %4715 = vrot.lane.b32.xlu1 %v4671_v63, %s8007_s20 }
 0x6cf   : > { %4725 = vrot.lane.b32.xlu0 %v4696_v31, %s8007_s20 }
 0x6d0   : > { %4727 = vrot.lane.b32.xlu1 %v4705_v55, %s8007_s20 }
 0x72d   : > { %v4708_v6 = vpop.permute.xlu0 %4707 }
 0x72e   : > { %v4744_v11 = vsel %vm8261_vm13, %v4708_v6, %v4743_v51  ;;  %v4710_v27 = vpop.permute.xlu1 %4709 }
 0x72f   : > { %4745 = vst [vmem:[#allocation3] sm:$0xf] %v4744_v11  ;;  %4746 = vst.msk [vmem:[#allocation3 + $0x4] sm:$0xf] %vm1092_vm12, %v4710_v27 }
 0x731   : > { %v4720_v53 = vpop.permute.xlu0 %4719 }
 0x732   : > { %v4758_v44 = vsel %vm8261_vm13, %v4720_v53, %v4757_v58  ;;  %v4722_v0 = vpop.permute.xlu1 %4721 }
 0x733   : > { %4759 = vst [vmem:[#allocation3 + $0x18] sm:$0xf] %v4758_v44  ;;  %4760 = vst.msk [vmem:[#allocation3 + $0x1c] sm:$0xf] %vm1092_vm12, %v4722_v0 }
 0x735   : > { %v4712_v20 = vpop.permute.xlu0 %4711 }
 0x736   : > { %v4748_v47 = vsel %vm8291_vm15, %v4712_v20, %v4747_v46  ;;  %v4718_v5 = vpop.permute.xlu1 %4717  ;;  %v10859_v32 = vld [vmem:[#allocation3 + $0x4] sm:$0xf]  ;;  %v10875_v33 = vld [vmem:[#allocation3] sm:$0xf] }
 0x737   : > { %4749 = vst [vmem:[#allocation3 + $0x8] sm:$0x1] %v4748_v47  ;;  %v4755_v48 = vsel %vm8291_vm15, %v4718_v5, %v4754_v29  ;;  %5049 = vrot.lane.b32.xlu0 %v10859_v32, %s8008_s23  ;;  %v6495_v21 = vld [vmem:[#allocation3] sm:$0xe]  ;;  %v6509_v34 = vrot.slane %v10859_v32, 5 }
 0x738   : > { %4756 = vst [vmem:[#allocation3 + $0x14] sm:$0x1] %v4755_v48  ;;  %v7800_v22 = vrot.slane %v6495_v21, 9 }
 0x739   : > { %v4724_v56 = vpop.permute.xlu0 %4723  ;;  %v6511_v59 = vrot.slane %v6509_v34, 4 }
 0x73a   : > { %v4762_v16 = vsel %vm8291_vm15, %v4724_v56, %v4761_v10  ;;  %v4730_v45 = vpop.permute.xlu1 %4729  ;;  %v10867_v18 = vld [vmem:[#allocation3 + $0x1c] sm:$0xf]  ;;  %v10883_v41 = vld [vmem:[#allocation3 + $0x18] sm:$0xf]  ;;  %v10897_v19 = vsel %vm8454_vm7, %v7800_v22, %v6509_v34 }
 0x73b   : > { %4763 = vst [vmem:[#allocation3 + $0x20] sm:$0x1] %v4762_v16  ;;  %v4769_v8 = vsel %vm8291_vm15, %v4730_v45, %v4768_v24  ;;  %5057 = vrot.lane.b32.xlu0 %v10867_v18, %s8008_s23  ;;  %v6497_v23 = vld [vmem:[#allocation3 + $0x18] sm:$0xe]  ;;  %v6523_v36 = vrot.slane %v10867_v18, 5  ;;  %v6538_v4 = vshrl.u32 %v10897_v19, 16 }
 0x73c   : > { %4770 = vst [vmem:[#allocation3 + $0x2c] sm:$0x1] %v4769_v8  ;;  %v7802_v38 = vrot.slane %v6497_v23, 9 }
 0x73d   : > { %v4714_v54 = vpop.permute.xlu0 %4713  ;;  %v6525_v51 = vrot.slane %v6523_v36, 4 }
 0x73e   : > { %v4751_v26 = vsel %vm8261_vm13, %v4714_v54, %v4750_v37  ;;  %v4716_v14 = vpop.permute.xlu1 %4715  ;;  %v10885_v2 = vld [vmem:[#allocation3 + $0x8] sm:$0x1]  ;;  %v6524_v55 = vsel %vm8454_vm7, %v7802_v38, %v6523_v36 }
 0x73f   : > { %4752 = vst [vmem:[#allocation3 + $0xc] sm:$0xf] %v4751_v26  ;;  %4753 = vst.msk [vmem:[#allocation3 + $0x10] sm:$0xf] %vm1092_vm12, %v4716_v14  ;;  %5047 = vrot.lane.b32.xlu0 %v10875_v33, %s8008_s23  ;;  %v6512_v39 = vrot.slane %v10885_v2, 5  ;;  %v6544_v35 = vshrl.u32 %v6524_v55, 16 }
 0x740   : > { %v10891_v28 = vld [vmem:[#allocation3 + $0x14] sm:$0x1] }
 0x741   : > { %v4726_v7 = vpop.permute.xlu0 %4725  ;;  %v6519_v57 = vrot.slane %v10891_v28, 5  ;;  %v10910_v17 = vsel %vm8454_vm7, %v6511_v59, %v6512_v39 }
 0x742   : > { %v4765_v25 = vsel %vm8261_vm13, %v4726_v7, %v4764_v61  ;;  %v4728_v30 = vpop.permute.xlu1 %4727  ;;  %v10899_v42 = vld [vmem:[#allocation3 + $0x20] sm:$0x1]  ;;  %v6550_v27 = vshrl.u32 %v10910_v17, 16 }
 0x743   : > { %4766 = vst [vmem:[#allocation3 + $0x24] sm:$0xf] %v4765_v25  ;;  %4767 = vst.msk [vmem:[#allocation3 + $0x28] sm:$0xf] %vm1092_vm12, %v4728_v30  ;;  %5055 = vrot.lane.b32.xlu0 %v10883_v41, %s8008_s23  ;;  %v6526_v62 = vrot.slane %v10899_v42, 5  ;;  %vm7380_vm12 = vcmask 1045504  }
 0x744   : > { %v10923_v31 = vld [vmem:[#allocation3 + $0x2c] sm:$0x1] }
 0x745   : > { %v10939_v44 = vsel %vm8454_vm7, %v6525_v51, %v6526_v62  ;;  %v6533_v29 = vrot.slane %v10923_v31, 5 }
 0x746   : > { %v10893_v3 = vld [vmem:[#allocation3 + $0x10] sm:$0xf]  ;;  %v6496_v43 = vld [vmem:[#allocation3 + $0xc] sm:$0xe]  ;;  %v6556_v16 = vshrl.u32 %v10939_v44, 16 }
 0x747   : > { %5053 = vrot.lane.b32.xlu1 %v10893_v3, %s8008_s23  ;;  %5325 = vrot.lane.b32.xlu0 %v10859_v32, %s8009_s24  ;;  %v7801_v52 = vrot.slane %v6496_v43, 9  ;;  %v6516_v60 = vrot.slane %v10893_v3, 5  ;;  %v10943_v20 = vld [vmem:[#allocation3 + $0xc] sm:$0xf]  ;;  %v4793_v7 = vpack.i.b16 %v10893_v3, %v10859_v32 }
 0x748   : > { %v4781_v37 = vpack.i.b16 %v10943_v20, %v10875_v33 }
 0x749   : > { %v10914_v9 = vsel %vm8454_vm7, %v7801_v52, %v6516_v60  ;;  %v6518_v40 = vrot.slane %v6516_v60, 4  ;;  %v10991_v25 = vrot.slane %v4793_v7, %v12628_v1  ;;  %v5659_v7 = vshll.u32 %v10899_v42, 16 }
 0x74a   : > { %v10917_v63 = vld [vmem:[#allocation3 + $0x28] sm:$0xf]  ;;  %v6537_v13 = vpack.i.b16 %v10914_v9, %v10897_v19  ;;  %v6539_v49 = vshrl.u32 %v10914_v9, 16  ;;  %v6498_v6 = vld [vmem:[#allocation3 + $0x24] sm:$0xe]  ;;  %v10972_v14 = vrot.slane %v4781_v37, %v12628_v1 }
 0x74b   : > { %5061 = vrot.lane.b32.xlu1 %v10917_v63, %s8008_s23  ;;  %5333 = vrot.lane.b32.xlu0 %v10867_v18, %s8009_s24  ;;  %v6530_v15 = vrot.slane %v10917_v63, 5  ;;  %v10934_v11 = vsel %vm8454_vm7, %v6518_v40, %v6519_v57  ;;  %v7803_v53 = vrot.slane %v6498_v6, 9  ;;  %v10953_v5 = vld [vmem:[#allocation3 + $0x24] sm:$0xf]  ;;  %v4799_v34 = vpack.i.b16 %v10917_v63, %v10867_v18 }
 0x74c   : > { %v6540_v58 = vpack.i.b16 %v6539_v49, %v6538_v4  ;;  %v6551_v0 = vshrl.u32 %v10934_v11, 16  ;;  %v4787_v54 = vpack.i.b16 %v10953_v5, %v10883_v41  ;;  %v6549_v39 = vpack.i.b16 %v10934_v11, %v10910_v17 }
 0x74d   : > { %v6532_v46 = vrot.slane %v6530_v15, 4  ;;  %v10947_v47 = vsel %vm8454_vm7, %v7803_v53, %v6530_v15  ;;  %v10994_v30 = vrot.slane %v4799_v34, %v12628_v1  ;;  %v5610_v40 = vshll.u32 %v10859_v32, 16 }
 0x74e   : > { %v6543_v48 = vpack.i.b16 %v10947_v47, %v6524_v55  ;;  %v6545_v10 = vshrl.u32 %v10947_v47, 16  ;;  %v6552_v24 = vpack.i.b16 %v6551_v0, %v6550_v27  ;;  %v10975_v61 = vrot.slane %v4787_v54, %v12628_v1 }
 0x74f   : > { %5323 = vrot.lane.b32.xlu0 %v10875_v33, %s8009_s24  ;;  %5051 = vrot.lane.b32.xlu1 %v10943_v20, %s8008_s23  ;;  %v10959_v56 = vsel %vm8454_vm7, %v6532_v46, %v6533_v29  ;;  %v4888_v23 = vcombine.high %v10991_v25, %v10994_v30  ;;  %v4887_v38 = vcombine.low %v10991_v25, %v10994_v30  ;;  %v4794_v49 = vshrl.u32 %v10859_v32, 16 }
 0x750   : > { %v6557_v45 = vshrl.u32 %v10959_v56, 16  ;;  %v6546_v8 = vpack.i.b16 %v6545_v10, %v6544_v35  ;;  %v4819_v21 = vcombine.low %v10972_v14, %v10975_v61  ;;  %v6555_v22 = vpack.i.b16 %v10959_v56, %v10939_v44 }
 0x751   : > { %v4820_v59 = vcombine.high %v10972_v14, %v10975_v61  ;;  %v11009_v50 = vrot.slane %v6543_v48, %v12628_v1  ;;  %v11023_v36 = vrot.slane %v6549_v39, %v12628_v1  ;;  %v5612_v15 = vrot.slane %v5610_v40, 5 }
 0x752   : > { %v6558_v26 = vpack.i.b16 %v6557_v45, %v6556_v16  ;;  %v11012_v43 = vrot.slane %v6555_v22, %v12628_v1  ;;  %v11030_v57 = vrot.slane %v6546_v8, %v12628_v1  ;;  %v5615_v53 = vrot.slane %v4794_v49, 4 }
 0x753   : > { %5331 = vrot.lane.b32.xlu0 %v10883_v41, %s8009_s24  ;;  %5059 = vrot.lane.b32.xlu1 %v10953_v5, %s8008_s23  ;;  %v4800_v0 = vshrl.u32 %v10867_v18, 16  ;;  %v5650_v46 = vshll.u32 %v10867_v18, 16  ;;  %v4782_v35 = vshrl.u32 %v10875_v33, 16  ;;  %v5605_v48 = vshll.u32 %v10875_v33, 16 }
 0x754   : > { %v6643_v60 = vcombine.low %v11023_v36, %v11012_v43  ;;  %v11040_v4 = vrot.slane %v6558_v26, %v12628_v1  ;;  %v5619_v10 = vshll.u32 %v10885_v2, 16  ;;  %v5616_v16 = vor.u32 %v5615_v53, %v5612_v15 }
 0x755   : > { %v5652_v45 = vrot.slane %v5650_v46, 5  ;;  %v5655_v8 = vrot.slane %v4800_v0, 4  ;;  %v5604_v37 = vrot.slane %v4782_v35, 4  ;;  %v5607_v54 = vrot.slane %v5605_v48, 5 }
 0x756   : > { %v5645_v26 = vshll.u32 %v10883_v41, 16  ;;  %v5621_v2 = vrot.slane %v5619_v10, 5  ;;  %v4795_v40 = vshrl.u32 %v10893_v3, 16  ;;  %v5630_v53 = vshll.u32 %v10893_v3, 16 }
 0x757   : > { %6795 = vrot.lane.b32.xlu0 %v10897_v19, %s8008_s23  ;;  %5329 = vrot.lane.b32.xlu1 %v10893_v3, %s8009_s24  ;;  %v5608_v22 = vor.u32 %v5607_v54, %v5604_v37  ;;  %v5661_v48 = vrot.slane %v5659_v7, 5  ;;  %v4801_v3 = vshrl.u32 %v10917_v63, 16  ;;  %v5670_v54 = vshll.u32 %v10917_v63, 16 }
 0x758   : > { %v5647_v39 = vrot.slane %v5645_v26, 5  ;;  %v11203_v61 = vrot.slane %v4887_v38, %v12629_v12 }
 0x75a   : > { %12635 = vst [vmem:[#allocation40_spill] sm:$0xff] %v11203_v61 }
 0x75b   : > { %6803 = vrot.lane.b32.xlu0 %v6524_v55, %s8008_s23  ;;  %5337 = vrot.lane.b32.xlu1 %v10917_v63, %s8009_s24  ;;  %v5639_v63 = vshll.u32 %v10891_v28, 16  ;;  %v5679_v28 = vshll.u32 %v10923_v31, 16 }
 0x75f   : > { %7071 = vrot.lane.b32.xlu0 %v10897_v19, %s8009_s24  ;;  %5327 = vrot.lane.b32.xlu1 %v10943_v20, %s8009_s24  ;;  %v11020_v19 = vrot.slane %v6537_v13, %v12628_v1  ;;  %v11043_v13 = vrot.slane %v6540_v58, %v12628_v1  ;;  %v6644_v58 = vcombine.high %v11023_v36, %v11012_v43 }
 0x761   : > { %v6576_v52 = vcombine.high %v11020_v19, %v11009_v50  ;;  %v6575_v62 = vcombine.low %v11020_v19, %v11009_v50  ;;  %v6609_v51 = vcombine.low %v11043_v13, %v11030_v57  ;;  %v6610_v6 = vcombine.high %v11043_v13, %v11030_v57 }
 0x763   : > { %7079 = vrot.lane.b32.xlu0 %v6524_v55, %s8009_s24  ;;  %5335 = vrot.lane.b32.xlu1 %v10953_v5, %s8009_s24  ;;  %v11047_v55 = vrot.slane %v6552_v24, %v12628_v1  ;;  %v4788_v24 = vshrl.u32 %v10883_v41, 16 }
 0x765   : > { %v6677_v27 = vcombine.low %v11047_v55, %v11040_v4  ;;  %v6678_v29 = vcombine.high %v11047_v55, %v11040_v4  ;;  %v5644_v34 = vrot.slane %v4788_v24, 4 }
 0x767   : > { %6797 = vrot.lane.b32.xlu0 %v10910_v17, %s8008_s23  ;;  %6799 = vrot.lane.b32.xlu1 %v10914_v9, %s8008_s23  ;;  %v5648_v10 = vor.u32 %v5647_v39, %v5644_v34  ;;  %v5675_v34 = vrot.slane %v4801_v3, 4  ;;  %v4789_v39 = vshrl.u32 %v10953_v5, 16  ;;  %v6685_v57 = vrot.slane %v6677_v27, %v12629_v12 }
 0x769   : > { %v4790_v18 = vpack.i.b16 %v4789_v39, %v4788_v24 }
 0x76b   : > { %6805 = vrot.lane.b32.xlu0 %v10939_v44, %s8008_s23  ;;  %6807 = vrot.lane.b32.xlu1 %v10947_v47, %s8008_s23 }
 0x76f   : > { %7075 = vrot.lane.b32.xlu0 %v10914_v9, %s8009_s24  ;;  %7073 = vrot.lane.b32.xlu1 %v10910_v17, %s8009_s24  ;;  %v5617_v17 = vrot.slane %v5616_v16, 4  ;;  %v5656_v9 = vor.u32 %v5655_v8, %v5652_v45  ;;  %v5632_v16 = vrot.slane %v5630_v53, 5  ;;  %v5635_v8 = vrot.slane %v4795_v40, 4 }
 0x771   : > { %v11091_v42 = vsel %vm8374_vm3, %v5617_v17, %v5621_v2  ;;  %v5649_v2 = vrot.slane %v5648_v10, 4  ;;  %v5636_v7 = vor.u32 %v5635_v8, %v5632_v16  ;;  %v4783_v17 = vshrl.u32 %v10943_v20, 16 }
 0x772   : > { %v5664_v10 = vrot.slane %v4789_v39, 4  ;;  %v7875_v39 = vcombine.high %v11203_v61, %v11203_v61 }
 0x773   : > { %7083 = vrot.lane.b32.xlu0 %v10947_v47, %s8009_s24  ;;  %7081 = vrot.lane.b32.xlu1 %v10939_v44, %s8009_s24  ;;  %v5657_v44 = vrot.slane %v5656_v9, 4  ;;  %v5609_v47 = vrot.slane %v5608_v22, 4  ;;  %v5672_v9 = vrot.slane %v5670_v54, 5  ;;  %v5625_v22 = vshll.u32 %v10943_v20, 16 }
 0x774   : > { %v5637_v53 = vrot.slane %v5636_v7, 4  ;;  %v5665_v20 = vshll.u32 %v10953_v5, 16  ;;  %v5681_v5 = vrot.slane %v5679_v28, 5 }
 0x775   : > { %v11099_v37 = vsel %vm8374_vm3, %v5657_v44, %v5661_v48  ;;  %v11109_v26 = vsel %vm8374_vm3, %v5609_v47, %v5612_v15  ;;  %v11121_v15 = vsel %vm8374_vm3, %v5649_v2, %v5652_v45  ;;  %v5676_v48 = vor.u32 %v5675_v34, %v5672_v9 }
 0x776   : > { %v5624_v44 = vrot.slane %v4783_v17, 4  ;;  %v5627_v47 = vrot.slane %v5625_v22, 5  ;;  %v5667_v2 = vrot.slane %v5665_v20, 5 }
 0x777   : > { %6221 = vrot.lane.b32.xlu0 %v11091_v42, %s8009_s24  ;;  %6801 = vrot.lane.b32.xlu1 %v10934_v11, %s8008_s23  ;;  %v5677_v8 = vrot.slane %v5676_v48, 4  ;;  %v4796_v48 = vpack.i.b16 %v4795_v40, %v4794_v49  ;;  %v4784_v49 = vpack.i.b16 %v4783_v17, %v4782_v35  ;;  %v4834_v40 = vrot.slane %v4820_v59, %v12629_v12 }
 0x778   : > { %v5628_v54 = vor.u32 %v5627_v47, %v5624_v44  ;;  %v5668_v7 = vor.u32 %v5667_v2, %v5664_v10 }
 0x779   : > { %v4912_v41 = vrot.slane %v4796_v48, %v12628_v1  ;;  %v4844_v33 = vrot.slane %v4784_v49, %v12628_v1  ;;  %v7719_v35 = vcombine.low %v4834_v40, %v4834_v40  ;;  %v7873_v10 = vcombine.high %v4834_v40, %v4834_v40 }
 0x77a   : > { %v5629_v31 = vrot.slane %v5628_v54, 4  ;;  %v5669_v22 = vrot.slane %v5668_v7, 4  ;;  %v11237_v48 = vrot.slane %v6643_v60, %v12629_v12  ;;  %v6617_v60 = vrot.slane %v6609_v51, %v12629_v12 }
 0x77b   : > { %6229 = vrot.lane.b32.xlu0 %v11099_v37, %s8009_s24  ;;  %6809 = vrot.lane.b32.xlu1 %v10959_v56, %s8008_s23 }
 0x77c   : > { %v11147_v34 = vsel %vm8374_vm3, %v5629_v31, %v5632_v16  ;;  %v11163_v16 = vsel %vm8374_vm3, %v5669_v22, %v5672_v9  ;;  %v6590_v31 = vrot.slane %v6576_v52, %v12629_v12  ;;  %12636 = vst [vmem:[#allocation39_spill] sm:$0xff] %v11237_v48  ;;  %v7920_v19 = vcombine.high %v6617_v60, %v6617_v60 }
 0x77d   : > { %v5691_v49 = vpack.i.b16 %v11163_v16, %v11121_v15  ;;  %v5685_v51 = vpack.i.b16 %v11147_v34, %v11109_v26  ;;  %v7804_v27 = vcombine.low %v6617_v60, %v6617_v60 }
 0x77f   : > { %6219 = vrot.lane.b32.xlu0 %v11109_v26, %s8009_s24  ;;  %7077 = vrot.lane.b32.xlu1 %v10934_v11, %s8009_s24  ;;  %v5641_v11 = vrot.slane %v5639_v63, 5  ;;  %v4802_v63 = vpack.i.b16 %v4801_v3, %v4800_v0  ;;  %v4902_v0 = vrot.slane %v4888_v23, %v12629_v12  ;;  %v4852_v23 = vrot.slane %v4790_v18, %v12628_v1 }
 0x781   : > { %v11131_v45 = vsel %vm8374_vm3, %v5637_v53, %v5641_v11  ;;  %v11159_v53 = vrot.slane %v4819_v21, %v12629_v12  ;;  %v4920_v32 = vrot.slane %v4802_v63, %v12628_v1  ;;  %v7726_v24 = vcombine.low %v4902_v0, %v4902_v0 }
 0x782   : > { %v4853_v17 = vcombine.low %v4844_v33, %v4852_v23  ;;  %v4854_v9 = vcombine.high %v4844_v33, %v4852_v23  ;;  %v7877_v30 = vcombine.high %v4902_v0, %v4902_v0  ;;  %v7807_v63 = vcombine.low %v6590_v31, %v6590_v31 }
 0x783   : > { %6227 = vrot.lane.b32.xlu0 %v11121_v15, %s8009_s24  ;;  %7085 = vrot.lane.b32.xlu1 %v10959_v56, %s8009_s24  ;;  %v11139_v56 = vsel %vm8374_vm3, %v5677_v8, %v5681_v5  ;;  %v7871_v21 = vcombine.high %v11159_v53, %v11159_v53  ;;  %v4921_v46 = vcombine.low %v4912_v41, %v4920_v32 }
 0x784   : > { %v4861_v59 = vrot.slane %v4853_v17, %v12629_v12  ;;  %v4868_v47 = vrot.slane %v4854_v9, %v12629_v12  ;;  %v4922_v20 = vcombine.high %v4912_v41, %v4920_v32  ;;  %v7923_v0 = vcombine.high %v11237_v48, %v11237_v48 }
 0x785   : > { %v4929_v3 = vrot.slane %v4921_v46, %v12629_v12  ;;  %v11251_v32 = vrot.slane %v6575_v62, %v12629_v12  ;;  %v6624_v62 = vrot.slane %v6610_v6, %v12629_v12  ;;  %v5703_v40 = vpack.i.b16 %v11139_v56, %v11099_v37 }
 0x786   : > { %v7716_v44 = vcombine.low %v4861_v59, %v4861_v59  ;;  %v7720_v38 = vcombine.low %v4868_v47, %v4868_v47  ;;  %v4936_v11 = vrot.slane %v4922_v20, %v12629_v12  ;;  %v7874_v5 = vcombine.high %v4868_v47, %v4868_v47 }
 0x787   : > { %5945 = vrot.lane.b32.xlu0 %v11091_v42, %s8008_s23  ;;  %6225 = vrot.lane.b32.xlu1 %v11131_v45, %s8009_s24  ;;  %v7723_v14 = vcombine.low %v4929_v3, %v4929_v3  ;;  %v7876_v2 = vcombine.high %v4929_v3, %v4929_v3  ;;  %v7872_v22 = vcombine.high %v4861_v59, %v4861_v59  ;;  %v5705_v55 = vshrl.u32 %v11139_v56, 16 }
 0x788   : > { %v7878_v8 = vcombine.high %v4936_v11, %v4936_v11  ;;  %12637 = vst [vmem:[#allocation19_spill] sm:$0xff] %v11251_v32  ;;  %v7919_v50 = vcombine.high %v11251_v32, %v11251_v32  ;;  %v5722_v46 = vrot.slane %v5691_v49, %v12628_v1  ;;  %v7808_v3 = vcombine.low %v6624_v62, %v6624_v62 }
 0x789   : > { %v5697_v13 = vpack.i.b16 %v11131_v45, %v11091_v42  ;;  %v5714_v6 = vrot.slane %v5685_v51, %v12628_v1  ;;  %v5790_v17 = vrot.slane %v5703_v40, %v12628_v1 }
 0x78b   : > { %5953 = vrot.lane.b32.xlu0 %v11099_v37, %s8008_s23  ;;  %6233 = vrot.lane.b32.xlu1 %v11139_v56, %s8009_s24  ;;  %v5723_v47 = vcombine.low %v5714_v6, %v5722_v46  ;;  %v5782_v20 = vrot.slane %v5697_v13, %v12628_v1 }
 0x78d   : > { %v5792_v4 = vcombine.high %v5782_v20, %v5790_v17  ;;  %v5791_v40 = vcombine.low %v5782_v20, %v5790_v17 }
 0x78f   : > { %5943 = vrot.lane.b32.xlu0 %v11109_v26, %s8008_s23  ;;  %6223 = vrot.lane.b32.xlu1 %v11147_v34, %s8009_s24  ;;  %v11365_v17 = vrot.slane %v5791_v40, %v12629_v12 }
 0x793   : > { %5951 = vrot.lane.b32.xlu0 %v11121_v15, %s8008_s23  ;;  %6231 = vrot.lane.b32.xlu1 %v11163_v16, %s8009_s24 }
 0x797   : > { %5949 = vrot.lane.b32.xlu1 %v11131_v45, %s8008_s23  ;;  %4947 = vrot.lane.b32.xlu0 %v7871_v21, %s8006_s19  ;;  %v7727_v21 = vcombine.low %v4936_v11, %v4936_v11 }
 0x79b   : > { %5957 = vrot.lane.b32.xlu1 %v11139_v56, %s8008_s23  ;;  %4992 = vrot.lane.b32.xlu0 %v7726_v24, %s8013_s30  ;;  %v5687_v56 = vshrl.u32 %v11147_v34, 16 }
 0x79f   : > { %5947 = vrot.lane.b32.xlu1 %v11147_v34, %s8008_s23  ;;  %4957 = vrot.lane.b32.xlu0 %v7719_v35, %s8013_s30  ;;  %v7921_v35 = vcombine.high %v6590_v31, %v6590_v31  ;;  %v5724_v31 = vcombine.high %v5714_v6, %v5722_v46 }
 0x7a3   : > { %5955 = vrot.lane.b32.xlu1 %v11163_v16, %s8008_s23  ;;  %4977 = vrot.lane.b32.xlu0 %v7723_v14, %s8004_s17  ;;  %v6658_v14 = vrot.slane %v6644_v58, %v12629_v12 }
 0x7a5   : > { %v7814_v58 = vcombine.low %v6658_v14, %v6658_v14 }
 0x7a7   : > { %4982 = vrot.lane.b32.xlu1 %v7875_v39, %s8006_s19  ;;  %4942 = vrot.lane.b32.xlu0 %v7716_v44, %s8004_s17  ;;  %v7924_v39 = vcombine.high %v6685_v57, %v6685_v57  ;;  %v11304_v44 = vrot.slane %v6678_v29, %v12629_v12  ;;  %v5693_v29 = vshrl.u32 %v11163_v16, 16  ;;  %v5698_v16 = vshrl.u32 %v11091_v42, 16 }
 0x7a9   : > { %v11214_v25 = vpop.permute.xlu0 %5049 }
 0x7ab   : > { %5002 = vrot.lane.b32.xlu1 %v7877_v30, %s8011_s26  ;;  %4962 = vrot.lane.b32.xlu0 %v7720_v38, %s8012_s29  ;;  %v7926_v30 = vcombine.high %v11304_v44, %v11304_v44  ;;  %v11316_v38 = vrot.slane %v5723_v47, %v12629_v12 }
 0x7ad   : > { %v11219_v28 = vpop.permute.xlu0 %5057 }
 0x7af   : > { %4967 = vrot.lane.b32.xlu1 %v7873_v10, %s8011_s26  ;;  %5007 = vrot.lane.b32.xlu0 %v7878_v8, %s8010_s25  ;;  %v7925_v8 = vcombine.high %v6658_v14, %v6658_v14 }
 0x7b1   : > { %v11223_v54 = vpop.permute.xlu0 %5047 }
 0x7b3   : > { %4987 = vrot.lane.b32.xlu1 %v7876_v2, %s8005_s18  ;;  %4972 = vrot.lane.b32.xlu0 %v7874_v5, %s8010_s25  ;;  %v7895_v2 = vcombine.high %v11316_v38, %v11316_v38  ;;  %v5806_v5 = vrot.slane %v5792_v4, %v12629_v12  ;;  %v7815_v4 = vcombine.low %v11304_v44, %v11304_v44 }
 0x7b5   : > { %v11231_v7 = vpop.permute.xlu0 %5055 }
 0x7b7   : > { %4952 = vrot.lane.b32.xlu1 %v7872_v22, %s8005_s18  ;;  %6713 = vrot.lane.b32.xlu0 %v7807_v63, %s8013_s30  ;;  %v5704_v22 = vshrl.u32 %v11099_v37, 16  ;;  %v5692_v63 = vshrl.u32 %v11121_v15, 16  ;;  %v7922_v37 = vcombine.high %v6624_v62, %v6624_v62  ;;  %v7768_v15 = vcombine.low %v5806_v5, %v5806_v5 }
 0x7b9   : > { %v11241_v18 = vpop.permute.xlu1 %5053  ;;  %v11243_v52 = vpop.permute.xlu0 %5325  ;;  %v5706_v60 = vpack.i.b16 %v5705_v55, %v5704_v22  ;;  %v5694_v49 = vpack.i.b16 %v5693_v29, %v5692_v63  ;;  %v7901_v55 = vcombine.high %v5806_v5, %v5806_v5 }
 0x7bb   : > { %4997 = vrot.lane.b32.xlu1 %v7727_v21, %s8012_s29  ;;  %6738 = vrot.lane.b32.xlu0 %v7923_v0, %s8006_s19  ;;  %v5699_v21 = vshrl.u32 %v11131_v45, 16  ;;  %v5686_v0 = vshrl.u32 %v11109_v26, 16  ;;  %v5738_v45 = vrot.slane %v5724_v31, %v12629_v12  ;;  %v11345_v42 = vrot.slane %v5706_v60, %v12628_v1 }
 0x7bc   : > { %v11348_v26 = vrot.slane %v5694_v49, %v12628_v1 }
 0x7bd   : > { %v11261_v41 = vpop.permute.xlu1 %5061  ;;  %v11263_v24 = vpop.permute.xlu0 %5333  ;;  %v5700_v51 = vpack.i.b16 %v5699_v21, %v5698_v16  ;;  %v5688_v34 = vpack.i.b16 %v5687_v56, %v5686_v0  ;;  %v7761_v13 = vcombine.low %v5738_v45, %v5738_v45  ;;  %v7897_v16 = vcombine.high %v5738_v45, %v5738_v45 }
 0x7be   : > { %v5083_v46 = vpack.i.b16 %v11261_v41, %v11219_v28 }
 0x7bf   : > { %6703 = vrot.lane.b32.xlu1 %v7919_v50, %s8006_s19  ;;  %6708 = vrot.lane.b32.xlu0 %v7920_v19, %s8005_s18  ;;  %v5816_v6 = vrot.slane %v5700_v51, %v12628_v1  ;;  %v11358_v14 = vrot.slane %v5688_v34, %v12628_v1 }
 0x7c0   : > { %v11371_v47 = vrot.slane %v5083_v46, %v12628_v1 }
 0x7c1   : > { %v11278_v23 = vpop.permute.xlu1 %5051  ;;  %v11280_v33 = vpop.permute.xlu0 %5323 }
 0x7c3   : > { %6723 = vrot.lane.b32.xlu1 %v7921_v35, %s8011_s26  ;;  %6718 = vrot.lane.b32.xlu0 %v7808_v3, %s8012_s29  ;;  %v7811_v3 = vcombine.low %v6685_v57, %v6685_v57  ;;  %v5757_v57 = vcombine.low %v11358_v14, %v11348_v26 }
 0x7c5   : > { %v11296_v59 = vpop.permute.xlu1 %5059  ;;  %v11298_v9 = vpop.permute.xlu0 %5331  ;;  %v5765_v22 = vrot.slane %v5757_v57, %v12629_v12 }
 0x7c7   : > { %6698 = vrot.lane.b32.xlu1 %v7804_v27, %s8004_s17  ;;  %6743 = vrot.lane.b32.xlu0 %v7924_v39, %s8005_s18  ;;  %v5077_v27 = vpack.i.b16 %v11241_v18, %v11214_v25  ;;  %v5825_v39 = vcombine.low %v5816_v6, %v11345_v42 }
 0x7c9   : > { %v11309_v43 = vpop.permute.xlu1 %5329  ;;  %v11311_v36 = vpop.permute.xlu0 %6795  ;;  %v11382_v29 = vrot.slane %v5077_v27, %v12628_v1  ;;  %v5833_v31 = vrot.slane %v5825_v39, %v12629_v12  ;;  %v5826_v39 = vcombine.high %v5816_v6, %v11345_v42  ;;  %v5085_v42 = vshrl.u32 %v11261_v41, 16 }
 0x7ca   : > { %v5084_v41 = vshrl.u32 %v11219_v28, 16 }
 0x7cb   : > { %6748 = vrot.lane.b32.xlu1 %v7814_v58, %s8013_s30  ;;  %6763 = vrot.lane.b32.xlu0 %v7926_v30, %s8010_s25  ;;  %v5171_v44 = vcombine.low %v11382_v29, %v11371_v47  ;;  %v7765_v49 = vcombine.low %v5833_v31, %v5833_v31  ;;  %v7900_v27 = vcombine.high %v5833_v31, %v5833_v31 }
 0x7cc   : > { %v5840_v6 = vrot.slane %v5826_v39, %v12629_v12 }
 0x7cd   : > { %v11322_v11 = vpop.permute.xlu1 %5337  ;;  %v11324_v10 = vpop.permute.xlu0 %6803  ;;  %v11422_v46 = vrot.slane %v5171_v44, %v12629_v12  ;;  %v5758_v44 = vcombine.high %v11358_v14, %v11348_v26  ;;  %v5078_v26 = vshrl.u32 %v11214_v25, 16  ;;  %v5086_v14 = vpack.i.b16 %v5085_v42, %v5084_v41 }
 0x7ce   : > { %v5359_v20 = vpack.i.b16 %v11322_v11, %v11263_v24 }
 0x7cf   : > { %6758 = vrot.lane.b32.xlu1 %v7925_v8, %s8011_s26  ;;  %5851 = vrot.lane.b32.xlu0 %v7895_v2, %s8006_s19  ;;  %v5353_v8 = vpack.i.b16 %v11309_v43, %v11243_v52  ;;  %v7899_v2 = vcombine.high %v11365_v17, %v11365_v17  ;;  %v11484_v25 = vrot.slane %v5086_v14, %v12628_v1 }
 0x7d0   : > { %v11395_v5 = vrot.slane %v5359_v20, %v12628_v1 }
 0x7d1   : > { %v11337_v50 = vpop.permute.xlu1 %5327  ;;  %v11339_v19 = vpop.permute.xlu0 %7071  ;;  %v11404_v0 = vrot.slane %v5353_v8, %v12628_v1  ;;  %v7883_v8 = vcombine.high %v11422_v46, %v11422_v46 }
 0x7d2   : > { %v5341_v60 = vpack.i.b16 %v11337_v50, %v11280_v33 }
 0x7d3   : > { %6728 = vrot.lane.b32.xlu1 %v7922_v37, %s8010_s25  ;;  %5896 = vrot.lane.b32.xlu0 %v7768_v15, %s8013_s30  ;;  %v7758_v37 = vcombine.low %v5765_v22, %v5765_v22  ;;  %v5071_v15 = vpack.i.b16 %v11296_v59, %v11231_v7  ;;  %v5447_v51 = vcombine.low %v11404_v0, %v11395_v5 }
 0x7d5   : > { %v11352_v62 = vpop.permute.xlu1 %5335  ;;  %v11354_v35 = vpop.permute.xlu0 %7079  ;;  %v11433_v57 = vrot.slane %v5071_v15, %v12628_v1 }
 0x7d6   : > { %v5347_v63 = vpack.i.b16 %v11352_v62, %v11298_v9 }
 0x7d7   : > { %6733 = vrot.lane.b32.xlu1 %v7811_v3, %s8004_s17  ;;  %5861 = vrot.lane.b32.xlu0 %v7761_v13, %s8013_s30  ;;  %v5065_v3 = vpack.i.b16 %v11278_v23, %v11223_v54  ;;  %v11427_v13 = vrot.slane %v5341_v60, %v12628_v1 }
 0x7d8   : > { %v11415_v45 = vrot.slane %v5347_v63, %v12628_v1 }
 0x7d9   : > { %v11375_v58 = vpop.permute.xlu1 %6799  ;;  %v11377_v30 = vpop.permute.xlu0 %6797  ;;  %v11447_v31 = vrot.slane %v5065_v3, %v12628_v1  ;;  %v5772_v3 = vrot.slane %v5758_v44, %v12629_v12 }
 0x7da   : > { %v5379_v20 = vcombine.low %v11427_v13, %v11415_v45 }
 0x7db   : > { %6753 = vrot.lane.b32.xlu1 %v7815_v4, %s8012_s29  ;;  %5906 = vrot.lane.b32.xlu0 %v7901_v55, %s8011_s26  ;;  %v5104_v63 = vcombine.high %v11447_v31, %v11433_v57  ;;  %v7762_v44 = vcombine.low %v5772_v3, %v5772_v3 }
 0x7dc   : > { %v11464_v15 = vrot.slane %v5379_v20, %v12629_v12  ;;  %v7769_v20 = vcombine.low %v5840_v6, %v5840_v6 }
 0x7dd   : > { %v11399_v21 = vpop.permute.xlu1 %6807  ;;  %v11401_v56 = vpop.permute.xlu0 %6805 }
 0x7de   : > { %v7887_v28 = vcombine.high %v11464_v15, %v11464_v15 }
 0x7df   : > { %5886 = vrot.lane.b32.xlu1 %v7899_v2, %s8006_s19  ;;  %5871 = vrot.lane.b32.xlu0 %v7897_v16, %s8011_s26  ;;  %v11444_v2 = vrot.slane %v5447_v51, %v12629_v12  ;;  %v5079_v51 = vshrl.u32 %v11241_v18, 16  ;;  %v5118_v18 = vrot.slane %v5104_v63, %v12629_v12  ;;  %v5072_v63 = vshrl.u32 %v11231_v7, 16 }
 0x7e0   : > { %v5349_v7 = vshrl.u32 %v11352_v62, 16  ;;  %v7898_v62 = vcombine.high %v5772_v3, %v5772_v3  ;;  %v5355_v3 = vshrl.u32 %v11309_v43, 16 }
 0x7e1   : > { %v11417_v34 = vpop.permute.xlu1 %7073  ;;  %v11419_v40 = vpop.permute.xlu0 %7075 }
 0x7e3   : > { %5881 = vrot.lane.b32.xlu1 %v7765_v49, %s8004_s17  ;;  %5846 = vrot.lane.b32.xlu0 %v7758_v37, %s8004_s17  ;;  %v7896_v49 = vcombine.high %v5765_v22, %v5765_v22  ;;  %v7891_v37 = vcombine.high %v11444_v2, %v11444_v2  ;;  %v5172_v22 = vcombine.high %v11382_v29, %v11371_v47  ;;  %v5073_v47 = vshrl.u32 %v11296_v59, 16 }
 0x7e4   : > { %v5066_v59 = vshrl.u32 %v11223_v54, 16  ;;  %v5343_v54 = vshrl.u32 %v11337_v50, 16  ;;  %v7881_v50 = vcombine.high %v5118_v18, %v5118_v18 }
 0x7e5   : > { %v11437_v4 = vpop.permute.xlu1 %7081  ;;  %v11439_v55 = vpop.permute.xlu0 %7083  ;;  %v5074_v14 = vpack.i.b16 %v5073_v47, %v5072_v63  ;;  %v5342_v47 = vshrl.u32 %v11280_v33, 16  ;;  %v5360_v33 = vshrl.u32 %v11263_v24, 16 }
 0x7e7   : > { %5891 = vrot.lane.b32.xlu1 %v7900_v27, %s8005_s18  ;;  %5266 = vrot.lane.b32.xlu0 %v7883_v8, %s8006_s19  ;;  %v5080_v8 = vpack.i.b16 %v5079_v51, %v5078_v26  ;;  %v5067_v51 = vshrl.u32 %v11278_v23, 16  ;;  %v7902_v23 = vcombine.high %v5840_v6, %v5840_v6  ;;  %v5361_v6 = vshrl.u32 %v11322_v11, 16 }
 0x7e8   : > { %v5354_v11 = vshrl.u32 %v11243_v52, 16 }
 0x7e9   : > { %v11457_v16 = vpop.permute.xlu1 %6801  ;;  %v11459_v60 = vpop.permute.xlu0 %6221  ;;  %v11494_v41 = vrot.slane %v5080_v8, %v12628_v1 }
 0x7eb   : > { %5856 = vrot.lane.b32.xlu1 %v7896_v49, %s8005_s18  ;;  %5542 = vrot.lane.b32.xlu0 %v7891_v37, %s8006_s19  ;;  %v7733_v49 = vcombine.low %v5118_v18, %v5118_v18  ;;  %v5186_v37 = vrot.slane %v5172_v22, %v12629_v12  ;;  %v5205_v26 = vcombine.low %v11494_v41, %v11484_v25 }
 0x7ec   : > { %v5103_v22 = vcombine.low %v11447_v31, %v11433_v57  ;;  %v11515_v57 = vrot.slane %v5074_v14, %v12628_v1  ;;  %v5344_v14 = vpack.i.b16 %v5343_v54, %v5342_v47 }
 0x7ed   : > { %v11474_v27 = vpop.permute.xlu1 %6809  ;;  %v11476_v39 = vpop.permute.xlu0 %6229  ;;  %v7885_v8 = vcombine.high %v5186_v37, %v5186_v37  ;;  %v5213_v31 = vrot.slane %v5205_v26, %v12629_v12  ;;  %v7740_v54 = vcombine.low %v5186_v37, %v5186_v37 }
 0x7ee   : > { %v5404_v52 = vrot.slane %v5344_v14, %v12628_v1 }
 0x7ef   : > { %5901 = vrot.lane.b32.xlu1 %v7769_v20, %s8012_s29  ;;  %5507 = vrot.lane.b32.xlu0 %v7887_v28, %s8006_s19  ;;  %v7737_v26 = vcombine.low %v5213_v31, %v5213_v31  ;;  %v7884_v47 = vcombine.high %v5213_v31, %v5213_v31 }
 0x7f1   : > { %v11487_v29 = vpop.permute.xlu1 %7077  ;;  %v11489_v42 = vpop.permute.xlu0 %6219 }
 0x7f3   : > { %5866 = vrot.lane.b32.xlu1 %v7762_v44, %s8012_s29  ;;  %5241 = vrot.lane.b32.xlu0 %v7733_v49, %s8013_s30  ;;  %v5068_v44 = vpack.i.b16 %v5067_v51, %v5066_v59  ;;  %v5348_v49 = vshrl.u32 %v11298_v9, 16  ;;  %v11524_v59 = vrot.slane %v5103_v22, %v12629_v12  ;;  %v5362_v22 = vpack.i.b16 %v5361_v6, %v5360_v33 }
 0x7f5   : > { %v11505_v20 = vpop.permute.xlu1 %7085  ;;  %v11507_v28 = vpop.permute.xlu0 %6227  ;;  %v5350_v63 = vpack.i.b16 %v5349_v7, %v5348_v49  ;;  %v5448_v7 = vcombine.high %v11404_v0, %v11395_v5  ;;  %v5356_v49 = vpack.i.b16 %v5355_v3, %v5354_v11  ;;  %v5480_v0 = vrot.slane %v5362_v22, %v12628_v1 }
 0x7f7   : > { %5911 = vrot.lane.b32.xlu1 %v7902_v23, %s8010_s25  ;;  %5286 = vrot.lane.b32.xlu0 %v7885_v8, %s8011_s26  ;;  %v11527_v23 = vrot.slane %v5068_v44, %v12628_v1  ;;  %v5412_v8 = vrot.slane %v5350_v63, %v12628_v1  ;;  %v7879_v44 = vcombine.high %v11524_v59, %v11524_v59 }
 0x7f8   : > { %v5462_v33 = vrot.slane %v5448_v7, %v12629_v12  ;;  %v5472_v3 = vrot.slane %v5356_v49, %v12628_v1 }
 0x7f9   : > { %v11519_v51 = vpop.permute.xlu1 %6225  ;;  %v11521_v9 = vpop.permute.xlu0 %5945  ;;  %v5137_v18 = vcombine.low %v11527_v23, %v11515_v57  ;;  %v5413_v6 = vcombine.low %v5404_v52, %v5412_v8 }
 0x7fa   : > { %v5482_v31 = vcombine.high %v5472_v3, %v5480_v0 }
 0x7fb   : > { %5876 = vrot.lane.b32.xlu1 %v7898_v62, %s8010_s25  ;;  %5251 = vrot.lane.b32.xlu0 %v7881_v50, %s8011_s26  ;;  %v5145_v5 = vrot.slane %v5137_v18, %v12629_v12  ;;  %v5380_v62 = vcombine.high %v11427_v13, %v11415_v45  ;;  %v7754_v45 = vcombine.low %v5462_v33, %v5462_v33 }
 0x7fc   : > { %v5421_v18 = vrot.slane %v5413_v6, %v12629_v12 }
 0x7fd   : > { %v11539_v24 = vpop.permute.xlu1 %6233  ;;  %v11541_v43 = vpop.permute.xlu0 %5953  ;;  %v7880_v37 = vcombine.high %v5145_v5, %v5145_v5  ;;  %v5394_v13 = vrot.slane %v5380_v62, %v12629_v12  ;;  %v6819_v62 = vpack.i.b16 %v11399_v21, %v11324_v10 }
 0x7fe   : > { %v7888_v49 = vcombine.high %v5421_v18, %v5421_v18 }
 0x7ff   : > { %5231 = vrot.lane.b32.xlu1 %v7879_v44, %s8006_s19  ;;  %5261 = vrot.lane.b32.xlu0 %v7737_v26, %s8004_s17  ;;  %v5414_v26 = vcombine.high %v5404_v52, %v5412_v8  ;;  %v7747_v44 = vcombine.low %v5394_v13, %v5394_v13  ;;  %v7893_v52 = vcombine.high %v5462_v33, %v5462_v33 }
 0x800   : > { %v7889_v32 = vcombine.high %v5394_v13, %v5394_v13  ;;  %v7730_v13 = vcombine.low %v5145_v5, %v5145_v5  ;;  %v7089_v5 = vpack.i.b16 %v11419_v40, %v11339_v19 }
 0x801   : > { %v11552_v63 = vpop.permute.xlu1 %6223  ;;  %v11554_v50 = vpop.permute.xlu0 %5943 }
 0x803   : > { %5276 = vrot.lane.b32.xlu1 %v7740_v54, %s8013_s30  ;;  %5271 = vrot.lane.b32.xlu0 %v7884_v47, %s8005_s18  ;;  %v5496_v54 = vrot.slane %v5482_v31, %v12629_v12  ;;  %v5138_v47 = vcombine.high %v11527_v23, %v11515_v57  ;;  %v6813_v31 = vpack.i.b16 %v11375_v58, %v11311_v36 }
 0x804   : > { %v5481_v57 = vcombine.low %v5472_v3, %v5480_v0  ;;  %v6850_v23 = vrot.slane %v6819_v62, %v12628_v1 }
 0x805   : > { %v11560_v14 = vpop.permute.xlu1 %6231  ;;  %v11562_v11 = vpop.permute.xlu0 %5951  ;;  %v6842_v48 = vrot.slane %v6813_v31, %v12628_v1 }
 0x806   : > { %v5489_v0 = vrot.slane %v5481_v57, %v12629_v12 }
 0x807   : > { %5552 = vrot.lane.b32.xlu1 %v7754_v45, %s8013_s30  ;;  %5236 = vrot.lane.b32.xlu0 %v7880_v37, %s8005_s18  ;;  %v7755_v37 = vcombine.low %v5496_v54, %v5496_v54  ;;  %v11584_v45 = vrot.slane %v5414_v26, %v12629_v12  ;;  %v11598_v26 = vrot.slane %v5138_v47, %v12629_v12 }
 0x808   : > { %v6851_v3 = vcombine.low %v6842_v48, %v6850_v23  ;;  %v7751_v47 = vcombine.low %v5489_v0, %v5489_v0  ;;  %v6852_v31 = vcombine.high %v6842_v48, %v6850_v23  ;;  %v5206_v48 = vcombine.high %v11494_v41, %v11484_v25 }
 0x809   : > { %v11568_v22 = vpop.permute.xlu1 %5949  ;;  %v11570_v7 = vpop.permute.xlu0 %4947  ;;  %v7748_v33 = vcombine.low %v11584_v45, %v11584_v45  ;;  %v6821_v25 = vshrl.u32 %v11399_v21, 16  ;;  %v6814_v21 = vshrl.u32 %v11311_v36, 16  ;;  %v7097_v36 = vshrl.u32 %v11439_v55, 16 }
 0x80a   : > { %12638 = vst [vmem:[#allocation38_spill] sm:$0xff] %v11570_v7  ;;  %v6866_v7 = vrot.slane %v6852_v31, %v12629_v12  ;;  %v5220_v41 = vrot.slane %v5206_v48, %v12629_v12 }
 0x80b   : > { %5517 = vrot.lane.b32.xlu1 %v7747_v44, %s8013_s30  ;;  %5512 = vrot.lane.b32.xlu0 %v7888_v49, %s8005_s18 }
 0x80c   : > { %v7821_v31 = vcombine.low %v6866_v7, %v6866_v7 }
 0x80d   : > { %v11579_v6 = vpop.permute.xlu1 %5957  ;;  %v11581_v8 = vpop.permute.xlu0 %4992 }
 0x80e   : > { %12639 = vst [vmem:[#allocation68_spill] sm:$0xff] %v11581_v8  ;;  %v7894_v8 = vcombine.high %v5496_v54, %v5496_v54  ;;  %v7744_v54 = vcombine.low %v5421_v18, %v5421_v18 }
 0x80f   : > { %5562 = vrot.lane.b32.xlu1 %v7893_v52, %s8011_s26  ;;  %5557 = vrot.lane.b32.xlu0 %v7755_v37, %s8012_s29  ;;  %v7882_v37 = vcombine.high %v11598_v26, %v11598_v26 }
 0x811   : > { %v11591_v44 = vpop.permute.xlu1 %5947  ;;  %v11593_v49 = vpop.permute.xlu0 %4957 }
 0x812   : > { %12640 = vst [vmem:[#allocation64_spill] sm:$0xff] %v11593_v49  ;;  %v11619_v49 = vrot.slane %v6851_v3, %v12629_v12 }
 0x813   : > { %5527 = vrot.lane.b32.xlu1 %v7889_v32, %s8011_s26  ;;  %5522 = vrot.lane.b32.xlu0 %v7748_v33, %s8012_s29  ;;  %v7095_v32 = vpack.i.b16 %v11439_v55, %v11354_v35  ;;  %v7091_v55 = vshrl.u32 %v11419_v40, 16 }
 0x814   : > { %12642 = vst [vmem:[#allocation63_spill] sm:$0xff] %v11619_v49  ;;  %v7927_v3 = vcombine.high %v11619_v49, %v11619_v49  ;;  %v7892_v49 = vcombine.high %v5489_v0, %v5489_v0 }
 0x815   : > { %v11604_v62 = vpop.permute.xlu1 %5955  ;;  %v11606_v52 = vpop.permute.xlu0 %4977  ;;  %v7126_v23 = vrot.slane %v7095_v32, %v12628_v1 }
 0x817   : > { %5226 = vrot.lane.b32.xlu1 %v7730_v13, %s8004_s17  ;;  %5256 = vrot.lane.b32.xlu0 %v7882_v37, %s8010_s25 }
 0x819   : > { %v11614_v33 = vpop.permute.xlu1 %4982  ;;  %v11616_v57 = vpop.permute.xlu0 %4942 }
 0x81a   : > { %12641 = vst [vmem:[#allocation27_spill] sm:$0xff] %v11614_v33  ;;  %v7118_v33 = vrot.slane %v7089_v5, %v12628_v1  ;;  %v6820_v5 = vshrl.u32 %v11324_v10, 16  ;;  %v7929_v10 = vcombine.high %v6866_v7, %v6866_v7 }
 0x81b   : > { %5537 = vrot.lane.b32.xlu1 %v7751_v47, %s8004_s17  ;;  %5567 = vrot.lane.b32.xlu0 %v7894_v8, %s8010_s25  ;;  %v6831_v47 = vpack.i.b16 %v11474_v27, %v11401_v56 }
 0x81c   : > { %v7127_v8 = vcombine.low %v7118_v33, %v7126_v23  ;;  %v6822_v48 = vpack.i.b16 %v6821_v25, %v6820_v5 }
 0x81d   : > { %v11628_v13 = vpop.permute.xlu1 %5002  ;;  %v11630_v37 = vpop.permute.xlu0 %4962 }
 0x81e   : > { %12643 = vst [vmem:[#allocation62_spill] sm:$0xff] %v11628_v13  ;;  %12644 = vst [vmem:[#allocation10_spill] sm:$0xff] %v11630_v37  ;;  %v7741_v13 = vcombine.low %v5220_v41, %v5220_v41 }
 0x81f   : > { %5502 = vrot.lane.b32.xlu1 %v7744_v54, %s8004_s17  ;;  %6979 = vrot.lane.b32.xlu0 %v7927_v3, %s8006_s19  ;;  %v6815_v54 = vshrl.u32 %v11375_v58, 16  ;;  %v6825_v3 = vpack.i.b16 %v11457_v16, %v11377_v30  ;;  %v11659_v58 = vrot.slane %v7127_v8, %v12629_v12 }
 0x821   : > { %v11642_v18 = vpop.permute.xlu1 %4967  ;;  %v11644_v32 = vpop.permute.xlu0 %5007  ;;  %12647 = vst [vmem:[#allocation71_spill] sm:$0xff] %v11659_v58  ;;  %v6816_v61 = vpack.i.b16 %v6815_v54, %v6814_v21  ;;  %v7935_v8 = vcombine.high %v11659_v58, %v11659_v58 }
 0x822   : > { %12645 = vst [vmem:[#allocation75_spill] sm:$0xff] %v11642_v18  ;;  %12646 = vst [vmem:[#allocation72_spill] sm:$0xff] %v11644_v32  ;;  %v7128_v18 = vcombine.high %v7118_v33, %v7126_v23  ;;  %v6918_v32 = vrot.slane %v6831_v47, %v12628_v1  ;;  %v7734_v33 = vcombine.low %v11598_v26, %v11598_v26  ;;  %v7090_v26 = vshrl.u32 %v11339_v19, 16 }
 0x823   : > { %5547 = vrot.lane.b32.xlu1 %v7892_v49, %s8005_s18  ;;  %6989 = vrot.lane.b32.xlu0 %v7821_v31, %s8013_s30  ;;  %v6910_v49 = vrot.slane %v6825_v3, %v12628_v1  ;;  %v6884_v23 = vrot.slane %v6822_v48, %v12628_v1  ;;  %v6876_v5 = vrot.slane %v6816_v61, %v12628_v1 }
 0x824   : > { %v11675_v31 = vrot.slane %v7128_v18, %v12629_v12  ;;  %v7886_v18 = vcombine.high %v5220_v41, %v5220_v41  ;;  %v7092_v61 = vpack.i.b16 %v7091_v55, %v7090_v26  ;;  %v7890_v41 = vcombine.high %v11584_v45, %v11584_v45 }
 0x825   : > { %v11654_v0 = vpop.permute.xlu1 %4987  ;;  %v11656_v37 = vpop.permute.xlu0 %4972  ;;  %v6919_v25 = vcombine.low %v6910_v49, %v6918_v32  ;;  %v6885_v3 = vcombine.low %v6876_v5, %v6884_v23  ;;  %v6886_v55 = vcombine.high %v6876_v5, %v6884_v23  ;;  %v6833_v23 = vshrl.u32 %v11474_v27, 16 }
 0x827   : > { %5281 = vrot.lane.b32.xlu1 %v7741_v13, %s8012_s29  ;;  %6999 = vrot.lane.b32.xlu0 %v7929_v10, %s8011_s26  ;;  %v7096_v13 = vshrl.u32 %v11354_v35, 16  ;;  %v7835_v35 = vcombine.low %v11675_v31, %v11675_v31  ;;  %v11690_v40 = vrot.slane %v6919_v25, %v12629_v12  ;;  %v6920_v10 = vcombine.high %v6910_v49, %v6918_v32 }
 0x828   : > { %v6893_v25 = vrot.slane %v6885_v3, %v12629_v12  ;;  %v7107_v49 = vpack.i.b16 %v11505_v20, %v11437_v4  ;;  %v7101_v3 = vpack.i.b16 %v11487_v29, %v11417_v34  ;;  %v6900_v5 = vrot.slane %v6886_v55, %v12629_v12 }
 0x829   : > { %v11668_v47 = vpop.permute.xlu1 %4952  ;;  %v11670_v7 = vpop.permute.xlu0 %6713  ;;  %v7098_v54 = vpack.i.b16 %v7097_v36, %v7096_v13  ;;  %12650 = vst [vmem:[#allocation21_spill] sm:$0xff] %v11690_v40  ;;  %v7152_v13 = vrot.slane %v7092_v61, %v12628_v1  ;;  %v6249_v55 = vpack.i.b16 %v11519_v51, %v11459_v60 }
 0x82a   : > { %12648 = vst [vmem:[#allocation12_spill] sm:$0xff] %v11670_v7  ;;  %v7818_v45 = vcombine.low %v6893_v25, %v6893_v25  ;;  %v7186_v27 = vrot.slane %v7101_v3, %v12628_v1 }
 0x82b   : > { %5246 = vrot.lane.b32.xlu1 %v7734_v33, %s8012_s29  ;;  %7255 = vrot.lane.b32.xlu0 %v7935_v8, %s8006_s19  ;;  %v7160_v19 = vrot.slane %v7098_v54, %v12628_v1  ;;  %v7931_v8 = vcombine.high %v11690_v40, %v11690_v40 }
 0x82d   : > { %v11683_v21 = vpop.permute.xlu1 %4997  ;;  %v11685_v48 = vpop.permute.xlu0 %6738  ;;  %v7161_v32 = vcombine.low %v7152_v13, %v7160_v19 }
 0x82e   : > { %12649 = vst [vmem:[#allocation11_spill] sm:$0xff] %v11685_v48 }
 0x82f   : > { %5291 = vrot.lane.b32.xlu1 %v7886_v18, %s8010_s25  ;;  %7265 = vrot.lane.b32.xlu0 %v7835_v35, %s8013_s30  ;;  %v7928_v18 = vcombine.high %v6893_v25, %v6893_v25  ;;  %v6934_v35 = vrot.slane %v6920_v10, %v12629_v12  ;;  %v7169_v61 = vrot.slane %v7161_v32, %v12629_v12  ;;  %v6826_v32 = vshrl.u32 %v11377_v30, 16 }
 0x830   : > { %v5973_v30 = vpack.i.b16 %v11568_v22, %v11521_v9 }
 0x831   : > { %v11695_v36 = vpop.permute.xlu1 %6703  ;;  %v11697_v33 = vpop.permute.xlu0 %6708 }
 0x832   : > { %12651 = vst [vmem:[#allocation74_spill] sm:$0xff] %v11695_v36  ;;  %12652 = vst [vmem:[#allocation18_spill] sm:$0xff] %v11697_v33  ;;  %v7822_v33 = vcombine.low %v6900_v5, %v6900_v5  ;;  %v7832_v36 = vcombine.low %v7169_v61, %v7169_v61 }
 0x833   : > { %5532 = vrot.lane.b32.xlu1 %v7890_v41, %s8010_s25  ;;  %7014 = vrot.lane.b32.xlu0 %v7931_v8, %s8006_s19  ;;  %v7194_v41 = vrot.slane %v7107_v49, %v12628_v1  ;;  %v6255_v8 = vpack.i.b16 %v11539_v24, %v11476_v39  ;;  %v7162_v49 = vcombine.high %v7152_v13, %v7160_v19 }
 0x835   : > { %v11709_v26 = vpop.permute.xlu1 %6723  ;;  %v11711_v54 = vpop.permute.xlu0 %6718  ;;  %v7196_v13 = vcombine.high %v7186_v27, %v7194_v41 }
 0x836   : > { %12653 = vst [vmem:[#allocation20_spill] sm:$0xff] %v11709_v26  ;;  %12654 = vst [vmem:[#allocation73_spill] sm:$0xff] %v11711_v54  ;;  %v7828_v26 = vcombine.low %v6934_v35, %v6934_v35  ;;  %v7933_v54 = vcombine.high %v6934_v35, %v6934_v35  ;;  %v6342_v35 = vrot.slane %v6255_v8, %v12628_v1 }
 0x837   : > { %6974 = vrot.lane.b32.xlu1 %v7818_v45, %s8004_s17  ;;  %6984 = vrot.lane.b32.xlu0 %v7928_v18, %s8005_s18  ;;  %v6832_v45 = vshrl.u32 %v11401_v56, 16  ;;  %v6827_v18 = vshrl.u32 %v11457_v16, 16  ;;  %v5979_v56 = vpack.i.b16 %v11579_v6, %v11541_v43 }
 0x839   : > { %v11724_v25 = vpop.permute.xlu1 %6698  ;;  %v11726_v10 = vpop.permute.xlu0 %6743  ;;  %v6834_v7 = vpack.i.b16 %v6833_v23, %v6832_v45  ;;  %v6828_v48 = vpack.i.b16 %v6827_v18, %v6826_v32  ;;  %v11750_v23 = vrot.slane %v7162_v49, %v12629_v12  ;;  %v11753_v45 = vrot.slane %v5979_v56, %v12628_v1 }
 0x83a   : > { %12655 = vst [vmem:[#allocation70_spill] sm:$0xff] %v11724_v25  ;;  %12656 = vst [vmem:[#allocation23_spill] sm:$0xff] %v11726_v10  ;;  %v7195_v10 = vcombine.low %v7186_v27, %v7194_v41  ;;  %v7936_v32 = vcombine.high %v7169_v61, %v7169_v61  ;;  %v11771_v27 = vrot.slane %v7196_v13, %v12629_v12 }
 0x83b   : > { %7024 = vrot.lane.b32.xlu1 %v7828_v26, %s8013_s30  ;;  %7034 = vrot.lane.b32.xlu0 %v7933_v54, %s8011_s26  ;;  %v6334_v26 = vrot.slane %v6249_v55, %v12628_v1  ;;  %v6952_v19 = vrot.slane %v6834_v7, %v12628_v1  ;;  %v7930_v54 = vcombine.high %v6900_v5, %v6900_v5 }
 0x83c   : > { %v11764_v7 = vrot.slane %v5973_v30, %v12628_v1  ;;  %v7836_v41 = vcombine.low %v11750_v23, %v11750_v23  ;;  %v5961_v13 = vpack.i.b16 %v11591_v44, %v11554_v50 }
 0x83d   : > { %v11739_v16 = vpop.permute.xlu1 %6748  ;;  %v11741_v3 = vpop.permute.xlu0 %6763  ;;  %v6343_v8 = vcombine.low %v6334_v26, %v6342_v35 }
 0x83e   : > { %12657 = vst [vmem:[#allocation22_spill] sm:$0xff] %v11739_v16  ;;  %12658 = vst [vmem:[#allocation33_spill] sm:$0xff] %v11741_v3  ;;  %v6067_v61 = vcombine.low %v11764_v7, %v11753_v45  ;;  %v7842_v3 = vcombine.low %v11771_v27, %v11771_v27 }
 0x83f   : > { %6994 = vrot.lane.b32.xlu1 %v7822_v33, %s8012_s29  ;;  %7250 = vrot.lane.b32.xlu0 %v7832_v36, %s8004_s17  ;;  %v11760_v33 = vrot.slane %v7195_v10, %v12629_v12  ;;  %v6944_v36 = vrot.slane %v6828_v48, %v12628_v1  ;;  %v5967_v48 = vpack.i.b16 %v11604_v62, %v11562_v11 }
 0x840   : > { %v11784_v30 = vrot.slane %v6343_v8, %v12629_v12 }
 0x841   : > { %v11755_v18 = vpop.permute.xlu1 %6758  ;;  %v11757_v55 = vpop.permute.xlu0 %5851  ;;  %12660 = vst [vmem:[#allocation25_spill] sm:$0xff] %v11760_v33  ;;  %v6953_v5 = vcombine.low %v6944_v36, %v6952_v19  ;;  %v7939_v56 = vcombine.high %v11760_v33, %v11760_v33  ;;  %v11797_v8 = vrot.slane %v5967_v48, %v12628_v1  ;;  %v5990_v48 = vrot.slane %v5961_v13, %v12628_v1 }
 0x842   : > { %12659 = vst [vmem:[#allocation57_spill] sm:$0xff] %v11755_v18  ;;  %12662 = vst [vmem:[#allocation31_spill] sm:$0xff] %v11784_v30  ;;  %v6243_v18 = vpack.i.b16 %v11560_v14, %v11507_v28 }
 0x843   : > { %7004 = vrot.lane.b32.xlu1 %v7930_v54, %s8010_s25  ;;  %7260 = vrot.lane.b32.xlu0 %v7936_v32, %s8005_s18  ;;  %v7109_v54 = vshrl.u32 %v11505_v20, 16  ;;  %v6344_v32 = vcombine.high %v6334_v26, %v6342_v35  ;;  %v11806_v20 = vrot.slane %v6067_v61, %v12629_v12  ;;  %v7108_v35 = vshrl.u32 %v11437_v4, 16 }
 0x844   : > { %v7103_v26 = vshrl.u32 %v11487_v29, 16  ;;  %v11817_v61 = vrot.slane %v6243_v18, %v12628_v1  ;;  %v5999_v4 = vcombine.low %v5990_v48, %v11797_v8  ;;  %v6257_v18 = vshrl.u32 %v11539_v24, 16 }
 0x845   : > { %v11777_v10 = vpop.permute.xlu1 %6728  ;;  %v11779_v49 = vpop.permute.xlu0 %5896  ;;  %12664 = vst [vmem:[#allocation15_spill] sm:$0xff] %v11806_v20  ;;  %v7907_v13 = vcombine.high %v11806_v20, %v11806_v20  ;;  %v6251_v24 = vshrl.u32 %v11519_v51, 16 }
 0x846   : > { %12661 = vst [vmem:[#allocation32_spill] sm:$0xff] %v11777_v10  ;;  %v6961_v10 = vrot.slane %v6953_v5, %v12629_v12  ;;  %v6237_v5 = vpack.i.b16 %v11552_v63, %v11489_v42 }
 0x847   : > { %7290 = vrot.lane.b32.xlu1 %v7939_v56, %s8006_s19  ;;  %7270 = vrot.lane.b32.xlu0 %v7836_v41, %s8012_s29  ;;  %v7915_v41 = vcombine.high %v11784_v30, %v11784_v30  ;;  %v7102_v56 = vshrl.u32 %v11417_v34, 16  ;;  %v7110_v30 = vpack.i.b16 %v7109_v54, %v7108_v35 }
 0x848   : > { %v7825_v33 = vcombine.low %v6961_v10, %v6961_v10  ;;  %v11830_v34 = vrot.slane %v6237_v5, %v12628_v1 }
 0x849   : > { %v11799_v16 = vpop.permute.xlu1 %6733  ;;  %v11801_v25 = vpop.permute.xlu0 %5861 }
 0x84a   : > { %12663 = vst [vmem:[#allocation61_spill] sm:$0xff] %v11799_v16  ;;  %v6954_v16 = vcombine.high %v6944_v36, %v6952_v19  ;;  %v11835_v19 = vrot.slane %v7110_v30, %v12628_v1  ;;  %v6276_v54 = vcombine.high %v11830_v34, %v11817_v61  ;;  %v6256_v30 = vshrl.u32 %v11476_v39, 16 }
 0x84b   : > { %7300 = vrot.lane.b32.xlu1 %v7842_v3, %s8013_s30  ;;  %6438 = vrot.lane.b32.xlu0 %v7915_v41, %s8006_s19  ;;  %v11827_v3 = vrot.slane %v6344_v32, %v12629_v12  ;;  %v7104_v41 = vpack.i.b16 %v7103_v26, %v7102_v56  ;;  %v7932_v26 = vcombine.high %v6961_v10, %v6961_v10 }
 0x84c   : > { %v6968_v36 = vrot.slane %v6954_v16, %v12629_v12  ;;  %v6250_v16 = vshrl.u32 %v11459_v60, 16  ;;  %v6000_v39 = vcombine.high %v5990_v48, %v11797_v8  ;;  %v5974_v8 = vshrl.u32 %v11521_v9, 16 }
 0x84d   : > { %v11820_v29 = vpop.permute.xlu1 %6753  ;;  %v11822_v40 = vpop.permute.xlu0 %5906  ;;  %v7796_v5 = vcombine.low %v11827_v3, %v11827_v3  ;;  %v11850_v56 = vrot.slane %v7104_v41, %v12628_v1 }
 0x84e   : > { %12665 = vst [vmem:[#allocation41_spill] sm:$0xff] %v11820_v29  ;;  %v7829_v29 = vcombine.low %v6968_v36, %v6968_v36  ;;  %v6252_v58 = vpack.i.b16 %v6251_v24, %v6250_v16 }
 0x84f   : > { %7009 = vrot.lane.b32.xlu1 %v7825_v33, %s8004_s17  ;;  %6162 = vrot.lane.b32.xlu0 %v7907_v13, %s8006_s19  ;;  %v11846_v33 = vrot.slane %v5999_v4, %v12629_v12  ;;  %v7229_v10 = vcombine.low %v11850_v56, %v11835_v19  ;;  %v6258_v13 = vpack.i.b16 %v6257_v18, %v6256_v30  ;;  %v5981_v4 = vshrl.u32 %v11579_v6, 16 }
 0x850   : > { %v5975_v18 = vshrl.u32 %v11568_v22, 16  ;;  %v11878_v22 = vrot.slane %v6000_v39, %v12629_v12 }
 0x851   : > { %v5887_v32 = vpop.permute.xlu1 %5886  ;;  %v11841_v35 = vpop.permute.xlu0 %5871  ;;  %v7903_v51 = vcombine.high %v11846_v33, %v11846_v33  ;;  %v11872_v48 = vrot.slane %v6258_v13, %v12628_v1 }
 0x852   : > { %v5976_v16 = vpack.i.b16 %v5975_v18, %v5974_v8  ;;  %v5963_v18 = vshrl.u32 %v11591_v44, 16 }
 0x853   : > { %7019 = vrot.lane.b32.xlu1 %v7932_v26, %s8005_s18  ;;  %6448 = vrot.lane.b32.xlu0 %v7796_v5, %s8013_s30  ;;  %v6290_v26 = vrot.slane %v6276_v54, %v12629_v12  ;;  %v5980_v5 = vshrl.u32 %v11541_v43, 16  ;;  %v7237_v54 = vrot.slane %v7229_v10, %v12629_v12  ;;  %v7934_v43 = vcombine.high %v6968_v36, %v6968_v36 }
 0x855   : > { %v5882_v20 = vpop.permute.xlu1 %5881  ;;  %v5847_v41 = vpop.permute.xlu0 %5846  ;;  %v5982_v30 = vpack.i.b16 %v5981_v4, %v5980_v5  ;;  %v7839_v13 = vcombine.low %v7237_v54, %v7237_v54  ;;  %v7940_v5 = vcombine.high %v7237_v54, %v7237_v54  ;;  %v6068_v54 = vcombine.high %v11764_v7, %v11753_v45 }
 0x856   : > { %v5930_v60 = vsel %vm572_vm8, %v11365_v17, %v5882_v20  ;;  %v7789_v20 = vcombine.low %v6290_v26, %v6290_v26  ;;  %v5915_v9 = vsel %vm572_vm8, %v11316_v38, %v5847_v41  ;;  %v5969_v38 = vshrl.u32 %v11604_v62, 16 }
 0x857   : > { %7029 = vrot.lane.b32.xlu1 %v7829_v29, %s8012_s29  ;;  %6127 = vrot.lane.b32.xlu0 %v7903_v51, %s8006_s19  ;;  %v5932_v6 = vsel %vm576_vm10, %v5930_v60, %v5887_v32  ;;  %v11881_v29 = vrot.slane %v6252_v58, %v12628_v1  ;;  %v6275_v58 = vcombine.low %v11830_v34, %v11817_v61  ;;  %v5968_v61 = vshrl.u32 %v11562_v11, 16 }
 0x858   : > { %v11895_v4 = vrot.slane %v5982_v30, %v12628_v1  ;;  %v5917_v41 = vsel %vm576_vm10, %v5915_v9, %v11757_v55  ;;  %v11907_v34 = vrot.slane %v5976_v16, %v12628_v1  ;;  %v5962_v55 = vshrl.u32 %v11554_v50, 16 }
 0x859   : > { %v5892_v24 = vpop.permute.xlu1 %5891  ;;  %v11875_v17 = vpop.permute.xlu0 %5266  ;;  %v6377_v10 = vcombine.low %v11881_v29, %v11872_v48  ;;  %v11917_v8 = vrot.slane %v6275_v58, %v12629_v12  ;;  %v5970_v30 = vpack.i.b16 %v5969_v38, %v5968_v61  ;;  %v6244_v50 = vshrl.u32 %v11507_v28, 16 }
 0x85a   : > { %v5934_v32 = vsel %vm579_vm11, %v5932_v6, %v5892_v24  ;;  %v6245_v6 = vshrl.u32 %v11560_v14, 16  ;;  %v6101_v44 = vcombine.low %v11907_v34, %v11895_v4  ;;  %v5964_v9 = vpack.i.b16 %v5963_v18, %v5962_v55 }
 0x85b   : > { %7039 = vrot.lane.b32.xlu1 %v7934_v43, %s8010_s25  ;;  %6413 = vrot.lane.b32.xlu0 %v7789_v20, %s8013_s30  ;;  %v5936_v36 = vsel %vm1546_vm9, %v5934_v32, %v11779_v49  ;;  %v7775_v49 = vcombine.low %v11878_v22, %v11878_v22  ;;  %v6385_v11 = vrot.slane %v6377_v10, %v12629_v12  ;;  %v6239_v20 = vshrl.u32 %v11552_v63, 16 }
 0x85c   : > { %v6238_v7 = vshrl.u32 %v11489_v42, 16  ;;  %v6246_v32 = vpack.i.b16 %v6245_v6, %v6244_v50  ;;  %v7911_v63 = vcombine.high %v11917_v8, %v11917_v8  ;;  %v11943_v58 = vrot.slane %v6101_v44, %v12629_v12 }
 0x85d   : > { %v5857_v39 = vpop.permute.xlu1 %5856  ;;  %v11900_v51 = vpop.permute.xlu0 %5542  ;;  %v7793_v16 = vcombine.low %v6385_v11, %v6385_v11  ;;  %v6024_v42 = vrot.slane %v5964_v9, %v12628_v1  ;;  %v7917_v6 = vcombine.high %v11827_v3, %v11827_v3  ;;  %v7905_v9 = vcombine.high %v11878_v22, %v11878_v22 }
 0x85e   : > { %v5919_v60 = vsel %vm579_vm11, %v5917_v41, %v5857_v39  ;;  %v6308_v39 = vrot.slane %v6246_v32, %v12628_v1  ;;  %v7779_v61 = vcombine.low %v11943_v58, %v11943_v58 }
 0x85f   : > { %7285 = vrot.lane.b32.xlu1 %v7839_v13, %s8004_s17  ;;  %6137 = vrot.lane.b32.xlu0 %v7775_v49, %s8013_s30  ;;  %v5921_v62 = vsel %vm1546_vm9, %v5919_v60, %v11801_v25  ;;  %v7913_v25 = vcombine.high %v6290_v26, %v6290_v26  ;;  %v6032_v26 = vrot.slane %v5970_v30, %v12628_v1 }
 0x860   : > { %v6240_v13 = vpack.i.b16 %v6239_v20, %v6238_v7 }
 0x861   : > { %v5902_v24 = vpop.permute.xlu1 %5901  ;;  %v11924_v43 = vpop.permute.xlu0 %5507  ;;  %v6033_v41 = vcombine.low %v6024_v42, %v6032_v26  ;;  %v6034_v30 = vcombine.high %v6024_v42, %v6032_v26  ;;  %v6102_v26 = vcombine.high %v11907_v34, %v11895_v4  ;;  %v6378_v4 = vcombine.high %v11881_v29, %v11872_v48 }
 0x862   : > { %v5938_v14 = vsel %vm1549_vm14, %v5936_v36, %v5902_v24  ;;  %v6082_v36 = vrot.slane %v6068_v54, %v12629_v12  ;;  %v6300_v18 = vrot.slane %v6240_v13, %v12628_v1  ;;  %v7916_v54 = vcombine.high %v6385_v11, %v6385_v11 }
 0x863   : > { %7295 = vrot.lane.b32.xlu1 %v7940_v5, %s8005_s18  ;;  %6423 = vrot.lane.b32.xlu0 %v7913_v25, %s8011_s26  ;;  %v11933_v45 = vsel %vm1552_vm1, %v5938_v14, %v11822_v40  ;;  %v6041_v44 = vrot.slane %v6033_v41, %v12629_v12  ;;  %v6116_v41 = vrot.slane %v6102_v26, %v12629_v12 }
 0x864   : > { %v7782_v5 = vcombine.low %v6082_v36, %v6082_v36  ;;  %v6309_v1 = vcombine.low %v6300_v18, %v6308_v39  ;;  %v7909_v50 = vcombine.high %v6082_v36, %v6082_v36 }
 0x865   : > { %v5867_v28 = vpop.permute.xlu1 %5866  ;;  %v11937_v10 = vpop.permute.xlu0 %5241  ;;  %v7904_v14 = vcombine.high %v6041_v44, %v6041_v44  ;;  %v7772_v42 = vcombine.low %v6041_v44, %v6041_v44 }
 0x866   : > { %v5923_v40 = vsel %vm1549_vm14, %v5921_v62, %v5867_v28  ;;  %v6310_v62 = vcombine.high %v6300_v18, %v6308_v39  ;;  %v6317_v32 = vrot.slane %v6309_v1, %v12629_v12  ;;  %v7910_v18 = vcombine.high %v6116_v41, %v6116_v41 }
 0x867   : > { %6403 = vrot.lane.b32.xlu1 %v7911_v63, %s8006_s19  ;;  %6433 = vrot.lane.b32.xlu0 %v7793_v16, %s8004_s17  ;;  %v11951_v38 = vsel %vm1552_vm1, %v5923_v40, %v11841_v35  ;;  %v6048_v16 = vrot.slane %v6034_v30, %v12629_v12  ;;  %v6392_v1 = vrot.slane %v6378_v4, %v12629_v12 }
 0x868   : > { %v6324_v20 = vrot.slane %v6310_v62, %v12629_v12  ;;  %v7786_v36 = vcombine.low %v6317_v32, %v6317_v32 }
 0x869   : > { %v11954_v49 = vpop.permute.xlu1 %5911  ;;  %v11956_v60 = vpop.permute.xlu0 %5286  ;;  %v7776_v40 = vcombine.low %v6048_v16, %v6048_v16  ;;  %v7906_v44 = vcombine.high %v6048_v16, %v6048_v16  ;;  %v7797_v30 = vcombine.low %v6392_v1, %v6392_v1 }
 0x86a   : > { %v7790_v7 = vcombine.low %v6324_v20, %v6324_v20  ;;  %v7914_v39 = vcombine.high %v6324_v20, %v6324_v20 }
 0x86b   : > { %6172 = vrot.lane.b32.xlu1 %v7782_v5, %s8013_s30  ;;  %6157 = vrot.lane.b32.xlu0 %v7779_v61, %s8004_s17  ;;  %v7912_v61 = vcombine.high %v6317_v32, %v6317_v32 }
 0x86d   : > { %v11963_v35 = vpop.permute.xlu1 %5876  ;;  %v11965_v55 = vpop.permute.xlu0 %5251 }
 0x86f   : > { %6458 = vrot.lane.b32.xlu1 %v7917_v6, %s8011_s26  ;;  %6443 = vrot.lane.b32.xlu0 %v7916_v54, %s8005_s18  ;;  %v7908_v54 = vcombine.high %v11943_v58, %v11943_v58  ;;  %v7230_v58 = vcombine.high %v11850_v56, %v11835_v19 }
 0x871   : > { %v11972_v24 = vpop.permute.xlu1 %5231  ;;  %v11974_v25 = vpop.permute.xlu0 %5261  ;;  %v7244_v26 = vrot.slane %v7230_v58, %v12629_v12  ;;  %v12670_v58 = vld [vmem:[#allocation68_spill] sm:$0xff] }
 0x872   : > { %v5310_v12 = vsel %vm572_vm8, %v11422_v46, %v11974_v25  ;;  %v12667_v25 = vld [vmem:[#allocation27_spill] sm:$0xff] }
 0x873   : > { %6182 = vrot.lane.b32.xlu1 %v7909_v50, %s8011_s26  ;;  %6132 = vrot.lane.b32.xlu0 %v7904_v14, %s8005_s18  ;;  %v7937_v50 = vcombine.high %v11675_v31, %v11675_v31  ;;  %v7918_v31 = vcombine.high %v6392_v1, %v6392_v1 }
 0x875   : > { %v11979_v3 = vpop.permute.xlu1 %5276  ;;  %v11981_v11 = vpop.permute.xlu0 %5271 }
 0x877   : > { %6147 = vrot.lane.b32.xlu1 %v7905_v9, %s8011_s26  ;;  %6418 = vrot.lane.b32.xlu0 %v7790_v7, %s8012_s29  ;;  %v7783_v9 = vcombine.low %v6116_v41, %v6116_v41  ;;  %v7938_v7 = vcombine.high %v11750_v23, %v11750_v23 }
 0x879   : > { %v5553_v28 = vpop.permute.xlu1 %5552  ;;  %v11991_v63 = vpop.permute.xlu0 %5236 }
 0x87b   : > { %6398 = vrot.lane.b32.xlu1 %v7786_v36, %s8004_s17  ;;  %6142 = vrot.lane.b32.xlu0 %v7776_v40, %s8012_s29 }
 0x87d   : > { %v11995_v22 = vpop.permute.xlu1 %5517  ;;  %v11997_v13 = vpop.permute.xlu0 %5512 }
 0x87f   : > { %6122 = vrot.lane.b32.xlu1 %v7772_v42, %s8004_s17  ;;  %6428 = vrot.lane.b32.xlu0 %v7914_v39, %s8010_s25  ;;  %v7843_v42 = vcombine.low %v7244_v26, %v7244_v26  ;;  %v5011_v39 = vsel %vm572_vm8, %v11159_v53, %v11616_v57  ;;  %v12666_v53 = vld [vmem:[#allocation40_spill] sm:$0xff]  ;;  %s7545_s17 = sshll.u32 %s12698_s28, 3 }
 0x880   : > { %v5026_v57 = vsel %vm572_vm8, %v12666_v53, %v11606_v52  ;;  %s323_s20 = scalar_lea.vmem %s12277_s8, %s7545_s17 }
 0x881   : > { %v12004_v34 = vpop.permute.xlu1 %5562  ;;  %v5558_v5 = vpop.permute.xlu0 %5557  ;;  %v5028_v4 = vsel %vm576_vm10, %v5026_v57, %v12667_v25 }
 0x883   : > { %6408 = vrot.lane.b32.xlu1 %v7912_v61, %s8005_s18  ;;  %6187 = vrot.lane.b32.xlu0 %v7910_v18, %s8010_s25  ;;  %v5312_v18 = vsel %vm576_vm10, %v5310_v12, %v11875_v17 }
 0x884   : > { %v5314_v1 = vsel %vm579_vm11, %v5312_v18, %v11981_v11 }
 0x885   : > { %v12008_v62 = vpop.permute.xlu1 %5527  ;;  %v12010_v6 = vpop.permute.xlu0 %5522  ;;  %v5316_v11 = vsel %vm1546_vm9, %v5314_v1, %v11979_v3 }
 0x887   : > { %6167 = vrot.lane.b32.xlu1 %v7908_v54, %s8005_s18  ;;  %6152 = vrot.lane.b32.xlu0 %v7906_v44, %s8010_s25 }
 0x889   : > { %v5227_v48 = vpop.permute.xlu1 %5226  ;;  %v12017_v29 = vpop.permute.xlu0 %5256 }
 0x88a   : > { %v5295_v19 = vsel %vm572_vm8, %v11524_v59, %v5227_v48 }
 0x88b   : > { %6453 = vrot.lane.b32.xlu1 %v7797_v30, %s8012_s29  ;;  %7275 = vrot.lane.b32.xlu0 %v7937_v50, %s8011_s26  ;;  %v5297_v41 = vsel %vm576_vm10, %v5295_v19, %v11972_v24  ;;  %v12668_v24 = vld [vmem:[#allocation38_spill] sm:$0xff]  ;;  %v7942_v30 = vcombine.high %v7244_v26, %v7244_v26  ;;  %v12669_v50 = vld [vmem:[#allocation64_spill] sm:$0xff] }
 0x88c   : > { %v5013_v61 = vsel %vm576_vm10, %v5011_v39, %v12668_v24  ;;  %v5299_v48 = vsel %vm579_vm11, %v5297_v41, %v11991_v63 }
 0x88d   : > { %v5538_v14 = vpop.permute.xlu1 %5537  ;;  %v5568_v20 = vpop.permute.xlu0 %5567  ;;  %v5301_v63 = vsel %vm1546_vm9, %v5299_v48, %v11937_v10  ;;  %v12671_v10 = vld [vmem:[#allocation10_spill] sm:$0xff] }
 0x88e   : > { %v5586_v36 = vsel %vm572_vm8, %v11444_v2, %v5538_v14 }
 0x88f   : > { %6177 = vrot.lane.b32.xlu1 %v7783_v9, %s8012_s29  ;;  %7280 = vrot.lane.b32.xlu0 %v7938_v7, %s8010_s25  ;;  %v5588_v23 = vsel %vm576_vm10, %v5586_v36, %v11900_v51  ;;  %v7402_v51 = vld [vmem:[%s12276_s7] sm:$0xf] }
 0x890   : > { %v12672_v36 = vld [vmem:[#allocation62_spill] sm:$0xff] }
 0x891   : > { %v5503_v32 = vpop.permute.xlu1 %5502  ;;  %v12029_v16 = vpop.permute.xlu0 %6979 }
 0x892   : > { %v5571_v2 = vsel %vm572_vm8, %v11464_v15, %v5503_v32  ;;  %v7941_v15 = vcombine.high %v11771_v27, %v11771_v27  ;;  %v5015_v27 = vsel %vm579_vm11, %v5013_v61, %v11668_v47 }
 0x893   : > { %6463 = vrot.lane.b32.xlu1 %v7918_v31, %s8010_s25  ;;  %7405 = vperm.xlu0 %7985, %v7402_v51   ;;  %v5573_v54 = vsel %vm576_vm10, %v5571_v2, %v11924_v43 }
 0x894   : > { %v5575_v43 = vsel %vm579_vm11, %v5573_v54, %v11997_v13  ;;  %v12675_v54 = vld [vmem:[#allocation63_spill] sm:$0xff] }
 0x895   : > { %v5548_v56 = vpop.permute.xlu1 %5547  ;;  %v12039_v40 = vpop.permute.xlu0 %6989  ;;  %v5577_v3 = vsel %vm1546_vm9, %v5575_v43, %v11995_v22  ;;  %v5942_v22 = vsel %vm1555_vm2, %v11933_v45, %v11954_v49  ;;  %v5927_v45 = vsel %vm1555_vm2, %v11951_v38, %v11963_v35 }
 0x896   : > { %v5590_v59 = vsel %vm579_vm11, %v5588_v23, %v5548_v56  ;;  %v5579_v39 = vsel %vm1549_vm14, %v5577_v3, %v12010_v6  ;;  %v7358_v51 = vrot.slane %v5942_v22, 2  ;;  %v7357_v61 = vrot.slane %v5927_v45, 2 }
 0x897   : > { %7305 = vrot.lane.b32.xlu1 %v7843_v42, %s8012_s29  ;;  %v5592_v46 = vsel %vm1546_vm9, %v5590_v59, %v5553_v28  ;;  %v5030_v28 = vsel %vm579_vm11, %v5028_v4, %v11654_v0  ;;  %v5017_v0 = vsel %vm1546_vm9, %v5015_v27, %v12669_v50  ;;  %v12674_v59 = vld [vmem:[#allocation72_spill] sm:$0xff]  ;;  %v5581_v6 = vsel %vm1552_vm1, %v5579_v39, %v12008_v62 }
 0x898   : > { %v5594_v17 = vsel %vm1549_vm14, %v5592_v46, %v5558_v5  ;;  %v5032_v47 = vsel %vm1546_vm9, %v5030_v28, %v12670_v58  ;;  %v5019_v26 = vsel %vm1549_vm14, %v5017_v0, %v12671_v10  ;;  %v12676_v0 = vld [vmem:[#allocation71_spill] sm:$0xff] }
 0x899   : > { %v5282_v44 = vpop.permute.xlu1 %5281  ;;  %v12070_v52 = vpop.permute.xlu0 %6999  ;;  %v5034_v9 = vsel %vm1549_vm14, %v5032_v47, %v11683_v21  ;;  %v5596_v13 = vsel %vm1552_vm1, %v5594_v17, %v12004_v34 }
 0x89a   : > { %v5318_v7 = vsel %vm1549_vm14, %v5316_v11, %v5282_v44  ;;  %v5036_v21 = vsel %vm1552_vm1, %v5034_v9, %v12672_v36 }
 0x89b   : > { %7310 = vrot.lane.b32.xlu1 %v7941_v15, %s8011_s26  ;;  %v5320_v56 = vsel %vm1552_vm1, %v5318_v7, %v11956_v60  ;;  %v5038_v60 = vsel %vm1555_vm2, %v5036_v21, %v12674_v59  ;;  %v12678_v59 = vld [vmem:[#allocation25_spill] sm:$0xff] }
 0x89d   : > { %v5247_v14 = vpop.permute.xlu1 %5246  ;;  %v7256_v5 = vpop.permute.xlu0 %7255 }
 0x89e   : > { %v5303_v32 = vsel %vm1549_vm14, %v5301_v63, %v5247_v14 }
 0x89f   : > { %v5305_v31 = vsel %vm1552_vm1, %v5303_v32, %v11965_v55  ;;  %7315 = vrot.lane.b32.xlu1 %v7942_v30, %s8010_s25  ;;  %v5598_v55 = vsel %vm1555_vm2, %v5596_v13, %v5568_v20 }
 0x8a0   : > { %v5307_v34 = vsel %vm1555_vm2, %v5305_v31, %v12017_v29  ;;  %v12673_v29 = vld [vmem:[#allocation75_spill] sm:$0xff]  ;;  %v7354_v20 = vrot.slane %v5598_v55, 4 }
 0x8a1   : > { %v5292_v19 = vpop.permute.xlu1 %5291  ;;  %v7266_v23 = vpop.permute.xlu0 %7265  ;;  %v5021_v2 = vsel %vm1552_vm1, %v5019_v26, %v12673_v29  ;;  %v7349_v41 = vrot.slane %v5307_v34, 6  ;;  %v12677_v26 = vld [vmem:[#allocation21_spill] sm:$0xff] }
 0x8a2   : > { %v5322_v42 = vsel %vm1555_vm2, %v5320_v56, %v5292_v19  ;;  %v5023_v24 = vsel %vm1555_vm2, %v5021_v2, %v11656_v37 }
 0x8a3   : > { %v7350_v12 = vrot.slane %v5322_v42, 6  ;;  %v7373_v38 = vsel %vm7371_vm6, %v5023_v24, %v7349_v41 }
 0x8a5   : > { %v5533_v49 = vpop.permute.xlu1 %5532  ;;  %v7015_v53 = vpop.permute.xlu0 %7014  ;;  %v7375_v57 = vsel %vm7371_vm6, %v5038_v60, %v7350_v12 }
 0x8a6   : > { %v5583_v46 = vsel %vm1555_vm2, %v5581_v6, %v5533_v49  ;;  %v7379_v15 = vsel %vm351_vm0, %v7375_v57, %v7354_v20 }
 0x8a7   : > { %v7353_v25 = vrot.slane %v5583_v46, 4  ;;  %v7385_v4 = vsel %vm7380_vm12, %v7379_v15, %v7358_v51 }
 0x8a8   : > { %7416 = vmatprep.subr.bf16.mxu1 %v7385_v4 }
 0x8a9   : > { %v6975_v35 = vpop.permute.xlu1 %6974  ;;  %v6985_v18 = vpop.permute.xlu0 %6984  ;;  %v7377_v62 = vsel %vm351_vm0, %v7373_v38, %v7353_v25 }
 0x8aa   : > { %v7043_v44 = vsel %vm572_vm8, %v12675_v54, %v6975_v35  ;;  %v7382_v28 = vsel %vm7380_vm12, %v7377_v62, %v7357_v61 }
 0x8ab   : > { %v7045_v27 = vsel %vm576_vm10, %v7043_v44, %v12029_v16  ;;  %7417 = vmatpush1.bf16.msra.mxu1 %v7382_v28  ;;  %v12679_v44 = vld [vmem:[#allocation61_spill] sm:$0xff]  ;;  %v12680_v28 = vld [vmem:[#allocation39_spill] sm:$0xff] }
 0x8ac   : > { %v7047_v1 = vsel %vm579_vm11, %v7045_v27, %v6985_v18  ;;  %v6782_v27 = vsel %vm572_vm8, %v12680_v28, %v12679_v44 }
 0x8ad   : > { %v7025_v37 = vpop.permute.xlu1 %7024  ;;  %v7035_v48 = vpop.permute.xlu0 %7034  ;;  %v7049_v17 = vsel %vm1546_vm9, %v7047_v1, %v12039_v40  ;;  %v12681_v1 = vld [vmem:[#allocation70_spill] sm:$0xff] }
 0x8b1   : > { %v6995_v43 = vpop.permute.xlu1 %6994  ;;  %v7251_v30 = vpop.permute.xlu0 %7250 }
 0x8b2   : > { %v7051_v50 = vsel %vm1549_vm14, %v7049_v17, %v6995_v43  ;;  %v7319_v58 = vsel %vm572_vm8, %v12676_v0, %v7251_v30  ;;  %v12683_v0 = vld [vmem:[#allocation11_spill] sm:$0xff] }
 0x8b3   : > { %v7053_v47 = vsel %vm1552_vm1, %v7051_v50, %v12070_v52  ;;  %v7321_v16 = vsel %vm576_vm10, %v7319_v58, %v7256_v5  ;;  %v6784_v58 = vsel %vm576_vm10, %v6782_v27, %v12683_v0  ;;  %v12694_v27 = vld [vmem:[#allocation20_spill] sm:$0xff] }
 0x8b5   : > { %v7005_v11 = vpop.permute.xlu1 %7004  ;;  %v7261_v14 = vpop.permute.xlu0 %7260 }
 0x8b6   : > { %v12150_v63 = vsel %vm1555_vm2, %v7053_v47, %v7005_v11  ;;  %v7323_v9 = vsel %vm579_vm11, %v7321_v16, %v7261_v14  ;;  %v12684_v47 = vld [vmem:[#allocation74_spill] sm:$0xff] }
 0x8b7   : > { %v7325_v40 = vsel %vm1546_vm9, %v7323_v9, %v7266_v23  ;;  %v12685_v9 = vld [vmem:[#allocation23_spill] sm:$0xff] }
 0x8b9   : > { %v7291_v13 = vpop.permute.xlu1 %7290  ;;  %v7271_v7 = vpop.permute.xlu0 %7270 }
 0x8ba   : > { %v12155_v32 = vsel %vm1549_vm14, %v7325_v40, %v7271_v7  ;;  %v6786_v40 = vsel %vm579_vm11, %v6784_v58, %v12685_v9  ;;  %v12686_v7 = vld [vmem:[#allocation18_spill] sm:$0xff] }
 0x8bd   : > { %v7301_v31 = vpop.permute.xlu1 %7300  ;;  %v6439_v3 = vpop.permute.xlu0 %6438 }
 0x8c1   : > { %v7010_v10 = vpop.permute.xlu1 %7009  ;;  %v6163_v52 = vpop.permute.xlu0 %6162 }
 0x8c2   : > { %v7058_v5 = vsel %vm572_vm8, %v12677_v26, %v7010_v10  ;;  %v12687_v10 = vld [vmem:[#allocation31_spill] sm:$0xff] }
 0x8c3   : > { %v7060_v36 = vsel %vm576_vm10, %v7058_v5, %v7015_v53  ;;  %v12688_v5 = vld [vmem:[#allocation15_spill] sm:$0xff] }
 0x8c5   : > { %v7020_v21 = vpop.permute.xlu1 %7019  ;;  %v12160_v34 = vpop.permute.xlu0 %6448 }
 0x8c6   : > { %v7062_v19 = vsel %vm579_vm11, %v7060_v36, %v7020_v21 }
 0x8c7   : > { %v7064_v56 = vsel %vm1546_vm9, %v7062_v19, %v7025_v37  ;;  %v12682_v37 = vld [vmem:[#allocation19_spill] sm:$0xff] }
 0x8c9   : > { %v7030_v23 = vpop.permute.xlu1 %7029  ;;  %v6128_v55 = vpop.permute.xlu0 %6127 }
 0x8ca   : > { %v7066_v22 = vsel %vm1549_vm14, %v7064_v56, %v7030_v23  ;;  %v12689_v56 = vld [vmem:[#allocation22_spill] sm:$0xff] }
 0x8cb   : > { %v12166_v42 = vsel %vm1552_vm1, %v7066_v22, %v7035_v48  ;;  %v6767_v48 = vsel %vm572_vm8, %v12682_v37, %v12681_v1  ;;  %v6788_v23 = vsel %vm1546_vm9, %v6786_v40, %v12689_v56  ;;  %v12690_v22 = vld [vmem:[#allocation12_spill] sm:$0xff] }
 0x8cc   : > { %v6769_v16 = vsel %vm576_vm10, %v6767_v48, %v12684_v47  ;;  %v12695_v37 = vld [vmem:[#allocation32_spill] sm:$0xff] }
 0x8cd   : > { %v12168_v39 = vpop.permute.xlu1 %7039  ;;  %v6414_v12 = vpop.permute.xlu0 %6413 }
 0x8ce   : > { %v7070_v0 = vsel %vm1555_vm2, %v12166_v42, %v12168_v39 }
 0x8cf   : > { %v7370_v9 = vrot.slane %v7070_v0, 2 }
 0x8d1   : > { %v7286_v29 = vpop.permute.xlu1 %7285  ;;  %v6138_v2 = vpop.permute.xlu0 %6137 }
 0x8d2   : > { %v7334_v60 = vsel %vm572_vm8, %v12678_v59, %v7286_v29 }
 0x8d3   : > { %v7336_v41 = vsel %vm576_vm10, %v7334_v60, %v7291_v13 }
 0x8d5   : > { %v7296_v20 = vpop.permute.xlu1 %7295  ;;  %v6424_v51 = vpop.permute.xlu0 %6423 }
 0x8d6   : > { %v7338_v45 = vsel %vm579_vm11, %v7336_v41, %v7296_v20 }
 0x8d7   : > { %v12175_v49 = vsel %vm1546_vm9, %v7338_v45, %v7301_v31  ;;  %v6771_v31 = vsel %vm579_vm11, %v6769_v16, %v12686_v7 }
 0x8d9   : > { %v6404_v6 = vpop.permute.xlu1 %6403  ;;  %v6434_v53 = vpop.permute.xlu0 %6433 }
 0x8da   : > { %v6482_v26 = vsel %vm572_vm8, %v12687_v10, %v6434_v53 }
 0x8db   : > { %v6484_v29 = vsel %vm576_vm10, %v6482_v26, %v6439_v3 }
 0x8dd   : > { %v6173_v57 = vpop.permute.xlu1 %6172  ;;  %v6158_v46 = vpop.permute.xlu0 %6157 }
 0x8de   : > { %v6206_v36 = vsel %vm572_vm8, %v12688_v5, %v6158_v46 }
 0x8df   : > { %v6208_v59 = vsel %vm576_vm10, %v6206_v36, %v6163_v52 }
 0x8e1   : > { %v6459_v15 = vpop.permute.xlu1 %6458  ;;  %v6444_v25 = vpop.permute.xlu0 %6443 }
 0x8e2   : > { %v6486_v41 = vsel %vm579_vm11, %v6484_v29, %v6444_v25 }
 0x8e3   : > { %v6488_v52 = vsel %vm1546_vm9, %v6486_v41, %v12160_v34  ;;  %v12696_v34 = vld [vmem:[#allocation33_spill] sm:$0xff] }
 0x8e5   : > { %v6183_v4 = vpop.permute.xlu1 %6182  ;;  %v6133_v24 = vpop.permute.xlu0 %6132 }
 0x8e9   : > { %v6148_v61 = vpop.permute.xlu1 %6147  ;;  %v6419_v38 = vpop.permute.xlu0 %6418 }
 0x8ed   : > { %v6399_v35 = vpop.permute.xlu1 %6398  ;;  %v6143_v18 = vpop.permute.xlu0 %6142 }
 0x8ee   : > { %v6467_v54 = vsel %vm572_vm8, %v11917_v8, %v6399_v35 }
 0x8ef   : > { %v6469_v30 = vsel %vm576_vm10, %v6467_v54, %v6404_v6  ;;  %v12691_v6 = vld [vmem:[#allocation41_spill] sm:$0xff] }
 0x8f0   : > { %v6790_v53 = vsel %vm1549_vm14, %v6788_v23, %v12691_v6 }
 0x8f1   : > { %v6123_v62 = vpop.permute.xlu1 %6122  ;;  %v6429_v43 = vpop.permute.xlu0 %6428 }
 0x8f2   : > { %v6191_v17 = vsel %vm572_vm8, %v11846_v33, %v6123_v62  ;;  %v12693_v62 = vld [vmem:[#allocation57_spill] sm:$0xff] }
 0x8f3   : > { %v6193_v14 = vsel %vm576_vm10, %v6191_v17, %v6128_v55 }
 0x8f4   : > { %v6195_v21 = vsel %vm579_vm11, %v6193_v14, %v6133_v24 }
 0x8f5   : > { %v6409_v50 = vpop.permute.xlu1 %6408  ;;  %v6188_v19 = vpop.permute.xlu0 %6187  ;;  %v6197_v45 = vsel %vm1546_vm9, %v6195_v21, %v6138_v2  ;;  %v6792_v2 = vsel %vm1552_vm1, %v6790_v53, %v12693_v62 }
 0x8f6   : > { %v6471_v8 = vsel %vm579_vm11, %v6469_v30, %v6409_v50  ;;  %v6794_v17 = vsel %vm1555_vm2, %v6792_v2, %v12696_v34 }
 0x8f7   : > { %v6473_v11 = vsel %vm1546_vm9, %v6471_v8, %v6414_v12  ;;  %v6773_v12 = vsel %vm1546_vm9, %v6771_v31, %v12690_v22 }
 0x8f8   : > { %v6475_v33 = vsel %vm1549_vm14, %v6473_v11, %v6419_v38  ;;  %v6199_v38 = vsel %vm1549_vm14, %v6197_v45, %v6143_v18  ;;  %v7366_v11 = vrot.slane %v6794_v17, 4 }
 0x8f9   : > { %v6168_v13 = vpop.permute.xlu1 %6167  ;;  %v6477_v55 = vsel %vm1552_vm1, %v6475_v33, %v6424_v51  ;;  %v12692_v51 = vld [vmem:[#allocation73_spill] sm:$0xff]  ;;  %v6153_v3 = vpop.permute.xlu0 %6152  ;;  %v6201_v48 = vsel %vm1552_vm1, %v6199_v38, %v6148_v61  ;;  %v7369_v33 = vrot.slane %v12150_v63, 2 }
 0x8fa   : > { %v6210_v20 = vsel %vm579_vm11, %v6208_v59, %v6168_v13  ;;  %v6479_v46 = vsel %vm1555_vm2, %v6477_v55, %v6429_v43  ;;  %v6775_v24 = vsel %vm1549_vm14, %v6773_v12, %v12692_v51 }
 0x8fb   : > { %v6212_v25 = vsel %vm1546_vm9, %v6210_v20, %v6173_v57  ;;  %v7361_v54 = vrot.slane %v6479_v46, 6  ;;  %v6777_v1 = vsel %vm1552_vm1, %v6775_v24, %v12694_v27  ;;  %v6203_v57 = vsel %vm1555_vm2, %v6201_v48, %v6153_v3 }
 0x8fc   : > { %v6779_v18 = vsel %vm1555_vm2, %v6777_v1, %v12695_v37 }
 0x8fd   : > { %v6454_v60 = vpop.permute.xlu1 %6453  ;;  %v7388_v58 = vsel %vm7371_vm6, %v6203_v57, %v7361_v54  ;;  %v7365_v47 = vrot.slane %v6779_v18, 4  ;;  %v7276_v61 = vpop.permute.xlu0 %7275 }
 0x8fe   : > { %v6490_v44 = vsel %vm1549_vm14, %v6488_v52, %v6454_v60  ;;  %v7329_v10 = vsel %vm1552_vm1, %v12155_v32, %v7276_v61  ;;  %v7401_v32 = vld [vmem:[%s12275_s6] sm:$0x3] }
 0x8ff   : > { %v6492_v50 = vsel %vm1552_vm1, %v6490_v44, %v6459_v15  ;;  %v7392_v15 = vsel %vm351_vm0, %v7388_v58, %v7365_v47 }
 0x900   : > { %v7396_v13 = vsel %vm7380_vm12, %v7392_v15, %v7369_v33 }
 0x901   : > { %v6178_v35 = vpop.permute.xlu1 %6177  ;;  %v7281_v7 = vpop.permute.xlu0 %7280 }
 0x902   : > { %v6214_v28 = vsel %vm1549_vm14, %v6212_v25, %v6178_v35  ;;  %v7331_v26 = vsel %vm1555_vm2, %v7329_v10, %v7281_v7 }
 0x903   : > { %v6216_v43 = vsel %vm1552_vm1, %v6214_v28, %v6183_v4 }
 0x904   : > { %v6218_v14 = vsel %vm1555_vm2, %v6216_v43, %v6188_v19  ;;  %v7412_v19 = vsel %vm7371_vm6, %v7331_v26, 0 }
 0x905   : > { %v6464_v30 = vpop.permute.xlu1 %6463 }
 0x906   : > { %v6494_v8 = vsel %vm1555_vm2, %v6492_v50, %v6464_v30 }
 0x907   : > { %v7362_v16 = vrot.slane %v6494_v8, 6 }
 0x909   : > { %v7306_v40 = vpop.permute.xlu1 %7305  ;;  %v7390_v4 = vsel %vm7371_vm6, %v6218_v14, %v7362_v16 }
 0x90a   : > { %v7394_v42 = vsel %vm351_vm0, %v7390_v4, %v7366_v11  ;;  %v7342_v5 = vsel %vm1549_vm14, %v12175_v49, %v7306_v40  ;;  %vm7408_vm0 = vcmask 293888  }
 0x90b   : > { %v7399_v39 = vsel %vm7380_vm12, %v7394_v42, %v7370_v9 }
 0x90c   : > { %7418 = vmatprep.subr.bf16.mxu1 %v7399_v39 }
 0x90d   : > { %v7311_v31 = vpop.permute.xlu1 %7310  ;;  %7419 = vmatpush1.bf16.msra.mxu1 %v7396_v13 }
 0x90e   : > { %v7344_v63 = vsel %vm1552_vm1, %v7342_v5, %v7311_v31 }
 0x911   : > { %v7316_v36 = vpop.permute.xlu1 %7315 }
 0x912   : > { %v7346_v21 = vsel %vm1555_vm2, %v7344_v63, %v7316_v36  ;;  %v7406_v56 = vpop.permute.xlu0 %7405 }
 0x913   : > { %7846 = vmatprep.subr.msk.bf16.mxu1 %vm7371_vm6, %v7346_v21 }
 0x914   : > { %7421 = vmatpush1.bf16.msra.mxu1 %v7412_v19 }
 0x917   : > { %7847 = vmatmul.mubr.msk.bf16.vlgmr.msra.gmra.mrb[4].mxu1 %vm7408_vm0, %v7401_v32 }
 0x9ea   : > { %v7450_v23 = vpop.f32.mrb[4].mxu1 }
 0x9eb   : > { %v7451_v55 = vadd.f32 %v7450_v23, %v7406_v56  ;;  %v7452_v49 = vpop.f32.mrb[5].mxu1 }
 0x9ec   : > { %v7453_v22 = vadd.f32 %v7452_v49, %v7406_v56  ;;  %v7454_v12 = vpop.f32.mrb[6].mxu1 }
 0x9ed   : > { %v7457_v29 = vmax.f32 %v7451_v55, 0.0  ;;  %v7455_v59 = vpop.f32.mrb[7].mxu1 }
 0x9ee   : > { %v7458_v60 = vmax.f32 %v7453_v22, 0.0 }
 0x9f0   : > { %v7461_v41 = vcombine.low %v7457_v29, %v7458_v60 }
 0x9f2   : > { %7848 = vst.sshfl [vmem:[%s323_s20] sm:$0xff pattern:$0x75316420] %v7461_v41 }
 0x9f3 PF: > { %s18_s27 = sadd.s32 1, %s7997_s27  }
 0x9f4   : > { %p15_p4 = scmp.ge.s32.totalorder %s18_s27, 4  }
 0x9f6   :  { %17 = sbr.rel (!%p15_p4) target bundleno = 1 (0x1), region = 86 }

</bundles_post_ra>
